<compile_context>
chip_gen: v5e
topology: v5e:2x2
jax: 0.10.0
libtpu: 0.0.40
codegen_flags: <defaults>
</compile_context>

<pallas_src>
import functools

import jax
import jax.numpy as jnp
from jax.experimental import pallas as pl
from jax.experimental.pallas import tpu as pltpu


# ----------------------------- in-kernel helpers ----------------------------

def _col_views(a):
    """Three column-shifted views of a (rows, W, C) tile.

    views[kw][r, w] == input column (w + kw - 1), with zeros at the image's W border,
    so the kw shift is hoisted out of the kh loop (3 relayouts instead of 9)."""
    z = jnp.zeros_like(a[:, :1, :])
    left = jnp.concatenate([z, a[:, :-1, :]], axis=1)      # kw = 0
    right = jnp.concatenate([a[:, 1:, :], z], axis=1)      # kw = 2
    return (left, a, right)


def _accumulate(views, w_ref, acc_ref, tile_h, width, fold):
    """3x3 conv of the (tile_h+2, W, Cin) bf16 halo views into the f32 VMEM accumulator."""
    cin = views[1].shape[-1]
    m = tile_h * width
    if fold:
        # Tiny Cin: fold the 9 taps into the contraction -> one (M, 9*Cin) @ (9*Cin, Cp) matmul.
        wide = jnp.concatenate(views, axis=-1)                        # (tile_h+2, W, 3*Cin)
        patch = jnp.concatenate(
            [wide[kh:kh + tile_h].reshape(m, 3 * cin) for kh in range(3)],
            axis=-1)                                                  # (M, 9*Cin), (kh,kw,ci) order
        acc_ref[...] = jnp.dot(patch, w_ref[...], preferred_element_type=jnp.float32)
    else:
        first = True
        for kh in range(3):
            for kw in range(3):
                patch = views[kw][kh:kh + tile_h].reshape(m, cin)
                contrib = jnp.dot(patch, w_ref[kh * 3 + kw],
                                  preferred_element_type=jnp.float32)
                if first:
                    acc_ref[...] = contrib        # first tap overwrites (no zero-init pass)
                    first = False
                else:
                    acc_ref[...] += contrib


def _emit(acc_ref, y_ref, stats_ref, j, tile_h, width, valid_h, out_mask):
    """Write the conv tile (bf16) plus per-channel [sum, sum_sq] partials (rows 0/1)."""
    acc = acc_ref[...]
    cp = acc.shape[-1]
    if out_mask:   # zero output rows that fall in the H padding before taking stats
        a3 = acc.reshape(tile_h, width, cp)
        grow = jax.lax.broadcasted_iota(jnp.int32, a3.shape, 0) + j * tile_h
        acc = jnp.where(grow < valid_h, a3, 0.0).reshape(tile_h * width, cp)
    y_ref[...] = acc.reshape(1, 1, tile_h, width, cp).astype(y_ref.dtype)
    s = jnp.sum(acc, axis=0, keepdims=True)
    q = jnp.sum(acc * acc, axis=0, keepdims=True)
    stats_ref[...] = jnp.concatenate(
        [s, q, jnp.zeros((6, cp), jnp.float32)], axis=0)[None, None]


def _row_halo_mask(a, j, tile_h, valid_h):
    """Zero rows of the assembled (tile_h+2, W, C) tile that lie outside the valid image
    (handles the edge-clamped halo rows and any H padding)."""
    grow = jax.lax.broadcasted_iota(jnp.int32, a.shape, 0) + (j * tile_h - 1)
    return jnp.where((grow >= 0) & (grow < valid_h), a, 0.0)


# ------------------------------- conv kernels -------------------------------

def _conv3x3_kernel(top_ref, mid_ref, bot_ref, w_ref, y_ref, stats_ref, acc_ref,
                    *, tile_h, width, valid_h, fold, out_mask):
    # Inputs are (1, rows, W, Cin) bf16 row-blocks of the raw image (no HBM halo staging):
    # one 1-row block above, the tile_h-row body, one 1-row block below.
    j = pl.program_id(1)
    a = jnp.concatenate([top_ref[0], mid_ref[0], bot_ref[0]], axis=0)   # (tile_h+2, W, Cin)
    a = _row_halo_mask(a, j, tile_h, valid_h)          # zero padding at the image's H border
    _accumulate(_col_views(a), w_ref, acc_ref, tile_h, width, fold)
    _emit(acc_ref, y_ref, stats_ref, j, tile_h, width, valid_h, out_mask)


def _bnrelu_conv3x3_kernel(top_ref, mid_ref, bot_ref, scale_ref, shift_ref, w_ref,
                           y_ref, stats_ref, acc_ref,
                           *, tile_h, width, valid_h, fold, out_mask):
    # Same, but the inputs are the *pre-BN* conv-1 output; BN1 + ReLU run here as a prologue
    # (one f32 affine, one bf16 downcast) so the activation never re-visits HBM for BN.
    j = pl.program_id(1)
    a = jnp.concatenate([top_ref[0], mid_ref[0], bot_ref[0]], axis=0).astype(jnp.float32)
    scale = scale_ref[...].reshape(1, 1, -1)
    shift = shift_ref[...].reshape(1, 1, -1)
    a = jnp.maximum(a * scale + shift, 0.0)
    a = _row_halo_mask(a, j, tile_h, valid_h)          # conv-2's zero padding applies post-ReLU
    a = a.astype(jnp.bfloat16)                         # single downcast; bf16 into the MXU
    _accumulate(_col_views(a), w_ref, acc_ref, tile_h, width, fold)
    _emit(acc_ref, y_ref, stats_ref, j, tile_h, width, valid_h, out_mask)


def _bn_relu_kernel(y_ref, scale_ref, shift_ref, o_ref):
    y = y_ref[...].astype(jnp.float32)
    scale = scale_ref[...].reshape(1, 1, 1, 1, -1)
    shift = shift_ref[...].reshape(1, 1, 1, 1, -1)
    o_ref[...] = jnp.maximum(y * scale + shift, 0.0).astype(o_ref.dtype)


# ------------------------------- host helpers -------------------------------

def _round_up(x, m):
    return ((x + m - 1) // m) * m


def _vmem_capacity_bytes():
    try:
        cap = int(pltpu.get_tpu_info().vmem_capacity_bytes)
        return min(max(cap, 32 * 2 ** 20), 128 * 2 ** 20)
    except Exception:
        return 64 * 2 ** 20     # conservative fallback (v7x has 64 MiB per TensorCore)


def _pick_tile_h(h, width, vmem_cap):
    # ~512 output rows/step on 64 MiB parts (v7x), ~1024 on 128 MiB parts (v5e/v6e),
    # then re-balance so the last tile is nearly full (avoids degenerate tile_h=1 for odd H).
    target_rows = 1024 if vmem_cap >= 96 * 2 ** 20 else 512
    tile_h = max(1, min(h, target_rows // max(width, 1)))
    n_tiles = -(-h // tile_h)
    return -(-h // n_tiles)


def _conv_vmem_budget(tile_h, width, cin, cp, fold, vmem_cap):
    m = tile_h * width
    halo = (tile_h + 2) * width * cin
    inputs = 2 * (halo * 2)                               # double-buffered body + halo rows (bf16)
    wts = 2 * 9 * cin * cp * 2
    outs = 2 * (m * cp * 2 + 8 * cp * 4)
    acc = m * cp * 4
    work = 4 * halo * 2 + halo * 4 + (m * 9 * cin * 2 if fold else 0)
    est = inputs + wts + outs + acc + work
    cap = int(0.65 * vmem_cap)                            # headroom for compiler scratch
    return max(16 * 2 ** 20, min(cap, 2 * est))


def _prep_weight(w, cin_pad, cout_pad, fold):
    # (3, 3, Cin, Cout) -> zero-padded (9, cin_pad, cout_pad) bf16, or (9*cin_pad, cout_pad)
    # when the taps are folded into the contraction.
    _, _, cin, cout = w.shape
    wp = jnp.zeros((3, 3, cin_pad, cout_pad), jnp.float32)
    wp = wp.at[:, :, :cin, :cout].set(w.astype(jnp.float32))
    wp = wp.reshape(9, cin_pad, cout_pad)
    if fold:
        wp = wp.reshape(9 * cin_pad, cout_pad)
    return wp.astype(jnp.bfloat16)


def _pad_channels(v, n, fill):
    return jnp.pad(v.astype(jnp.float32), (0, n - v.shape[0]), constant_values=fill)


def _bn_scale_shift(stats, gamma_p, beta_p, count, eps):
    # TODO(synk): the tiny cross-tile/cross-image reduction of the per-tile BN partial sums
    # (training-mode batch statistics) stays in plain JAX glue.
    total = stats[:, :, 0, :].sum(axis=(0, 1))
    total_sq = stats[:, :, 1, :].sum(axis=(0, 1))
    mean = total / count
    var = jnp.maximum(total_sq / count - mean * mean, 0.0)   # biased var (PyTorch training BN)
    scale = gamma_p * jax.lax.rsqrt(var + eps)
    shift = beta_p - mean * scale
    return scale, shift


# ------------------------------ pallas drivers -------------------------------

def _conv_layer(img, w_flat, scale_shift, tile_h, width, valid_h, vmem_cap):
    """img: (N, Hp, W, Cin) bf16 (Hp a multiple of tile_h).  Returns
       y     (N, T, tile_h, W, Cp) bf16  (pre-BN conv output; reshapes freely to (N, Hp, W, Cp))
       stats (N, T, 8, Cp)  f32          (row 0 = per-channel sum, row 1 = sum of squares)."""
    n, hp, _, cin = img.shape
    t = hp // tile_h
    cp = w_flat.shape[-1]
    fold = w_flat.ndim == 2
    out_mask = hp > valid_h

    # Overlapping (tile_h+2)-row halo windows are expressed directly against the image in HBM:
    # a tile_h-row body block plus two single-row blocks (edge-clamped); no HBM staging.
    top_spec = pl.BlockSpec((1, 1, width, cin),
                            lambda i, j: (i, jnp.maximum(j * tile_h - 1, 0), 0, 0))
    mid_spec = pl.BlockSpec((1, tile_h, width, cin), lambda i, j: (i, j, 0, 0))
    bot_spec = pl.BlockSpec((1, 1, width, cin),
                            lambda i, j: (i, jnp.minimum((j + 1) * tile_h, hp - 1), 0, 0))
    # TODO(synk): on v7x, single-buffer the grid-constant weight/scale/shift operands with
    # pipeline_mode=pl.Buffered(1) once that path is verified on the target jax version.
    w_spec = pl.BlockSpec(w_flat.shape, lambda i, j: (0,) * w_flat.ndim)

    kparams = dict(tile_h=tile_h, width=width, valid_h=valid_h, fold=fold, out_mask=out_mask)
    if scale_shift is None:
        kernel = functools.partial(_conv3x3_kernel, **kparams)
        args = (img, img, img, w_flat)
        in_specs = [top_spec, mid_spec, bot_spec, w_spec]
    else:
        scale, shift = scale_shift
        vec_spec = pl.BlockSpec((1, cin), lambda i, j: (0, 0))
        kernel = functools.partial(_bnrelu_conv3x3_kernel, **kparams)
        args = (img, img, img,
                scale.reshape(1, cin).astype(jnp.float32),
                shift.reshape(1, cin).astype(jnp.float32),
                w_flat)
        in_specs = [top_spec, mid_spec, bot_spec, vec_spec, vec_spec, w_spec]

    return pl.pallas_call(
        kernel,
        out_shape=(jax.ShapeDtypeStruct((n, t, tile_h, width, cp), jnp.bfloat16),
                   jax.ShapeDtypeStruct((n, t, 8, cp), jnp.float32)),
        grid_spec=pltpu.PrefetchScalarGridSpec(
            num_scalar_prefetch=0,
            grid=(n, t),
            in_specs=in_specs,
            out_specs=[pl.BlockSpec((1, 1, tile_h, width, cp), lambda i, j: (i, j, 0, 0, 0)),
                       pl.BlockSpec((1, 1, 8, cp), lambda i, j: (i, j, 0, 0))],
            scratch_shapes=[pltpu.VMEM((tile_h * width, cp), jnp.float32)]),
        compiler_params=pltpu.CompilerParams(
            dimension_semantics=("parallel", "parallel"),
            vmem_limit_bytes=_conv_vmem_budget(tile_h, width, cin, cp, fold, vmem_cap)),
    )(*args)


def _bn_relu(y, scale, shift, vmem_cap):
    # y: (N, T, tile_h, W, Cp) bf16; lane-dense elementwise BN + ReLU, f32 output.
    n, t, tile_h, width, cp = y.shape
    block = (1, 1, tile_h, width, cp)
    vmem = max(16 * 2 ** 20, min(int(0.65 * vmem_cap), 8 * tile_h * width * cp * 6))
    return pl.pallas_call(
        _bn_relu_kernel,
        out_shape=jax.ShapeDtypeStruct(y.shape, jnp.float32),
        grid_spec=pltpu.PrefetchScalarGridSpec(
            num_scalar_prefetch=0,
            grid=(n, t),
            in_specs=[pl.BlockSpec(block, lambda i, j: (i, j, 0, 0, 0)),
                      pl.BlockSpec((1, cp), lambda i, j: (0, 0)),
                      pl.BlockSpec((1, cp), lambda i, j: (0, 0))],
            out_specs=pl.BlockSpec(block, lambda i, j: (i, j, 0, 0, 0)),
        ),
        compiler_params=pltpu.CompilerParams(
            dimension_semantics=("parallel", "parallel"),
            vmem_limit_bytes=vmem),
    )(y, scale.reshape(1, cp).astype(jnp.float32), shift.reshape(1, cp).astype(jnp.float32))


# ------------------------------- forward ------------------------------------

def double_conv_forward(x_nchw, p, eps=1e-5):
    """DoubleConv forward (training-mode BatchNorm statistics).  NCHW in, NCHW f32 out."""
    n, cin, h, width = x_nchw.shape
    c1 = p["w1"].shape[-1]
    c2 = p["w2"].shape[-1]
    c1p = _round_up(c1, 128)
    c2p = _round_up(c2, 128)

    vmem_cap = _vmem_capacity_bytes()
    tile_h = _pick_tile_h(h, width, vmem_cap)
    hp = _round_up(h, tile_h)
    count = float(n * h * width)

    # NCHW -> NHWC and a single cast to bf16 (one fused pass); pad H only if tile_h does not
    # divide H (pad rows are masked out of the conv outputs and BN statistics).
    x = jnp.transpose(x_nchw, (0, 2, 3, 1)).astype(jnp.bfloat16)
    if hp > h:
        x = jnp.pad(x, ((0, 0), (0, hp - h), (0, 0), (0, 0)))

    fold1 = cin * 9 <= 256          # tiny-Cin first layer: single K=9*Cin matmul
    w1f = _prep_weight(p["w1"], cin, c1p, fold1)
    w2f = _prep_weight(p["w2"], c1p, c2p, fold=False)
    g1 = _pad_channels(p["g1"], c1p, 1.0)
    b1 = _pad_channels(p["be1"], c1p, 0.0)
    g2 = _pad_channels(p["g2"], c2p, 1.0)
    b2 = _pad_channels(p["be2"], c2p, 0.0)
    # NOTE: conv biases p["b1"], p["b2"] are intentionally not added in compute: with
    # training-mode BatchNorm directly after each conv, a constant per-channel bias is removed
    # exactly by the mean subtraction, so the forward output is unchanged (verified against the
    # bias-including reference below).  Running-stat buffers / eval-mode BN are out of scope.

    # ---- conv1 (+ fused per-channel sum / sum-of-squares for BN1 batch stats) ----
    y1, st1 = _conv_layer(x, w1f, None, tile_h, width, valid_h=h, vmem_cap=vmem_cap)
    scale1, shift1 = _bn_scale_shift(st1, g1, b1, count, eps)

    # ---- BN1 + ReLU fused as the prologue of conv2 (+ fused BN2 stats) ----
    y1_img = y1.reshape(n, hp, width, c1p)          # free reshape: identical row-major layout
    y2, st2 = _conv_layer(y1_img, w2f, (scale1, shift1), tile_h, width,
                          valid_h=h, vmem_cap=vmem_cap)
    scale2, shift2 = _bn_scale_shift(st2, g2, b2, count, eps)

    # ---- final BN2 + ReLU (lane-dense elementwise pass) ----
    out = _bn_relu(y2, scale2, shift2, vmem_cap)            # (n, t, tile_h, w, c2p) f32
    out = out.reshape(n, hp, width, c2p)[:, :h, :, :c2]
    return jnp.transpose(out, (0, 3, 1, 2))                 # NHWC -> NCHW (XLA glue)


# ------------------------------ params & reference ---------------------------

def init_double_conv_params(key, in_channels, out_channels):
    k1, k2, k3, k4 = jax.random.split(key, 4)
    fan1 = float(in_channels * 9)
    fan2 = float(out_channels * 9)
    # Conv weights stored as (kh, kw, Cin, Cout) (PyTorch stores (Cout, Cin, kh, kw)).
    w1 = jax.random.uniform(k1, (3, 3, in_channels, out_channels), jnp.float32, -1.0, 1.0) / jnp.sqrt(fan1)
    b1 = jax.random.uniform(k2, (out_channels,), jnp.float32, -1.0, 1.0) / jnp.sqrt(fan1)
    w2 = jax.random.uniform(k3, (3, 3, out_channels, out_channels), jnp.float32, -1.0, 1.0) / jnp.sqrt(fan2)
    b2 = jax.random.uniform(k4, (out_channels,), jnp.float32, -1.0, 1.0) / jnp.sqrt(fan2)
    # BatchNorm affine params: PyTorch defaults (gamma=1, beta=0).
    g1 = jnp.ones((out_channels,), jnp.float32)
    be1 = jnp.zeros((out_channels,), jnp.float32)
    g2 = jnp.ones((out_channels,), jnp.float32)
    be2 = jnp.zeros((out_channels,), jnp.float32)
    return dict(w1=w1, b1=b1, g1=g1, be1=be1, w2=w2, b2=b2, g2=g2, be2=be2)


def _reference_forward(x_nchw, p, eps=1e-5):
    # Pure-JAX f32 reference (includes the conv biases; training-mode BN).
    x = jnp.transpose(x_nchw, (0, 2, 3, 1))

    def conv(v, w, b):
        return jax.lax.conv_general_dilated(
            v, w, (1, 1), 'SAME',
            dimension_numbers=('NHWC', 'HWIO', 'NHWC')) + b

    def bn_relu(v, g, b):
        m = v.mean(axis=(0, 1, 2))
        var = v.var(axis=(0, 1, 2))
        return jnp.maximum((v - m) * jax.lax.rsqrt(var + eps) * g + b, 0.0)

    y = bn_relu(conv(x, p["w1"], p["b1"]), p["g1"], p["be1"])
    y = bn_relu(conv(y, p["w2"], p["b2"]), p["g2"], p["be2"])
    return jnp.transpose(y, (0, 3, 1, 2))


if __name__ == "__main__":
    key = jax.random.PRNGKey(0)
    kx, kp = jax.random.split(key)
    in_channels, out_channels = 4, 8
    x = jax.random.normal(kx, (2, in_channels, 16, 16), jnp.float32)   # NCHW, like PyTorch
    params = init_double_conv_params(kp, in_channels, out_channels)

    out = jax.jit(double_conv_forward)(x, params)
    out = jax.block_until_ready(out)
    assert out.shape == (2, out_channels, 16, 16)
    assert bool(jnp.all(out >= 0.0))   # final ReLU

    ref = _reference_forward(x, params)
    err = float(jnp.max(jnp.abs(out - ref)))
    assert err < 0.12, f"max abs error vs reference too large: {err}"
    print("KERNEL_OK")
</pallas_src>

<mosaic_0001>
module attributes {stable_mosaic.version = 11 : i64} {
  func.func @_bn_relu_kernel(%arg0: i32, %arg1: i32, %arg2: memref<1x1x16x16x128xbf16, #tpu.memory_space<vmem>>, %arg3: memref<1x128xf32, #tpu.memory_space<vmem>>, %arg4: memref<1x128xf32, #tpu.memory_space<vmem>>, %arg5: memref<1x1x16x16x128xf32, #tpu.memory_space<vmem>>) attributes {dimension_semantics = [#tpu.dimension_semantics<parallel>, #tpu.dimension_semantics<parallel>], iteration_bounds = array<i64: 2, 1>, scalar_prefetch = 0 : i64, scratch_operands = 0 : i64, tpu.core_type = #tpu.core_type<tc>, window_params = [{transform_indices = @transform_0, window_bounds = array<i64: 1, 1, 16, 16, 128>}, {pipeline_mode = #tpu.pipeline_mode<synchronous>, transform_indices = @transform_1, window_bounds = array<i64: 1, 128>}, {pipeline_mode = #tpu.pipeline_mode<synchronous>, transform_indices = @transform_2, window_bounds = array<i64: 1, 128>}, {transform_indices = @transform_3, window_bounds = array<i64: 1, 1, 16, 16, 128>}]} {
    %c0 = arith.constant 0 : index
    %c0_0 = arith.constant 0 : index
    %c0_1 = arith.constant 0 : index
    %c0_2 = arith.constant 0 : index
    %c0_3 = arith.constant 0 : index
    %0 = vector.load %arg2[%c0, %c0_0, %c0_1, %c0_2, %c0_3] : memref<1x1x16x16x128xbf16, #tpu.memory_space<vmem>>, vector<1x1x16x16x128xbf16>
    %1 = arith.extf %0 : vector<1x1x16x16x128xbf16> to vector<1x1x16x16x128xf32>
    %c0_4 = arith.constant 0 : index
    %c0_5 = arith.constant 0 : index
    %2 = vector.load %arg3[%c0_4, %c0_5] : memref<1x128xf32, #tpu.memory_space<vmem>>, vector<1x128xf32>
    %3 = vector.shape_cast %2 : vector<1x128xf32> to vector<1x1x1x1x128xf32>
    %c0_6 = arith.constant 0 : index
    %c0_7 = arith.constant 0 : index
    %4 = vector.load %arg4[%c0_6, %c0_7] : memref<1x128xf32, #tpu.memory_space<vmem>>, vector<1x128xf32>
    %5 = vector.shape_cast %4 : vector<1x128xf32> to vector<1x1x1x1x128xf32>
    %6 = vector.broadcast %3 : vector<1x1x1x1x128xf32> to vector<1x1x16x16x128xf32>
    %7 = arith.mulf %1, %6 : vector<1x1x16x16x128xf32>
    %8 = vector.broadcast %5 : vector<1x1x1x1x128xf32> to vector<1x1x16x16x128xf32>
    %9 = arith.addf %7, %8 : vector<1x1x16x16x128xf32>
    %cst = arith.constant 0.000000e+00 : f32
    %10 = vector.broadcast %cst : f32 to vector<1x1x16x16x128xf32>
    %11 = arith.maximumf %9, %10 : vector<1x1x16x16x128xf32>
    %c0_8 = arith.constant 0 : index
    %c0_9 = arith.constant 0 : index
    %c0_10 = arith.constant 0 : index
    %c0_11 = arith.constant 0 : index
    %c0_12 = arith.constant 0 : index
    %12 = vector.load %arg5[%c0_8, %c0_9, %c0_10, %c0_11, %c0_12] : memref<1x1x16x16x128xf32, #tpu.memory_space<vmem>>, vector<1x1x16x16x128xf32>
    tpu.vector_store %arg5[%c0_8, %c0_9, %c0_10, %c0_11, %c0_12], %11 {strides = array<i32>} : memref<1x1x16x16x128xf32, #tpu.memory_space<vmem>>, vector<1x1x16x16x128xf32>,
    return
  }
  func.func @transform_0(%arg0: i32, %arg1: i32) -> (i32, i32, i32, i32, i32) {
    %c0_i32 = arith.constant 0 : i32
    %c0_i32_0 = arith.constant 0 : i32
    %c0_i32_1 = arith.constant 0 : i32
    %c0_i32_2 = arith.constant 0 : i32
    return %arg0, %arg1, %c0_i32, %c0_i32_0, %c0_i32_1 : i32, i32, i32, i32, i32
  }
  func.func @transform_1(%arg0: i32, %arg1: i32) -> (i32, i32) {
    %c0_i32 = arith.constant 0 : i32
    %c0_i32_0 = arith.constant 0 : i32
    %c0_i32_1 = arith.constant 0 : i32
    return %c0_i32, %c0_i32_0 : i32, i32
  }
  func.func @transform_2(%arg0: i32, %arg1: i32) -> (i32, i32) {
    %c0_i32 = arith.constant 0 : i32
    %c0_i32_0 = arith.constant 0 : i32
    %c0_i32_1 = arith.constant 0 : i32
    return %c0_i32, %c0_i32_0 : i32, i32
  }
  func.func @transform_3(%arg0: i32, %arg1: i32) -> (i32, i32, i32, i32, i32) {
    %c0_i32 = arith.constant 0 : i32
    %c0_i32_0 = arith.constant 0 : i32
    %c0_i32_1 = arith.constant 0 : i32
    %c0_i32_2 = arith.constant 0 : i32
    return %arg0, %arg1, %c0_i32, %c0_i32_0, %c0_i32_1 : i32, i32, i32, i32, i32
  }
}

module attributes {stable_mosaic.version = 11 : i64} {
  func.func @_conv3x3_kernel(%arg0: i32, %arg1: i32, %arg2: memref<1x1x16x4xbf16, #tpu.memory_space<vmem>>, %arg3: memref<1x16x16x4xbf16, #tpu.memory_space<vmem>>, %arg4: memref<1x1x16x4xbf16, #tpu.memory_space<vmem>>, %arg5: memref<36x128xbf16, #tpu.memory_space<vmem>>, %arg6: memref<1x1x16x16x128xbf16, #tpu.memory_space<vmem>>, %arg7: memref<1x1x8x128xf32, #tpu.memory_space<vmem>>, %arg8: memref<256x128xf32, #tpu.memory_space<vmem>>) attributes {dimension_semantics = [#tpu.dimension_semantics<parallel>, #tpu.dimension_semantics<parallel>], iteration_bounds = array<i64: 2, 1>, scalar_prefetch = 0 : i64, scratch_operands = 1 : i64, tpu.core_type = #tpu.core_type<tc>, window_params = [{transform_indices = @transform_0, window_bounds = array<i64: 1, 1, 16, 4>}, {transform_indices = @transform_1, window_bounds = array<i64: 1, 16, 16, 4>}, {transform_indices = @transform_2, window_bounds = array<i64: 1, 1, 16, 4>}, {pipeline_mode = #tpu.pipeline_mode<synchronous>, transform_indices = @transform_3, window_bounds = array<i64: 36, 128>}, {transform_indices = @transform_4, window_bounds = array<i64: 1, 1, 16, 16, 128>}, {transform_indices = @transform_5, window_bounds = array<i64: 1, 1, 8, 128>}]} {
    %c0 = arith.constant 0 : index
    %c0_0 = arith.constant 0 : index
    %c0_1 = arith.constant 0 : index
    %c0_2 = arith.constant 0 : index
    %0 = vector.load %arg2[%c0, %c0_0, %c0_1, %c0_2] : memref<1x1x16x4xbf16, #tpu.memory_space<vmem>>, vector<1x1x16x4xbf16>
    %1 = vector.shape_cast %0 : vector<1x1x16x4xbf16> to vector<1x16x4xbf16>
    %c0_3 = arith.constant 0 : index
    %c0_4 = arith.constant 0 : index
    %c0_5 = arith.constant 0 : index
    %c0_6 = arith.constant 0 : index
    %2 = vector.load %arg3[%c0_3, %c0_4, %c0_5, %c0_6] : memref<1x16x16x4xbf16, #tpu.memory_space<vmem>>, vector<1x16x16x4xbf16>
    %3 = vector.shape_cast %2 : vector<1x16x16x4xbf16> to vector<16x16x4xbf16>
    %c0_7 = arith.constant 0 : index
    %c0_8 = arith.constant 0 : index
    %c0_9 = arith.constant 0 : index
    %c0_10 = arith.constant 0 : index
    %4 = vector.load %arg4[%c0_7, %c0_8, %c0_9, %c0_10] : memref<1x1x16x4xbf16, #tpu.memory_space<vmem>>, vector<1x1x16x4xbf16>
    %5 = vector.shape_cast %4 : vector<1x1x16x4xbf16> to vector<1x16x4xbf16>
    %6 = tpu.concatenate %1, %3, %5 in 0 : vector<1x16x4xbf16>, vector<16x16x4xbf16>, vector<1x16x4xbf16> -> vector<18x16x4xbf16>
    %7 = tpu.iota {dimensions = array<i32: 0>} : vector<18x16x4xi32>
    %c16_i32 = arith.constant 16 : i32
    %8 = arith.muli %arg1, %c16_i32 : i32
    %c1_i32 = arith.constant 1 : i32
    %9 = arith.subi %8, %c1_i32 : i32
    %10 = vector.broadcast %9 : i32 to vector<18x16x4xi32>
    %11 = arith.addi %7, %10 : vector<18x16x4xi32>
    %c0_i32 = arith.constant 0 : i32
    %12 = vector.broadcast %c0_i32 : i32 to vector<18x16x4xi32>
    %13 = arith.cmpi sge, %11, %12 : vector<18x16x4xi32>
    %c16_i32_11 = arith.constant 16 : i32
    %14 = vector.broadcast %c16_i32_11 : i32 to vector<18x16x4xi32>
    %15 = arith.cmpi slt, %11, %14 : vector<18x16x4xi32>
    %16 = arith.andi %13, %15 : vector<18x16x4xi1>
    %cst = arith.constant 0.000000e+00 : f32
    %17 = arith.truncf %cst : f32 to bf16
    %18 = vector.broadcast %17 : bf16 to vector<18x16x4xbf16>
    %19 = arith.select %16, %6, %18 : vector<18x16x4xi1>, vector<18x16x4xbf16>
    %cst_12 = arith.constant 0.000000e+00 : bf16
    %20 = vector.broadcast %cst_12 : bf16 to vector<18x1x4xbf16>
    %21 = vector.extract_strided_slice %19 {offsets = [0, 0, 0], sizes = [18, 15, 4], strides = [1, 1, 1]} : vector<18x16x4xbf16> to vector<18x15x4xbf16>
    %22 = tpu.concatenate %20, %21 in 1 : vector<18x1x4xbf16>, vector<18x15x4xbf16> -> vector<18x16x4xbf16>
    %23 = vector.extract_strided_slice %19 {offsets = [0, 1, 0], sizes = [18, 15, 4], strides = [1, 1, 1]} : vector<18x16x4xbf16> to vector<18x15x4xbf16>
    %24 = tpu.concatenate %23, %20 in 1 : vector<18x15x4xbf16>, vector<18x1x4xbf16> -> vector<18x16x4xbf16>
    %25 = tpu.concatenate %22, %19, %24 in 2 : vector<18x16x4xbf16>, vector<18x16x4xbf16>, vector<18x16x4xbf16> -> vector<18x16x12xbf16>
    %26 = vector.extract_strided_slice %25 {offsets = [0, 0, 0], sizes = [16, 16, 12], strides = [1, 1, 1]} : vector<18x16x12xbf16> to vector<16x16x12xbf16>
    %27 = vector.shape_cast %26 : vector<16x16x12xbf16> to vector<256x12xbf16>
    %28 = vector.extract_strided_slice %25 {offsets = [1, 0, 0], sizes = [16, 16, 12], strides = [1, 1, 1]} : vector<18x16x12xbf16> to vector<16x16x12xbf16>
    %29 = vector.shape_cast %28 : vector<16x16x12xbf16> to vector<256x12xbf16>
    %30 = vector.extract_strided_slice %25 {offsets = [2, 0, 0], sizes = [16, 16, 12], strides = [1, 1, 1]} : vector<18x16x12xbf16> to vector<16x16x12xbf16>
    %31 = vector.shape_cast %30 : vector<16x16x12xbf16> to vector<256x12xbf16>
    %32 = tpu.concatenate %27, %29, %31 in 1 : vector<256x12xbf16>, vector<256x12xbf16>, vector<256x12xbf16> -> vector<256x36xbf16>
    %c0_13 = arith.constant 0 : index
    %c0_14 = arith.constant 0 : index
    %33 = vector.load %arg5[%c0_13, %c0_14] : memref<36x128xbf16, #tpu.memory_space<vmem>>, vector<36x128xbf16>
    %cst_15 = arith.constant dense<0.000000e+00> : vector<256x128xf32>
    %34 = tpu.matmul %32, %33, %cst_15 {dimension_numbers = #tpu.dot_dimension_numbers<[1], [0], [0], [1], [0, 0, 1, 1], [], []>} : vector<256x36xbf16>, vector<36x128xbf16>, vector<256x128xf32> -> vector<256x128xf32>
    %c0_16 = arith.constant 0 : index
    %c0_17 = arith.constant 0 : index
    %35 = vector.load %arg8[%c0_16, %c0_17] : memref<256x128xf32, #tpu.memory_space<vmem>>, vector<256x128xf32>
    tpu.vector_store %arg8[%c0_16, %c0_17], %34 {strides = array<i32>} : memref<256x128xf32, #tpu.memory_space<vmem>>, vector<256x128xf32>,
    %c0_18 = arith.constant 0 : index
    %c0_19 = arith.constant 0 : index
    %36 = vector.load %arg8[%c0_18, %c0_19] : memref<256x128xf32, #tpu.memory_space<vmem>>, vector<256x128xf32>
    %37 = vector.shape_cast %36 : vector<256x128xf32> to vector<1x1x16x16x128xf32>
    %38 = arith.truncf %37 : vector<1x1x16x16x128xf32> to vector<1x1x16x16x128xbf16>
    %c0_20 = arith.constant 0 : index
    %c0_21 = arith.constant 0 : index
    %c0_22 = arith.constant 0 : index
    %c0_23 = arith.constant 0 : index
    %c0_24 = arith.constant 0 : index
    %39 = vector.load %arg6[%c0_20, %c0_21, %c0_22, %c0_23, %c0_24] : memref<1x1x16x16x128xbf16, #tpu.memory_space<vmem>>, vector<1x1x16x16x128xbf16>
    tpu.vector_store %arg6[%c0_20, %c0_21, %c0_22, %c0_23, %c0_24], %38 {strides = array<i32>} : memref<1x1x16x16x128xbf16, #tpu.memory_space<vmem>>, vector<1x1x16x16x128xbf16>,
    %cst_25 = arith.constant dense<0.000000e+00> : vector<128xf32>
    %40 = vector.multi_reduction <add>, %36, %cst_25 [0] : vector<256x128xf32> to vector<128xf32>
    %41 = vector.shape_cast %40 : vector<128xf32> to vector<1x128xf32>
    %42 = arith.mulf %36, %36 : vector<256x128xf32>
    %cst_26 = arith.constant dense<0.000000e+00> : vector<128xf32>
    %43 = vector.multi_reduction <add>, %42, %cst_26 [0] : vector<256x128xf32> to vector<128xf32>
    %44 = vector.shape_cast %43 : vector<128xf32> to vector<1x128xf32>
    %cst_27 = arith.constant 0.000000e+00 : f32
    %45 = vector.broadcast %cst_27 : f32 to vector<6x128xf32>
    %46 = tpu.concatenate %41, %44, %45 in 0 : vector<1x128xf32>, vector<1x128xf32>, vector<6x128xf32> -> vector<8x128xf32>
    %47 = vector.shape_cast %46 : vector<8x128xf32> to vector<1x1x8x128xf32>
    %c0_28 = arith.constant 0 : index
    %c0_29 = arith.constant 0 : index
    %c0_30 = arith.constant 0 : index
    %c0_31 = arith.constant 0 : index
    %48 = vector.load %arg7[%c0_28, %c0_29, %c0_30, %c0_31] : memref<1x1x8x128xf32, #tpu.memory_space<vmem>>, vector<1x1x8x128xf32>
    tpu.vector_store %arg7[%c0_28, %c0_29, %c0_30, %c0_31], %47 {strides = array<i32>} : memref<1x1x8x128xf32, #tpu.memory_space<vmem>>, vector<1x1x8x128xf32>,
    return
  }
  func.func @transform_0(%arg0: i32, %arg1: i32) -> (i32, i32, i32, i32) {
    %c16_i32 = arith.constant 16 : i32
    %0 = arith.muli %arg1, %c16_i32 : i32
    %c1_i32 = arith.constant 1 : i32
    %1 = arith.subi %0, %c1_i32 : i32
    %c0_i32 = arith.constant 0 : i32
    %2 = arith.maxsi %1, %c0_i32 : i32
    %c0_i32_0 = arith.constant 0 : i32
    %c0_i32_1 = arith.constant 0 : i32
    %c0_i32_2 = arith.constant 0 : i32
    return %arg0, %2, %c0_i32_0, %c0_i32_1 : i32, i32, i32, i32
  }
  func.func @transform_1(%arg0: i32, %arg1: i32) -> (i32, i32, i32, i32) {
    %c0_i32 = arith.constant 0 : i32
    %c0_i32_0 = arith.constant 0 : i32
    %c0_i32_1 = arith.constant 0 : i32
    return %arg0, %arg1, %c0_i32, %c0_i32_0 : i32, i32, i32, i32
  }
  func.func @transform_2(%arg0: i32, %arg1: i32) -> (i32, i32, i32, i32) {
    %c1_i32 = arith.constant 1 : i32
    %0 = arith.addi %arg1, %c1_i32 : i32
    %c16_i32 = arith.constant 16 : i32
    %1 = arith.muli %0, %c16_i32 : i32
    %c15_i32 = arith.constant 15 : i32
    %2 = arith.minsi %1, %c15_i32 : i32
    %c0_i32 = arith.constant 0 : i32
    %c0_i32_0 = arith.constant 0 : i32
    %c0_i32_1 = arith.constant 0 : i32
    return %arg0, %2, %c0_i32, %c0_i32_0 : i32, i32, i32, i32
  }
  func.func @transform_3(%arg0: i32, %arg1: i32) -> (i32, i32) {
    %c0_i32 = arith.constant 0 : i32
    %c0_i32_0 = arith.constant 0 : i32
    %c0_i32_1 = arith.constant 0 : i32
    return %c0_i32, %c0_i32_0 : i32, i32
  }
  func.func @transform_4(%arg0: i32, %arg1: i32) -> (i32, i32, i32, i32, i32) {
    %c0_i32 = arith.constant 0 : i32
    %c0_i32_0 = arith.constant 0 : i32
    %c0_i32_1 = arith.constant 0 : i32
    %c0_i32_2 = arith.constant 0 : i32
    return %arg0, %arg1, %c0_i32, %c0_i32_0, %c0_i32_1 : i32, i32, i32, i32, i32
  }
  func.func @transform_5(%arg0: i32, %arg1: i32) -> (i32, i32, i32, i32) {
    %c0_i32 = arith.constant 0 : i32
    %c0_i32_0 = arith.constant 0 : i32
    %c0_i32_1 = arith.constant 0 : i32
    return %arg0, %arg1, %c0_i32, %c0_i32_0 : i32, i32, i32, i32
  }
}

module attributes {stable_mosaic.version = 11 : i64} {
  func.func @_bnrelu_conv3x3_kernel(%arg0: i32, %arg1: i32, %arg2: memref<1x1x16x128xbf16, #tpu.memory_space<vmem>>, %arg3: memref<1x16x16x128xbf16, #tpu.memory_space<vmem>>, %arg4: memref<1x1x16x128xbf16, #tpu.memory_space<vmem>>, %arg5: memref<1x128xf32, #tpu.memory_space<vmem>>, %arg6: memref<1x128xf32, #tpu.memory_space<vmem>>, %arg7: memref<9x128x128xbf16, #tpu.memory_space<vmem>>, %arg8: memref<1x1x16x16x128xbf16, #tpu.memory_space<vmem>>, %arg9: memref<1x1x8x128xf32, #tpu.memory_space<vmem>>, %arg10: memref<256x128xf32, #tpu.memory_space<vmem>>) attributes {dimension_semantics = [#tpu.dimension_semantics<parallel>, #tpu.dimension_semantics<parallel>], iteration_bounds = array<i64: 2, 1>, scalar_prefetch = 0 : i64, scratch_operands = 1 : i64, tpu.core_type = #tpu.core_type<tc>, window_params = [{transform_indices = @transform_0, window_bounds = array<i64: 1, 1, 16, 128>}, {transform_indices = @transform_1, window_bounds = array<i64: 1, 16, 16, 128>}, {transform_indices = @transform_2, window_bounds = array<i64: 1, 1, 16, 128>}, {pipeline_mode = #tpu.pipeline_mode<synchronous>, transform_indices = @transform_3, window_bounds = array<i64: 1, 128>}, {pipeline_mode = #tpu.pipeline_mode<synchronous>, transform_indices = @transform_4, window_bounds = array<i64: 1, 128>}, {pipeline_mode = #tpu.pipeline_mode<synchronous>, transform_indices = @transform_5, window_bounds = array<i64: 9, 128, 128>}, {transform_indices = @transform_6, window_bounds = array<i64: 1, 1, 16, 16, 128>}, {transform_indices = @transform_7, window_bounds = array<i64: 1, 1, 8, 128>}]} {
    %c0 = arith.constant 0 : index
    %c0_0 = arith.constant 0 : index
    %c0_1 = arith.constant 0 : index
    %c0_2 = arith.constant 0 : index
    %0 = vector.load %arg2[%c0, %c0_0, %c0_1, %c0_2] : memref<1x1x16x128xbf16, #tpu.memory_space<vmem>>, vector<1x1x16x128xbf16>
    %1 = vector.shape_cast %0 : vector<1x1x16x128xbf16> to vector<1x16x128xbf16>
    %c0_3 = arith.constant 0 : index
    %c0_4 = arith.constant 0 : index
    %c0_5 = arith.constant 0 : index
    %c0_6 = arith.constant 0 : index
    %2 = vector.load %arg3[%c0_3, %c0_4, %c0_5, %c0_6] : memref<1x16x16x128xbf16, #tpu.memory_space<vmem>>, vector<1x16x16x128xbf16>
    %3 = vector.shape_cast %2 : vector<1x16x16x128xbf16> to vector<16x16x128xbf16>
    %c0_7 = arith.constant 0 : index
    %c0_8 = arith.constant 0 : index
    %c0_9 = arith.constant 0 : index
    %c0_10 = arith.constant 0 : index
    %4 = vector.load %arg4[%c0_7, %c0_8, %c0_9, %c0_10] : memref<1x1x16x128xbf16, #tpu.memory_space<vmem>>, vector<1x1x16x128xbf16>
    %5 = vector.shape_cast %4 : vector<1x1x16x128xbf16> to vector<1x16x128xbf16>
    %6 = tpu.concatenate %1, %3, %5 in 0 : vector<1x16x128xbf16>, vector<16x16x128xbf16>, vector<1x16x128xbf16> -> vector<18x16x128xbf16>
    %7 = arith.extf %6 : vector<18x16x128xbf16> to vector<18x16x128xf32>
    %c0_11 = arith.constant 0 : index
    %c0_12 = arith.constant 0 : index
    %8 = vector.load %arg5[%c0_11, %c0_12] : memref<1x128xf32, #tpu.memory_space<vmem>>, vector<1x128xf32>
    %9 = vector.shape_cast %8 : vector<1x128xf32> to vector<1x1x128xf32>
    %c0_13 = arith.constant 0 : index
    %c0_14 = arith.constant 0 : index
    %10 = vector.load %arg6[%c0_13, %c0_14] : memref<1x128xf32, #tpu.memory_space<vmem>>, vector<1x128xf32>
    %11 = vector.shape_cast %10 : vector<1x128xf32> to vector<1x1x128xf32>
    %12 = vector.broadcast %9 : vector<1x1x128xf32> to vector<18x16x128xf32>
    %13 = arith.mulf %7, %12 : vector<18x16x128xf32>
    %14 = vector.broadcast %11 : vector<1x1x128xf32> to vector<18x16x128xf32>
    %15 = arith.addf %13, %14 : vector<18x16x128xf32>
    %cst = arith.constant 0.000000e+00 : f32
    %16 = vector.broadcast %cst : f32 to vector<18x16x128xf32>
    %17 = arith.maximumf %15, %16 : vector<18x16x128xf32>
    %18 = tpu.iota {dimensions = array<i32: 0>} : vector<18x16x128xi32>
    %c16_i32 = arith.constant 16 : i32
    %19 = arith.muli %arg1, %c16_i32 : i32
    %c1_i32 = arith.constant 1 : i32
    %20 = arith.subi %19, %c1_i32 : i32
    %21 = vector.broadcast %20 : i32 to vector<18x16x128xi32>
    %22 = arith.addi %18, %21 : vector<18x16x128xi32>
    %c0_i32 = arith.constant 0 : i32
    %23 = vector.broadcast %c0_i32 : i32 to vector<18x16x128xi32>
    %24 = arith.cmpi sge, %22, %23 : vector<18x16x128xi32>
    %c16_i32_15 = arith.constant 16 : i32
    %25 = vector.broadcast %c16_i32_15 : i32 to vector<18x16x128xi32>
    %26 = arith.cmpi slt, %22, %25 : vector<18x16x128xi32>
    %27 = arith.andi %24, %26 : vector<18x16x128xi1>
    %cst_16 = arith.constant 0.000000e+00 : f32
    %28 = vector.broadcast %cst_16 : f32 to vector<18x16x128xf32>
    %29 = arith.select %27, %17, %28 : vector<18x16x128xi1>, vector<18x16x128xf32>
    %30 = arith.truncf %29 : vector<18x16x128xf32> to vector<18x16x128xbf16>
    %cst_17 = arith.constant 0.000000e+00 : bf16
    %31 = vector.broadcast %cst_17 : bf16 to vector<18x1x128xbf16>
    %32 = vector.extract_strided_slice %30 {offsets = [0, 0, 0], sizes = [18, 15, 128], strides = [1, 1, 1]} : vector<18x16x128xbf16> to vector<18x15x128xbf16>
    %33 = tpu.concatenate %31, %32 in 1 : vector<18x1x128xbf16>, vector<18x15x128xbf16> -> vector<18x16x128xbf16>
    %34 = vector.extract_strided_slice %30 {offsets = [0, 1, 0], sizes = [18, 15, 128], strides = [1, 1, 1]} : vector<18x16x128xbf16> to vector<18x15x128xbf16>
    %35 = tpu.concatenate %34, %31 in 1 : vector<18x15x128xbf16>, vector<18x1x128xbf16> -> vector<18x16x128xbf16>
    %36 = vector.extract_strided_slice %33 {offsets = [0, 0, 0], sizes = [16, 16, 128], strides = [1, 1, 1]} : vector<18x16x128xbf16> to vector<16x16x128xbf16>
    %37 = vector.shape_cast %36 : vector<16x16x128xbf16> to vector<256x128xbf16>
    %c0_18 = arith.constant 0 : index
    %c0_19 = arith.constant 0 : index
    %c0_20 = arith.constant 0 : index
    %38 = vector.load %arg7[%c0_18, %c0_19, %c0_20] : memref<9x128x128xbf16, #tpu.memory_space<vmem>>, vector<1x128x128xbf16>
    %39 = vector.shape_cast %38 : vector<1x128x128xbf16> to vector<128x128xbf16>
    %cst_21 = arith.constant dense<0.000000e+00> : vector<256x128xf32>
    %40 = tpu.matmul %37, %39, %cst_21 {dimension_numbers = #tpu.dot_dimension_numbers<[1], [0], [0], [1], [0, 0, 1, 1], [], []>} : vector<256x128xbf16>, vector<128x128xbf16>, vector<256x128xf32> -> vector<256x128xf32>
    %c0_22 = arith.constant 0 : index
    %c0_23 = arith.constant 0 : index
    %41 = vector.load %arg10[%c0_22, %c0_23] : memref<256x128xf32, #tpu.memory_space<vmem>>, vector<256x128xf32>
    tpu.vector_store %arg10[%c0_22, %c0_23], %40 {strides = array<i32>} : memref<256x128xf32, #tpu.memory_space<vmem>>, vector<256x128xf32>,
    %42 = vector.extract_strided_slice %30 {offsets = [0, 0, 0], sizes = [16, 16, 128], strides = [1, 1, 1]} : vector<18x16x128xbf16> to vector<16x16x128xbf16>
    %43 = vector.shape_cast %42 : vector<16x16x128xbf16> to vector<256x128xbf16>
    %c1 = arith.constant 1 : index
    %c0_24 = arith.constant 0 : index
    %c0_25 = arith.constant 0 : index
    %44 = vector.load %arg7[%c1, %c0_24, %c0_25] : memref<9x128x128xbf16, #tpu.memory_space<vmem>>, vector<1x128x128xbf16>
    %45 = vector.shape_cast %44 : vector<1x128x128xbf16> to vector<128x128xbf16>
    %cst_26 = arith.constant dense<0.000000e+00> : vector<256x128xf32>
    %46 = tpu.matmul %43, %45, %cst_26 {dimension_numbers = #tpu.dot_dimension_numbers<[1], [0], [0], [1], [0, 0, 1, 1], [], []>} : vector<256x128xbf16>, vector<128x128xbf16>, vector<256x128xf32> -> vector<256x128xf32>
    %c0_27 = arith.constant 0 : index
    %c0_28 = arith.constant 0 : index
    %47 = vector.load %arg10[%c0_27, %c0_28] : memref<256x128xf32, #tpu.memory_space<vmem>>, vector<256x128xf32>
    %48 = arith.addf %47, %46 : vector<256x128xf32>
    %c0_29 = arith.constant 0 : index
    %c0_30 = arith.constant 0 : index
    %49 = vector.load %arg10[%c0_29, %c0_30] : memref<256x128xf32, #tpu.memory_space<vmem>>, vector<256x128xf32>
    tpu.vector_store %arg10[%c0_29, %c0_30], %48 {strides = array<i32>} : memref<256x128xf32, #tpu.memory_space<vmem>>, vector<256x128xf32>,
    %50 = vector.extract_strided_slice %35 {offsets = [0, 0, 0], sizes = [16, 16, 128], strides = [1, 1, 1]} : vector<18x16x128xbf16> to vector<16x16x128xbf16>
    %51 = vector.shape_cast %50 : vector<16x16x128xbf16> to vector<256x128xbf16>
    %c2 = arith.constant 2 : index
    %c0_31 = arith.constant 0 : index
    %c0_32 = arith.constant 0 : index
    %52 = vector.load %arg7[%c2, %c0_31, %c0_32] : memref<9x128x128xbf16, #tpu.memory_space<vmem>>, vector<1x128x128xbf16>
    %53 = vector.shape_cast %52 : vector<1x128x128xbf16> to vector<128x128xbf16>
    %cst_33 = arith.constant dense<0.000000e+00> : vector<256x128xf32>
    %54 = tpu.matmul %51, %53, %cst_33 {dimension_numbers = #tpu.dot_dimension_numbers<[1], [0], [0], [1], [0, 0, 1, 1], [], []>} : vector<256x128xbf16>, vector<128x128xbf16>, vector<256x128xf32> -> vector<256x128xf32>
    %c0_34 = arith.constant 0 : index
    %c0_35 = arith.constant 0 : index
    %55 = vector.load %arg10[%c0_34, %c0_35] : memref<256x128xf32, #tpu.memory_space<vmem>>, vector<256x128xf32>
    %56 = arith.addf %55, %54 : vector<256x128xf32>
    %c0_36 = arith.constant 0 : index
    %c0_37 = arith.constant 0 : index
    %57 = vector.load %arg10[%c0_36, %c0_37] : memref<256x128xf32, #tpu.memory_space<vmem>>, vector<256x128xf32>
    tpu.vector_store %arg10[%c0_36, %c0_37], %56 {strides = array<i32>} : memref<256x128xf32, #tpu.memory_space<vmem>>, vector<256x128xf32>,
    %58 = vector.extract_strided_slice %33 {offsets = [1, 0, 0], sizes = [16, 16, 128], strides = [1, 1, 1]} : vector<18x16x128xbf16> to vector<16x16x128xbf16>
    %59 = vector.shape_cast %58 : vector<16x16x128xbf16> to vector<256x128xbf16>
    %c3 = arith.constant 3 : index
    %c0_38 = arith.constant 0 : index
    %c0_39 = arith.constant 0 : index
    %60 = vector.load %arg7[%c3, %c0_38, %c0_39] : memref<9x128x128xbf16, #tpu.memory_space<vmem>>, vector<1x128x128xbf16>
    %61 = vector.shape_cast %60 : vector<1x128x128xbf16> to vector<128x128xbf16>
    %cst_40 = arith.constant dense<0.000000e+00> : vector<256x128xf32>
    %62 = tpu.matmul %59, %61, %cst_40 {dimension_numbers = #tpu.dot_dimension_numbers<[1], [0], [0], [1], [0, 0, 1, 1], [], []>} : vector<256x128xbf16>, vector<128x128xbf16>, vector<256x128xf32> -> vector<256x128xf32>
    %c0_41 = arith.constant 0 : index
    %c0_42 = arith.constant 0 : index
    %63 = vector.load %arg10[%c0_41, %c0_42] : memref<256x128xf32, #tpu.memory_space<vmem>>, vector<256x128xf32>
    %64 = arith.addf %63, %62 : vector<256x128xf32>
    %c0_43 = arith.constant 0 : index
    %c0_44 = arith.constant 0 : index
    %65 = vector.load %arg10[%c0_43, %c0_44] : memref<256x128xf32, #tpu.memory_space<vmem>>, vector<256x128xf32>
    tpu.vector_store %arg10[%c0_43, %c0_44], %64 {strides = array<i32>} : memref<256x128xf32, #tpu.memory_space<vmem>>, vector<256x128xf32>,
    %66 = vector.extract_strided_slice %30 {offsets = [1, 0, 0], sizes = [16, 16, 128], strides = [1, 1, 1]} : vector<18x16x128xbf16> to vector<16x16x128xbf16>
    %67 = vector.shape_cast %66 : vector<16x16x128xbf16> to vector<256x128xbf16>
    %c4 = arith.constant 4 : index
    %c0_45 = arith.constant 0 : index
    %c0_46 = arith.constant 0 : index
    %68 = vector.load %arg7[%c4, %c0_45, %c0_46] : memref<9x128x128xbf16, #tpu.memory_space<vmem>>, vector<1x128x128xbf16>
    %69 = vector.shape_cast %68 : vector<1x128x128xbf16> to vector<128x128xbf16>
    %cst_47 = arith.constant dense<0.000000e+00> : vector<256x128xf32>
    %70 = tpu.matmul %67, %69, %cst_47 {dimension_numbers = #tpu.dot_dimension_numbers<[1], [0], [0], [1], [0, 0, 1, 1], [], []>} : vector<256x128xbf16>, vector<128x128xbf16>, vector<256x128xf32> -> vector<256x128xf32>
    %c0_48 = arith.constant 0 : index
    %c0_49 = arith.constant 0 : index
    %71 = vector.load %arg10[%c0_48, %c0_49] : memref<256x128xf32, #tpu.memory_space<vmem>>, vector<256x128xf32>
    %72 = arith.addf %71, %70 : vector<256x128xf32>
    %c0_50 = arith.constant 0 : index
    %c0_51 = arith.constant 0 : index
    %73 = vector.load %arg10[%c0_50, %c0_51] : memref<256x128xf32, #tpu.memory_space<vmem>>, vector<256x128xf32>
    tpu.vector_store %arg10[%c0_50, %c0_51], %72 {strides = array<i32>} : memref<256x128xf32, #tpu.memory_space<vmem>>, vector<256x128xf32>,
    %74 = vector.extract_strided_slice %35 {offsets = [1, 0, 0], sizes = [16, 16, 128], strides = [1, 1, 1]} : vector<18x16x128xbf16> to vector<16x16x128xbf16>
    %75 = vector.shape_cast %74 : vector<16x16x128xbf16> to vector<256x128xbf16>
    %c5 = arith.constant 5 : index
    %c0_52 = arith.constant 0 : index
    %c0_53 = arith.constant 0 : index
    %76 = vector.load %arg7[%c5, %c0_52, %c0_53] : memref<9x128x128xbf16, #tpu.memory_space<vmem>>, vector<1x128x128xbf16>
    %77 = vector.shape_cast %76 : vector<1x128x128xbf16> to vector<128x128xbf16>
    %cst_54 = arith.constant dense<0.000000e+00> : vector<256x128xf32>
    %78 = tpu.matmul %75, %77, %cst_54 {dimension_numbers = #tpu.dot_dimension_numbers<[1], [0], [0], [1], [0, 0, 1, 1], [], []>} : vector<256x128xbf16>, vector<128x128xbf16>, vector<256x128xf32> -> vector<256x128xf32>
    %c0_55 = arith.constant 0 : index
    %c0_56 = arith.constant 0 : index
    %79 = vector.load %arg10[%c0_55, %c0_56] : memref<256x128xf32, #tpu.memory_space<vmem>>, vector<256x128xf32>
    %80 = arith.addf %79, %78 : vector<256x128xf32>
    %c0_57 = arith.constant 0 : index
    %c0_58 = arith.constant 0 : index
    %81 = vector.load %arg10[%c0_57, %c0_58] : memref<256x128xf32, #tpu.memory_space<vmem>>, vector<256x128xf32>
    tpu.vector_store %arg10[%c0_57, %c0_58], %80 {strides = array<i32>} : memref<256x128xf32, #tpu.memory_space<vmem>>, vector<256x128xf32>,
    %82 = vector.extract_strided_slice %33 {offsets = [2, 0, 0], sizes = [16, 16, 128], strides = [1, 1, 1]} : vector<18x16x128xbf16> to vector<16x16x128xbf16>
    %83 = vector.shape_cast %82 : vector<16x16x128xbf16> to vector<256x128xbf16>
    %c6 = arith.constant 6 : index
    %c0_59 = arith.constant 0 : index
    %c0_60 = arith.constant 0 : index
    %84 = vector.load %arg7[%c6, %c0_59, %c0_60] : memref<9x128x128xbf16, #tpu.memory_space<vmem>>, vector<1x128x128xbf16>
    %85 = vector.shape_cast %84 : vector<1x128x128xbf16> to vector<128x128xbf16>
    %cst_61 = arith.constant dense<0.000000e+00> : vector<256x128xf32>
    %86 = tpu.matmul %83, %85, %cst_61 {dimension_numbers = #tpu.dot_dimension_numbers<[1], [0], [0], [1], [0, 0, 1, 1], [], []>} : vector<256x128xbf16>, vector<128x128xbf16>, vector<256x128xf32> -> vector<256x128xf32>
    %c0_62 = arith.constant 0 : index
    %c0_63 = arith.constant 0 : index
    %87 = vector.load %arg10[%c0_62, %c0_63] : memref<256x128xf32, #tpu.memory_space<vmem>>, vector<256x128xf32>
    %88 = arith.addf %87, %86 : vector<256x128xf32>
    %c0_64 = arith.constant 0 : index
    %c0_65 = arith.constant 0 : index
    %89 = vector.load %arg10[%c0_64, %c0_65] : memref<256x128xf32, #tpu.memory_space<vmem>>, vector<256x128xf32>
    tpu.vector_store %arg10[%c0_64, %c0_65], %88 {strides = array<i32>} : memref<256x128xf32, #tpu.memory_space<vmem>>, vector<256x128xf32>,
    %90 = vector.extract_strided_slice %30 {offsets = [2, 0, 0], sizes = [16, 16, 128], strides = [1, 1, 1]} : vector<18x16x128xbf16> to vector<16x16x128xbf16>
    %91 = vector.shape_cast %90 : vector<16x16x128xbf16> to vector<256x128xbf16>
    %c7 = arith.constant 7 : index
    %c0_66 = arith.constant 0 : index
    %c0_67 = arith.constant 0 : index
    %92 = vector.load %arg7[%c7, %c0_66, %c0_67] : memref<9x128x128xbf16, #tpu.memory_space<vmem>>, vector<1x128x128xbf16>
    %93 = vector.shape_cast %92 : vector<1x128x128xbf16> to vector<128x128xbf16>
    %cst_68 = arith.constant dense<0.000000e+00> : vector<256x128xf32>
    %94 = tpu.matmul %91, %93, %cst_68 {dimension_numbers = #tpu.dot_dimension_numbers<[1], [0], [0], [1], [0, 0, 1, 1], [], []>} : vector<256x128xbf16>, vector<128x128xbf16>, vector<256x128xf32> -> vector<256x128xf32>
    %c0_69 = arith.constant 0 : index
    %c0_70 = arith.constant 0 : index
    %95 = vector.load %arg10[%c0_69, %c0_70] : memref<256x128xf32, #tpu.memory_space<vmem>>, vector<256x128xf32>
    %96 = arith.addf %95, %94 : vector<256x128xf32>
    %c0_71 = arith.constant 0 : index
    %c0_72 = arith.constant 0 : index
    %97 = vector.load %arg10[%c0_71, %c0_72] : memref<256x128xf32, #tpu.memory_space<vmem>>, vector<256x128xf32>
    tpu.vector_store %arg10[%c0_71, %c0_72], %96 {strides = array<i32>} : memref<256x128xf32, #tpu.memory_space<vmem>>, vector<256x128xf32>,
    %98 = vector.extract_strided_slice %35 {offsets = [2, 0, 0], sizes = [16, 16, 128], strides = [1, 1, 1]} : vector<18x16x128xbf16> to vector<16x16x128xbf16>
    %99 = vector.shape_cast %98 : vector<16x16x128xbf16> to vector<256x128xbf16>
    %c8 = arith.constant 8 : index
    %c0_73 = arith.constant 0 : index
    %c0_74 = arith.constant 0 : index
    %100 = vector.load %arg7[%c8, %c0_73, %c0_74] : memref<9x128x128xbf16, #tpu.memory_space<vmem>>, vector<1x128x128xbf16>
    %101 = vector.shape_cast %100 : vector<1x128x128xbf16> to vector<128x128xbf16>
    %cst_75 = arith.constant dense<0.000000e+00> : vector<256x128xf32>
    %102 = tpu.matmul %99, %101, %cst_75 {dimension_numbers = #tpu.dot_dimension_numbers<[1], [0], [0], [1], [0, 0, 1, 1], [], []>} : vector<256x128xbf16>, vector<128x128xbf16>, vector<256x128xf32> -> vector<256x128xf32>
    %c0_76 = arith.constant 0 : index
    %c0_77 = arith.constant 0 : index
    %103 = vector.load %arg10[%c0_76, %c0_77] : memref<256x128xf32, #tpu.memory_space<vmem>>, vector<256x128xf32>
    %104 = arith.addf %103, %102 : vector<256x128xf32>
    %c0_78 = arith.constant 0 : index
    %c0_79 = arith.constant 0 : index
    %105 = vector.load %arg10[%c0_78, %c0_79] : memref<256x128xf32, #tpu.memory_space<vmem>>, vector<256x128xf32>
    tpu.vector_store %arg10[%c0_78, %c0_79], %104 {strides = array<i32>} : memref<256x128xf32, #tpu.memory_space<vmem>>, vector<256x128xf32>,
    %c0_80 = arith.constant 0 : index
    %c0_81 = arith.constant 0 : index
    %106 = vector.load %arg10[%c0_80, %c0_81] : memref<256x128xf32, #tpu.memory_space<vmem>>, vector<256x128xf32>
    %107 = vector.shape_cast %106 : vector<256x128xf32> to vector<1x1x16x16x128xf32>
    %108 = arith.truncf %107 : vector<1x1x16x16x128xf32> to vector<1x1x16x16x128xbf16>
    %c0_82 = arith.constant 0 : index
    %c0_83 = arith.constant 0 : index
    %c0_84 = arith.constant 0 : index
    %c0_85 = arith.constant 0 : index
    %c0_86 = arith.constant 0 : index
    %109 = vector.load %arg8[%c0_82, %c0_83, %c0_84, %c0_85, %c0_86] : memref<1x1x16x16x128xbf16, #tpu.memory_space<vmem>>, vector<1x1x16x16x128xbf16>
    tpu.vector_store %arg8[%c0_82, %c0_83, %c0_84, %c0_85, %c0_86], %108 {strides = array<i32>} : memref<1x1x16x16x128xbf16, #tpu.memory_space<vmem>>, vector<1x1x16x16x128xbf16>,
    %cst_87 = arith.constant dense<0.000000e+00> : vector<128xf32>
    %110 = vector.multi_reduction <add>, %106, %cst_87 [0] : vector<256x128xf32> to vector<128xf32>
    %111 = vector.shape_cast %110 : vector<128xf32> to vector<1x128xf32>
    %112 = arith.mulf %106, %106 : vector<256x128xf32>
    %cst_88 = arith.constant dense<0.000000e+00> : vector<128xf32>
    %113 = vector.multi_reduction <add>, %112, %cst_88 [0] : vector<256x128xf32> to vector<128xf32>
    %114 = vector.shape_cast %113 : vector<128xf32> to vector<1x128xf32>
    %cst_89 = arith.constant 0.000000e+00 : f32
    %115 = vector.broadcast %cst_89 : f32 to vector<6x128xf32>
    %116 = tpu.concatenate %111, %114, %115 in 0 : vector<1x128xf32>, vector<1x128xf32>, vector<6x128xf32> -> vector<8x128xf32>
    %117 = vector.shape_cast %116 : vector<8x128xf32> to vector<1x1x8x128xf32>
    %c0_90 = arith.constant 0 : index
    %c0_91 = arith.constant 0 : index
    %c0_92 = arith.constant 0 : index
    %c0_93 = arith.constant 0 : index
    %118 = vector.load %arg9[%c0_90, %c0_91, %c0_92, %c0_93] : memref<1x1x8x128xf32, #tpu.memory_space<vmem>>, vector<1x1x8x128xf32>
    tpu.vector_store %arg9[%c0_90, %c0_91, %c0_92, %c0_93], %117 {strides = array<i32>} : memref<1x1x8x128xf32, #tpu.memory_space<vmem>>, vector<1x1x8x128xf32>,
    return
  }
  func.func @transform_0(%arg0: i32, %arg1: i32) -> (i32, i32, i32, i32) {
    %c16_i32 = arith.constant 16 : i32
    %0 = arith.muli %arg1, %c16_i32 : i32
    %c1_i32 = arith.constant 1 : i32
    %1 = arith.subi %0, %c1_i32 : i32
    %c0_i32 = arith.constant 0 : i32
    %2 = arith.maxsi %1, %c0_i32 : i32
    %c0_i32_0 = arith.constant 0 : i32
    %c0_i32_1 = arith.constant 0 : i32
    %c0_i32_2 = arith.constant 0 : i32
    return %arg0, %2, %c0_i32_0, %c0_i32_1 : i32, i32, i32, i32
  }
  func.func @transform_1(%arg0: i32, %arg1: i32) -> (i32, i32, i32, i32) {
    %c0_i32 = arith.constant 0 : i32
    %c0_i32_0 = arith.constant 0 : i32
    %c0_i32_1 = arith.constant 0 : i32
    return %arg0, %arg1, %c0_i32, %c0_i32_0 : i32, i32, i32, i32
  }
  func.func @transform_2(%arg0: i32, %arg1: i32) -> (i32, i32, i32, i32) {
    %c1_i32 = arith.constant 1 : i32
    %0 = arith.addi %arg1, %c1_i32 : i32
    %c16_i32 = arith.constant 16 : i32
    %1 = arith.muli %0, %c16_i32 : i32
    %c15_i32 = arith.constant 15 : i32
    %2 = arith.minsi %1, %c15_i32 : i32
    %c0_i32 = arith.constant 0 : i32
    %c0_i32_0 = arith.constant 0 : i32
    %c0_i32_1 = arith.constant 0 : i32
    return %arg0, %2, %c0_i32, %c0_i32_0 : i32, i32, i32, i32
  }
  func.func @transform_3(%arg0: i32, %arg1: i32) -> (i32, i32) {
    %c0_i32 = arith.constant 0 : i32
    %c0_i32_0 = arith.constant 0 : i32
    %c0_i32_1 = arith.constant 0 : i32
    return %c0_i32, %c0_i32_0 : i32, i32
  }
  func.func @transform_4(%arg0: i32, %arg1: i32) -> (i32, i32) {
    %c0_i32 = arith.constant 0 : i32
    %c0_i32_0 = arith.constant 0 : i32
    %c0_i32_1 = arith.constant 0 : i32
    return %c0_i32, %c0_i32_0 : i32, i32
  }
  func.func @transform_5(%arg0: i32, %arg1: i32) -> (i32, i32, i32) {
    %c0_i32 = arith.constant 0 : i32
    %c0_i32_0 = arith.constant 0 : i32
    %c0_i32_1 = arith.constant 0 : i32
    %c0_i32_2 = arith.constant 0 : i32
    return %c0_i32, %c0_i32_0, %c0_i32_1 : i32, i32, i32
  }
  func.func @transform_6(%arg0: i32, %arg1: i32) -> (i32, i32, i32, i32, i32) {
    %c0_i32 = arith.constant 0 : i32
    %c0_i32_0 = arith.constant 0 : i32
    %c0_i32_1 = arith.constant 0 : i32
    %c0_i32_2 = arith.constant 0 : i32
    return %arg0, %arg1, %c0_i32, %c0_i32_0, %c0_i32_1 : i32, i32, i32, i32, i32
  }
  func.func @transform_7(%arg0: i32, %arg1: i32) -> (i32, i32, i32, i32) {
    %c0_i32 = arith.constant 0 : i32
    %c0_i32_0 = arith.constant 0 : i32
    %c0_i32_1 = arith.constant 0 : i32
    return %arg0, %arg1, %c0_i32, %c0_i32_0 : i32, i32, i32, i32
  }
}

</mosaic_0001>

<bundles_post_ra>
// kernel: double_conv_forward.5
= control target key start
LH: loop header
LB: loop body
LE: loop exit
PB: predicated region body
PF: predicated region fallthrough
CT: control target
= control target key end

     0   :  { %s661_s12 = smov 0   ;;  %s663_s13 = smov 0   ;;  %s824_s0 = inlined_call_operand.vmem [shape: bf16[2,1,16,16,128], index: 0, kind: input, shape index: {}]   ;;  %s825_s1 = inlined_call_operand.vmem [shape: f32[1,128], index: 1, kind: input, shape index: {}]   ;;  %s826_s2 = inlined_call_operand.vmem [shape: f32[1,128], index: 2, kind: input, shape index: {}]   ;;  %s827_s3 = inlined_call_operand.vmem [shape: f32[2,1,16,16,128], index: 3, kind: output, shape index: {}]  }
   0x1   :  { %s665_s14 = smov 0  }
   0x2 LB: > { %s25_s15 = sadd.s32 1, %s635_s13  ;;  %p503_p0 = scmp.ge.s32.totalorder %s639_s14, 1  ;;  %s639_s14 = sphi %s665_s14, %s13_s14   ;;  %s635_s13 = sphi %s663_s13, %s829_s13   ;;  %s631_s12 = sphi %s661_s12, %s828_s12  }
   0x3   : > { %p27_p1 = scmp.ge.s32.totalorder %s25_s15, 2  ;;  %p157_p2 = scmp.lt.s32.totalorder %s639_s14, 3 }
   0x5   : > { %s831_s15 = smov (%p27_p1, %s25_s15), 0  ;;  %p158_p3 = pnand %p503_p0, %p157_p2 }
   0x6   : > { %p189_p4 = scmp.lt.s32.totalorder (!%p158_p3), %s631_s12, 1 }
   0x7   : > { %161 = sbr.rel (%p158_p3) target bundleno = 56 (0x38), region = 32 }
   0xc   : > { %s833_s12 = smov (!%p189_p4, %s631_s12), 1  ;;  %v690_v0 = vld [vmem:[%s825_s1] ss:$0 sm:$0xff] }
   0xd   : > { %s510_s16 = sshll.u32 %s833_s12, 7  ;;  %v698_v5 = vld [vmem:[%s826_s2] ss:$0 sm:$0xff]  ;;  %s511_s24 = sshll.u32 %s833_s12, 8 }
   0xe   : > { %s685_s19 = scalar_lea.vmem %s824_s0, %s510_s16  ;;  %s717_s27 = scalar_lea.vmem %s827_s3, %s511_s24 }
   0xf   : > { %v513_v1 = vld [vmem:[%s685_s19] sm:$0xff]   ;;  %v576_v2 = vld [vmem:[%s685_s19 + $0x8] sm:$0xff]   ;;  %v577_v3 = vld [vmem:[%s685_s19 + $0x10] sm:$0xff]  }
  0x10   : > { %v514_v4 = vunpack.c.l.bf16 %v513_v1  ;;  %v515_v6 = vunpack.c.h.bf16 %v513_v1  ;;  %v518_v7 = vunpack.c.l.bf16 %v576_v2  ;;  %v519_v8 = vunpack.c.h.bf16 %v576_v2  ;;  %v578_v9 = vld [vmem:[%s685_s19 + $0x18] sm:$0xff]   ;;  %v579_v30 = vld [vmem:[%s685_s19 + $0x20] sm:$0xff]   ;;  %v580_v31 = vld [vmem:[%s685_s19 + $0x28] sm:$0xff]  }
  0x11   : > { %v522_v10 = vunpack.c.l.bf16 %v577_v3  ;;  %v523_v11 = vunpack.c.h.bf16 %v577_v3  ;;  %v526_v12 = vunpack.c.l.bf16 %v578_v9  ;;  %v527_v13 = vunpack.c.h.bf16 %v578_v9  ;;  %v581_v36 = vld [vmem:[%s685_s19 + $0x30] sm:$0xff]   ;;  %v582_v37 = vld [vmem:[%s685_s19 + $0x38] sm:$0xff]   ;;  %v583_v3 = vld [vmem:[%s685_s19 + $0x40] sm:$0xff]  }
  0x12   : > { %v276_v14 = vmul.f32 %v690_v0, %v514_v4  ;;  %v277_v15 = vmul.f32 %v690_v0, %v515_v6  ;;  %v278_v16 = vmul.f32 %v690_v0, %v518_v7  ;;  %v279_v17 = vmul.f32 %v690_v0, %v519_v8  ;;  %v584_v4 = vld [vmem:[%s685_s19 + $0x48] sm:$0xff]   ;;  %v585_v6 = vld [vmem:[%s685_s19 + $0x50] sm:$0xff]  }
  0x13   : > { %v280_v18 = vmul.f32 %v690_v0, %v522_v10  ;;  %v281_v19 = vmul.f32 %v690_v0, %v523_v11  ;;  %v282_v20 = vmul.f32 %v690_v0, %v526_v12  ;;  %v283_v21 = vmul.f32 %v690_v0, %v527_v13  ;;  %v586_v11 = vld [vmem:[%s685_s19 + $0x58] sm:$0xff]  }
  0x14   : > { %v311_v22 = vadd.f32 %v698_v5, %v276_v14  ;;  %v312_v23 = vadd.f32 %v698_v5, %v277_v15  ;;  %v313_v24 = vadd.f32 %v698_v5, %v278_v16  ;;  %v314_v25 = vadd.f32 %v698_v5, %v279_v17 }
  0x15   : > { %v315_v26 = vadd.f32 %v698_v5, %v280_v18  ;;  %v316_v27 = vadd.f32 %v698_v5, %v281_v19  ;;  %v317_v28 = vadd.f32 %v698_v5, %v282_v20  ;;  %v318_v29 = vadd.f32 %v698_v5, %v283_v21 }
  0x16   : > { %v343_v32 = vmax.f32 %v311_v22, 0.0  ;;  %v344_v33 = vmax.f32 %v312_v23, 0.0  ;;  %v345_v34 = vmax.f32 %v313_v24, 0.0  ;;  %v346_v35 = vmax.f32 %v314_v25, 0.0 }
  0x17   : > { %v347_v38 = vmax.f32 %v315_v26, 0.0  ;;  %v348_v39 = vmax.f32 %v316_v27, 0.0  ;;  %v349_v40 = vmax.f32 %v317_v28, 0.0  ;;  %v350_v41 = vmax.f32 %v318_v29, 0.0 }
  0x18   : > { %375 = vst [vmem:[%s717_s27] sm:$0xff] %v343_v32  ;;  %v530_v42 = vunpack.c.l.bf16 %v579_v30  ;;  %v531_v43 = vunpack.c.h.bf16 %v579_v30  ;;  %v534_v44 = vunpack.c.l.bf16 %v580_v31  ;;  %v535_v45 = vunpack.c.h.bf16 %v580_v31 }
  0x19   : > { %376 = vst [vmem:[%s717_s27 + $0x8] sm:$0xff] %v344_v33  ;;  %v538_v46 = vunpack.c.l.bf16 %v581_v36  ;;  %v539_v47 = vunpack.c.h.bf16 %v581_v36  ;;  %v542_v48 = vunpack.c.l.bf16 %v582_v37  ;;  %v543_v49 = vunpack.c.h.bf16 %v582_v37 }
  0x1a   : > { %377 = vst [vmem:[%s717_s27 + $0x10] sm:$0xff] %v345_v34  ;;  %v284_v50 = vmul.f32 %v690_v0, %v530_v42  ;;  %v285_v51 = vmul.f32 %v690_v0, %v531_v43  ;;  %v286_v52 = vmul.f32 %v690_v0, %v534_v44  ;;  %v287_v53 = vmul.f32 %v690_v0, %v535_v45  ;;  %v589_v42 = vld [vmem:[%s685_s19 + $0x70] sm:$0xff]  }
  0x1b   : > { %378 = vst [vmem:[%s717_s27 + $0x18] sm:$0xff] %v346_v35  ;;  %v288_v54 = vmul.f32 %v690_v0, %v538_v46  ;;  %v289_v55 = vmul.f32 %v690_v0, %v539_v47  ;;  %v290_v56 = vmul.f32 %v690_v0, %v542_v48  ;;  %v291_v57 = vmul.f32 %v690_v0, %v543_v49  ;;  %v590_v47 = vld [vmem:[%s685_s19 + $0x78] sm:$0xff]  }
  0x1c   : > { %379 = vst [vmem:[%s717_s27 + $0x20] sm:$0xff] %v347_v38  ;;  %v319_v58 = vadd.f32 %v698_v5, %v284_v50  ;;  %v320_v59 = vadd.f32 %v698_v5, %v285_v51  ;;  %v321_v60 = vadd.f32 %v698_v5, %v286_v52  ;;  %v322_v61 = vadd.f32 %v698_v5, %v287_v53 }
  0x1d   : > { %380 = vst [vmem:[%s717_s27 + $0x28] sm:$0xff] %v348_v39  ;;  %v323_v62 = vadd.f32 %v698_v5, %v288_v54  ;;  %v324_v63 = vadd.f32 %v698_v5, %v289_v55  ;;  %v325_v1 = vadd.f32 %v698_v5, %v290_v56  ;;  %v326_v2 = vadd.f32 %v698_v5, %v291_v57 }
  0x1e   : > { %381 = vst [vmem:[%s717_s27 + $0x30] sm:$0xff] %v349_v40  ;;  %v351_v7 = vmax.f32 %v319_v58, 0.0  ;;  %v352_v8 = vmax.f32 %v320_v59, 0.0  ;;  %v353_v9 = vmax.f32 %v321_v60, 0.0  ;;  %v354_v10 = vmax.f32 %v322_v61, 0.0  ;;  %v587_v40 = vld [vmem:[%s685_s19 + $0x60] sm:$0xff]  }
  0x1f   : > { %382 = vst [vmem:[%s717_s27 + $0x38] sm:$0xff] %v350_v41  ;;  %v355_v12 = vmax.f32 %v323_v62, 0.0  ;;  %v356_v13 = vmax.f32 %v324_v63, 0.0  ;;  %v357_v14 = vmax.f32 %v325_v1, 0.0  ;;  %v358_v15 = vmax.f32 %v326_v2, 0.0  ;;  %v588_v41 = vld [vmem:[%s685_s19 + $0x68] sm:$0xff]  }
  0x20   : > { %383 = vst [vmem:[%s717_s27 + $0x40] sm:$0xff] %v351_v7  ;;  %v546_v16 = vunpack.c.l.bf16 %v583_v3  ;;  %v547_v17 = vunpack.c.h.bf16 %v583_v3  ;;  %v550_v18 = vunpack.c.l.bf16 %v584_v4  ;;  %v551_v19 = vunpack.c.h.bf16 %v584_v4 }
  0x21   : > { %384 = vst [vmem:[%s717_s27 + $0x48] sm:$0xff] %v352_v8  ;;  %v554_v20 = vunpack.c.l.bf16 %v585_v6  ;;  %v555_v21 = vunpack.c.h.bf16 %v585_v6  ;;  %v558_v22 = vunpack.c.l.bf16 %v586_v11  ;;  %v559_v23 = vunpack.c.h.bf16 %v586_v11 }
  0x22   : > { %385 = vst [vmem:[%s717_s27 + $0x50] sm:$0xff] %v353_v9  ;;  %v292_v24 = vmul.f32 %v690_v0, %v546_v16  ;;  %v293_v25 = vmul.f32 %v690_v0, %v547_v17  ;;  %v294_v26 = vmul.f32 %v690_v0, %v550_v18  ;;  %v295_v27 = vmul.f32 %v690_v0, %v551_v19 }
  0x23   : > { %386 = vst [vmem:[%s717_s27 + $0x58] sm:$0xff] %v354_v10  ;;  %v296_v28 = vmul.f32 %v690_v0, %v554_v20  ;;  %v297_v29 = vmul.f32 %v690_v0, %v555_v21  ;;  %v298_v30 = vmul.f32 %v690_v0, %v558_v22  ;;  %v299_v31 = vmul.f32 %v690_v0, %v559_v23 }
  0x24   : > { %387 = vst [vmem:[%s717_s27 + $0x60] sm:$0xff] %v355_v12  ;;  %v327_v32 = vadd.f32 %v698_v5, %v292_v24  ;;  %v328_v33 = vadd.f32 %v698_v5, %v293_v25  ;;  %v329_v34 = vadd.f32 %v698_v5, %v294_v26  ;;  %v330_v35 = vadd.f32 %v698_v5, %v295_v27 }
  0x25   : > { %388 = vst [vmem:[%s717_s27 + $0x68] sm:$0xff] %v356_v13  ;;  %v331_v36 = vadd.f32 %v698_v5, %v296_v28  ;;  %v332_v37 = vadd.f32 %v698_v5, %v297_v29  ;;  %v333_v38 = vadd.f32 %v698_v5, %v298_v30  ;;  %v334_v39 = vadd.f32 %v698_v5, %v299_v31 }
  0x26   : > { %389 = vst [vmem:[%s717_s27 + $0x70] sm:$0xff] %v357_v14  ;;  %v359_v43 = vmax.f32 %v327_v32, 0.0  ;;  %v360_v44 = vmax.f32 %v328_v33, 0.0  ;;  %v361_v45 = vmax.f32 %v329_v34, 0.0  ;;  %v362_v46 = vmax.f32 %v330_v35, 0.0 }
  0x27   : > { %390 = vst [vmem:[%s717_s27 + $0x78] sm:$0xff] %v358_v15  ;;  %v363_v48 = vmax.f32 %v331_v36, 0.0  ;;  %v364_v49 = vmax.f32 %v332_v37, 0.0  ;;  %v365_v50 = vmax.f32 %v333_v38, 0.0  ;;  %v366_v51 = vmax.f32 %v334_v39, 0.0 }
  0x28   : > { %391 = vst [vmem:[%s717_s27 + $0x80] sm:$0xff] %v359_v43  ;;  %v562_v52 = vunpack.c.l.bf16 %v587_v40  ;;  %v563_v53 = vunpack.c.h.bf16 %v587_v40  ;;  %v566_v54 = vunpack.c.l.bf16 %v588_v41  ;;  %v567_v55 = vunpack.c.h.bf16 %v588_v41 }
  0x29   : > { %392 = vst [vmem:[%s717_s27 + $0x88] sm:$0xff] %v360_v44  ;;  %v570_v56 = vunpack.c.l.bf16 %v589_v42  ;;  %v571_v57 = vunpack.c.h.bf16 %v589_v42  ;;  %v574_v58 = vunpack.c.l.bf16 %v590_v47  ;;  %v575_v59 = vunpack.c.h.bf16 %v590_v47 }
  0x2a   : > { %393 = vst [vmem:[%s717_s27 + $0x90] sm:$0xff] %v361_v45  ;;  %v300_v60 = vmul.f32 %v690_v0, %v562_v52  ;;  %v301_v61 = vmul.f32 %v690_v0, %v563_v53  ;;  %v302_v62 = vmul.f32 %v690_v0, %v566_v54  ;;  %v303_v63 = vmul.f32 %v690_v0, %v567_v55 }
  0x2b   : > { %394 = vst [vmem:[%s717_s27 + $0x98] sm:$0xff] %v362_v46  ;;  %v304_v1 = vmul.f32 %v690_v0, %v570_v56  ;;  %v305_v2 = vmul.f32 %v690_v0, %v571_v57  ;;  %v306_v3 = vmul.f32 %v690_v0, %v574_v58  ;;  %v307_v4 = vmul.f32 %v690_v0, %v575_v59 }
  0x2c   : > { %395 = vst [vmem:[%s717_s27 + $0xa0] sm:$0xff] %v363_v48  ;;  %v335_v6 = vadd.f32 %v698_v5, %v300_v60  ;;  %v336_v7 = vadd.f32 %v698_v5, %v301_v61  ;;  %v337_v8 = vadd.f32 %v698_v5, %v302_v62  ;;  %v338_v9 = vadd.f32 %v698_v5, %v303_v63 }
  0x2d   : > { %396 = vst [vmem:[%s717_s27 + $0xa8] sm:$0xff] %v364_v49  ;;  %v339_v10 = vadd.f32 %v698_v5, %v304_v1  ;;  %v340_v11 = vadd.f32 %v698_v5, %v305_v2  ;;  %v341_v14 = vadd.f32 %v698_v5, %v306_v3  ;;  %v342_v16 = vadd.f32 %v698_v5, %v307_v4 }
  0x2e   : > { %397 = vst [vmem:[%s717_s27 + $0xb0] sm:$0xff] %v365_v50  ;;  %v367_v0 = vmax.f32 %v335_v6, 0.0  ;;  %v368_v12 = vmax.f32 %v336_v7, 0.0  ;;  %v369_v13 = vmax.f32 %v337_v8, 0.0  ;;  %v370_v15 = vmax.f32 %v338_v9, 0.0 }
  0x2f   : > { %398 = vst [vmem:[%s717_s27 + $0xb8] sm:$0xff] %v366_v51  ;;  %v371_v17 = vmax.f32 %v339_v10, 0.0  ;;  %v372_v18 = vmax.f32 %v340_v11, 0.0  ;;  %v373_v19 = vmax.f32 %v341_v14, 0.0  ;;  %v374_v20 = vmax.f32 %v342_v16, 0.0 }
  0x30   : > { %399 = vst [vmem:[%s717_s27 + $0xc0] sm:$0xff] %v367_v0 }
  0x31   : > { %400 = vst [vmem:[%s717_s27 + $0xc8] sm:$0xff] %v368_v12 }
  0x32   : > { %401 = vst [vmem:[%s717_s27 + $0xd0] sm:$0xff] %v369_v13 }
  0x33   : > { %402 = vst [vmem:[%s717_s27 + $0xd8] sm:$0xff] %v370_v15 }
  0x34   : > { %403 = vst [vmem:[%s717_s27 + $0xe0] sm:$0xff] %v371_v17 }
  0x35   : > { %404 = vst [vmem:[%s717_s27 + $0xe8] sm:$0xff] %v372_v18 }
  0x36   : > { %405 = vst [vmem:[%s717_s27 + $0xf0] sm:$0xff] %v373_v19 }
  0x37   : > { %406 = vst [vmem:[%s717_s27 + $0xf8] sm:$0xff] %v374_v20 }
  0x38 PF: > { %s13_s14 = sadd.s32 1, %s639_s14   ;;  %s828_s12 = smov %s635_s13 }
  0x39   : > { %p10_p5 = scmp.ge.s32.totalorder %s13_s14, 4   ;;  %s829_s13 = smov %s831_s15 }
  0x3b   :  { %12 = sbr.rel (!%p10_p5) target bundleno = 2 (0x2), region = 62 }

// kernel: double_conv_forward.3
= control target key start
LH: loop header
LB: loop body
LE: loop exit
PB: predicated region body
PF: predicated region fallthrough
CT: control target
= control target key end

     0   :  { %s2093_s18 = smov 0   ;;  %s2095_s19 = smov 0   ;;  %s2763_s0 = inlined_call_operand.vmem [shape: bf16[2,16,16,4], index: 0, kind: input, shape index: {}, may-alias: {0,1,2}]   ;;  %s2764_s1 = inlined_call_operand.vmem [shape: bf16[2,16,16,4], index: 1, kind: input, shape index: {}, may-alias: {0,1,2}]   ;;  %s2765_s2 = inlined_call_operand.vmem [shape: bf16[2,16,16,4], index: 2, kind: input, shape index: {}, may-alias: {0,1,2}]   ;;  %s2766_s3 = inlined_call_operand.vmem [shape: bf16[36,128], index: 3, kind: input, shape index: {}]   ;;  %s2767_s4 = inlined_call_operand.vmem [shape: bf16[2,1,16,16,128], index: 4, kind: output, shape index: {0}]   ;;  %s2768_s5 = inlined_call_operand.vmem [shape: f32[2,1,8,128], index: 5, kind: output, shape index: {1}]  }
   0x1   :  { %s2097_s0 = smov 0  }
   0x2 LB: > { %s28_s2 = sadd.s32 1, %s2052_s19  ;;  %p1778_p0 = scmp.ge.s32.totalorder %s2056_s0, 1  ;;  %s2056_s0 = sphi %s2097_s0, %s16_s0   ;;  %s2052_s19 = sphi %s2095_s19, %s2774_s19   ;;  %s2048_s18 = sphi %s2093_s18, %s2773_s18  }
   0x3   : > { %p30_p1 = scmp.ge.s32.totalorder %s28_s2, 2  ;;  %p278_p2 = scmp.lt.s32.totalorder %s2056_s0, 3 }
   0x5   : > { %s2776_s2 = smov (%p30_p1, %s28_s2), 0  ;;  %p279_p3 = pnand %p1778_p0, %p278_p2 }
   0x6   : > { %p366_p4 = scmp.lt.s32.totalorder (!%p279_p3), %s2048_s18, 1  ;;  %s2058_s24 = smov (!%p279_p3), 4  }
   0x7   : > { %282 = sbr.rel (%p279_p3) target bundleno = 611 (0x263), region = 36  ;;  %s2059_s25 = smov (!%p279_p3), 8  }
   0x8   : > { %s2061_s26 = smov (!%p279_p3), 12   ;;  %s2062_s27 = smov (!%p279_p3), 24  }
   0xc   : > { %s2778_s18 = smov (!%p366_p4, %s2048_s18), 1  ;;  %vm865_vm0 = vcmask 1047552   ;;  %vm866_vm1 = vsmask.f32 7424  ;;  %v2060_v49 = vmov 0   ;;  %vm790_vm3 = vcmask 1040384  }
   0xd   : > { %s1879_s20 = sshll.u32 %s2778_s18, 7  ;;  %vm2142_vm2 = vmand %vm865_vm0, %vm866_vm1  ;;  %v592_v50 = vunpack.c.l.b16 %v2060_v49  ;;  %vm791_vm4 = vsmask.f32 256  ;;  %vm976_vm6 = vcmask 31744   ;;  %vm1031_vm7 = vcmask 64512   ;;  %s1787_s12 = sshll.u32 %s2778_s18, 3 }
   0xe   : > { %s2119_s23 = scalar_lea.vmem %s2764_s1, %s1879_s20  ;;  %vm2376_vm5 = vmand %vm790_vm3, %vm791_vm4  ;;  %vm1268_vm8 = vcmask 1041408   ;;  %vm1149_vm9 = vcmask 97280   ;;  %vm1182_vm10 = vcmask 195584   ;;  %vm1235_vm11 = vcmask 293888   ;;  %s2684_s11 = scalar_lea.vmem %s2767_s4, %s1879_s20 }
   0xf   : > { %v2122_v0 = vld [vmem:[%s2119_s23] sm:$0xff]  ;;  %v2125_v1 = vld [vmem:[%s2119_s23 + $0x8] sm:$0xff]  ;;  %v2138_v6 = vld [vmem:[%s2119_s23 + $0x10] sm:$0xff]  ;;  %v2247_v58 = vpack.c.b16 %v592_v50, %v592_v50  ;;  %s408_s15 = scalar_lea.vmem %s2768_s5, %s1787_s12 }
  0x10   : > { %v2128_v2 = vld [vmem:[%s2119_s23 + $0x20] sm:$0xff]  ;;  %888 = vrot.lane.b32.xlu0 %v2122_v0, %s2058_s24  ;;  %v654_v3 = vshrl.u32 %v2122_v0, 16  ;;  %v657_v4 = vshll.u32 %v2122_v0, 16  ;;  %v664_v5 = vshll.u32 %v2125_v1, 16  ;;  %v661_v10 = vshrl.u32 %v2125_v1, 16  ;;  %v2152_v12 = vld [vmem:[%s2119_s23 + $0x28] sm:$0xff] }
  0x11   : > { %896 = vrot.lane.b32.xlu2 %v2128_v2, %s2058_s24  ;;  %v671_v13 = vshll.u32 %v2138_v6, 16  ;;  %v668_v15 = vshrl.u32 %v2138_v6, 16  ;;  %v685_v18 = vshll.u32 %v2128_v2, 16  ;;  %v692_v19 = vshll.u32 %v2152_v12, 16  ;;  %v2180_v26 = vld [vmem:[%s2119_s23 + $0x40] sm:$0xff]  ;;  %v2196_v32 = vld [vmem:[%s2119_s23 + $0x48] sm:$0xff] }
  0x12   : > { %v813_v7 = vrot.slane %v657_v4, 1  ;;  %v815_v11 = vrot.slane %v664_v5, 1  ;;  %v682_v22 = vshrl.u32 %v2128_v2, 16  ;;  %v689_v24 = vshrl.u32 %v2152_v12, 16  ;;  %v2207_v37 = vld [vmem:[%s2119_s23 + $0x30] sm:$0xff]  ;;  %v2215_v40 = vld [vmem:[%s2119_s23 + $0x18] sm:$0xff] }
  0x13   : > { %v817_v16 = vrot.slane %v671_v13, 1  ;;  %v821_v23 = vrot.slane %v685_v18, 1  ;;  %v823_v25 = vrot.slane %v692_v19, 1  ;;  %v713_v30 = vshll.u32 %v2180_v26, 16  ;;  %v2226_v46 = vld [vmem:[%s2119_s23 + $0x68] sm:$0xff]  ;;  %v2254_v61 = vld [vmem:[%s2119_s23 + $0x50] sm:$0xff] }
  0x14   : > { %v814_v9 = vor.u32 %v813_v7, %v654_v3  ;;  %v816_v17 = vor.u32 %v815_v11, %v661_v10  ;;  %v710_v34 = vshrl.u32 %v2180_v26, 16  ;;  %v720_v36 = vshll.u32 %v2196_v32, 16  ;;  %v2267_v11 = vld [vmem:[%s2119_s23 + $0x58] sm:$0xff] }
  0x15   : > { %v818_v20 = vor.u32 %v817_v16, %v668_v15  ;;  %v822_v28 = vor.u32 %v821_v23, %v682_v22  ;;  %v824_v29 = vor.u32 %v823_v25, %v689_v24  ;;  %v829_v35 = vrot.slane %v713_v30, 1 }
  0x16   : > { %v869_v14 = vsel %vm2142_vm2, %v814_v9, 0  ;;  %v870_v21 = vsel %vm2142_vm2, %v816_v17, 0  ;;  %v699_v39 = vshll.u32 %v2207_v37, 16  ;;  %v717_v41 = vshrl.u32 %v2196_v32, 16 }
  0x17   : > { %942 = vrot.lane.b32.xlu1 %v869_v14, %s2059_s25  ;;  %v871_v27 = vsel %vm2142_vm2, %v818_v20, 0  ;;  %v873_v31 = vsel %vm2142_vm2, %v822_v28, 0  ;;  %v874_v33 = vsel %vm2142_vm2, %v824_v29, 0  ;;  %v830_v38 = vor.u32 %v829_v35, %v710_v34  ;;  %v2275_v20 = vld [vmem:[%s2119_s23 + $0x60] sm:$0xff] }
  0x18   : > { %890 = vrot.lane.b32.xlu0 %v2125_v1, %s2058_s24  ;;  %v831_v42 = vrot.slane %v720_v36, 1  ;;  %v696_v44 = vshrl.u32 %v2207_v37, 16  ;;  %v825_v45 = vrot.slane %v699_v39, 1  ;;  %v678_v47 = vshll.u32 %v2215_v40, 16 }
  0x19   : > { %892 = vrot.lane.b32.xlu2 %v2138_v6, %s2058_s24  ;;  %v877_v43 = vsel %vm2142_vm2, %v830_v38, 0  ;;  %v745_v51 = vshrl.u32 %v2226_v46, 16  ;;  %v748_v52 = vshll.u32 %v2226_v46, 16  ;;  %v675_v55 = vshrl.u32 %v2215_v40, 16 }
  0x1a   : > { %v832_v48 = vor.u32 %v831_v42, %v717_v41  ;;  %v826_v53 = vor.u32 %v825_v45, %v696_v44  ;;  %v819_v57 = vrot.slane %v678_v47, 1  ;;  %v650_v7 = vshll.u32 %v2247_v58, 16 }
  0x1b   : > { %v839_v54 = vrot.slane %v748_v52, 1  ;;  %v727_v9 = vshll.u32 %v2254_v61, 16  ;;  %v647_v16 = vshrl.u32 %v2247_v58, 16  ;;  %v731_v25 = vshrl.u32 %v2267_v11, 16 }
  0x1c   : > { %v878_v56 = vsel %vm2142_vm2, %v832_v48, 0  ;;  %v875_v60 = vsel %vm2142_vm2, %v826_v53, 0  ;;  %v820_v63 = vor.u32 %v819_v57, %v675_v55  ;;  %v811_v17 = vrot.slane %v650_v7, 1  ;;  %v2311_v53 = vld [vmem:[%s2119_s23 + $0x38] sm:$0xff] }
  0x1d   : > { %v840_v59 = vor.u32 %v839_v54, %v745_v51  ;;  %v833_v23 = vrot.slane %v727_v9, 1  ;;  %v741_v29 = vshll.u32 %v2275_v20, 16  ;;  %v738_v48 = vshrl.u32 %v2275_v20, 16 }
  0x1e   : > { %v872_v14 = vsel %vm2142_vm2, %v820_v63, 0  ;;  %v812_v28 = vor.u32 %v811_v17, %v647_v16  ;;  %v706_v63 = vshll.u32 %v2311_v53, 16  ;;  %v691_v1 = vrot.slane %v689_v24, 7 }
  0x1f   : > { %944 = vrot.lane.b32.xlu1 %v870_v21, %s2059_s25  ;;  %v882_v62 = vsel %vm2142_vm2, %v840_v59, 0  ;;  %v724_v21 = vshrl.u32 %v2254_v61, 16  ;;  %v837_v49 = vrot.slane %v741_v29, 1  ;;  %v684_v59 = vrot.slane %v682_v22, 7 }
  0x20   : > { %898 = vrot.lane.b32.xlu0 %v2152_v12, %s2058_s24  ;;  %v2303_v45 = vsel %vm2142_vm2, %v812_v28, 0  ;;  %v827_v22 = vrot.slane %v706_v63, 1 }
  0x21   : > { %946 = vrot.lane.b32.xlu2 %v871_v27, %s2059_s25  ;;  %v734_v27 = vshll.u32 %v2267_v11, 16  ;;  %v834_v35 = vor.u32 %v833_v23, %v724_v21  ;;  %v838_v17 = vor.u32 %v837_v49, %v738_v48  ;;  %v687_v49 = vor.u32 %v685_v18, %v684_v59 }
  0x22   : > { %v656_v18 = vrot.slane %v654_v3, 7 }
  0x23   : > { %v798_v24 = vsel %vm2376_vm5, 0, %v687_v49 }
  0x24   : > { %v659_v59 = vor.u32 %v657_v4, %v656_v18 }
  0x26   : > { %v794_v3 = vsel %vm2376_vm5, 0, %v659_v59 }
  0x27   : > { %950 = vrot.lane.b32.xlu1 %v873_v31, %s2059_s25  ;;  %v2289_v31 = vld [vmem:[%s2119_s23 + $0x70] sm:$0xff] }
  0x28   : > { %952 = vrot.lane.b32.xlu0 %v874_v33, %s2059_s25  ;;  %v835_v33 = vrot.slane %v734_v27, 1  ;;  %v752_v38 = vshrl.u32 %v2289_v31, 16  ;;  %v755_v42 = vshll.u32 %v2289_v31, 16 }
  0x29   : > { %906 = vrot.lane.b32.xlu2 %v2196_v32, %s2058_s24 }
  0x2a   : > { %v841_v50 = vrot.slane %v755_v42, 1 }
  0x2c   : > { %v842_v57 = vor.u32 %v841_v50, %v752_v38  ;;  %v881_v50 = vsel %vm2142_vm2, %v838_v17, 0 }
  0x2e   : > { %v883_v23 = vsel %vm2142_vm2, %v842_v57, 0 }
  0x2f   : > { %904 = vrot.lane.b32.xlu1 %v2180_v26, %s2058_s24 }
  0x30   : > { %958 = vrot.lane.b32.xlu0 %v877_v43, %s2059_s25  ;;  %v836_v43 = vor.u32 %v835_v33, %v731_v25 }
  0x31   : > { %894 = vrot.lane.b32.xlu2 %v2215_v40, %s2058_s24 }
  0x32   : > { %v880_v54 = vsel %vm2142_vm2, %v836_v43, 0 }
  0x37   : > { %960 = vrot.lane.b32.xlu1 %v878_v56, %s2059_s25  ;;  %v879_v56 = vsel %vm2142_vm2, %v834_v35, 0 }
  0x38   : > { %900 = vrot.lane.b32.xlu0 %v2207_v37, %s2058_s24 }
  0x39   : > { %954 = vrot.lane.b32.xlu2 %v875_v60, %s2059_s25  ;;  %v703_v60 = vshrl.u32 %v2311_v53, 16 }
  0x3b   : > { %v828_v35 = vor.u32 %v827_v22, %v703_v60 }
  0x3d   : > { %v876_v57 = vsel %vm2142_vm2, %v828_v35, 0  ;;  %v663_v35 = vrot.slane %v661_v10, 7 }
  0x3f   : > { %948 = vrot.lane.b32.xlu1 %v872_v14, %s2059_s25  ;;  %v2326_v14 = vld [vmem:[%s2119_s23 + $0x78] sm:$0xff] }
  0x40   : > { %886 = vrot.lane.b32.xlu0 %v2247_v58, %s2058_s24  ;;  %v759_v28 = vshrl.u32 %v2326_v14, 16  ;;  %v762_v33 = vshll.u32 %v2326_v14, 16 }
  0x41   : > { %908 = vrot.lane.b32.xlu2 %v2254_v61, %s2058_s24 }
  0x42   : > { %v843_v43 = vrot.slane %v762_v33, 1 }
  0x47   : > { %940 = vrot.lane.b32.xlu1 %v2303_v45, %s2059_s25 }
  0x48   : > { %912 = vrot.lane.b32.xlu0 %v2275_v20, %s2058_s24 }
  0x49   : > { %962 = vrot.lane.b32.xlu2 %v879_v56, %s2059_s25  ;;  %v844_v56 = vor.u32 %v843_v43, %v759_v28  ;;  %v666_v43 = vor.u32 %v664_v5, %v663_v35 }
  0x4b   : > { %v884_v22 = vsel %vm2142_vm2, %v844_v56, 0 }
  0x4f   : > { %966 = vrot.lane.b32.xlu1 %v881_v50, %s2059_s25 }
  0x50   : > { %914 = vrot.lane.b32.xlu0 %v2226_v46, %s2058_s24 }
  0x51   : > { %956 = vrot.lane.b32.xlu2 %v876_v57, %s2059_s25  ;;  %v795_v57 = vsel %vm2376_vm5, 0, %v666_v43  ;;  %v698_v43 = vrot.slane %v696_v44, 7 }
  0x53   : > { %v701_v32 = vor.u32 %v699_v39, %v698_v43 }
  0x57   : > { %902 = vrot.lane.b32.xlu1 %v2311_v53, %s2058_s24 }
  0x58   : > { %968 = vrot.lane.b32.xlu0 %v882_v62, %s2059_s25 }
  0x59   : > { %916 = vrot.lane.b32.xlu2 %v2289_v31, %s2058_s24 }
  0x5f   : > { %910 = vrot.lane.b32.xlu1 %v2267_v11, %s2058_s24 }
  0x60   : > { %964 = vrot.lane.b32.xlu0 %v880_v54, %s2059_s25  ;;  %v670_v54 = vrot.slane %v668_v15, 7 }
  0x61   : > { %918 = vrot.lane.b32.xlu2 %v2326_v14, %s2058_s24 }
  0x62   : > { %v673_v0 = vor.u32 %v671_v13, %v670_v54  ;;  %v694_v54 = vor.u32 %v692_v19, %v691_v1 }
  0x64   : > { %v796_v10 = vsel %vm2376_vm5, 0, %v673_v0  ;;  %v799_v12 = vsel %vm2376_vm5, 0, %v694_v54 }
  0x67   : > { %970 = vrot.lane.b32.xlu1 %v883_v23, %s2059_s25 }
  0x68   : > { %972 = vrot.lane.b32.xlu0 %v884_v22, %s2059_s25 }
  0x6b   : > { %v897_v2 = vpop.permute.xlu2 %896 }
  0x73   : > { %v893_v8 = vpop.permute.xlu2 %892 }
  0x74   : > { %v988_v13 = vsel %vm976_vm6, %v796_v10, %v893_v8  ;;  %v712_v8 = vrot.slane %v710_v34, 7 }
  0x76   : > { %v715_v34 = vor.u32 %v713_v30, %v712_v8 }
  0x7b   : > { %v947_v23 = vpop.permute.xlu2 %946 }
  0x7c   : > { %v2403_v18 = vsel %vm1031_vm7, %v988_v13, %v947_v23  ;;  %v994_v23 = vsel %vm976_vm6, %v798_v24, %v897_v2  ;;  %v802_v2 = vsel %vm2376_vm5, 0, %v715_v34 }
  0x82   : > { %v889_v62 = vpop.permute.xlu0 %888 }
  0x83   : > { %v982_v4 = vsel %vm976_vm6, %v794_v3, %v889_v62  ;;  %v907_v6 = vpop.permute.xlu2 %906 }
  0x89   : > { %v943_v15 = vpop.permute.xlu1 %942 }
  0x8a   : > { %v891_v50 = vpop.permute.xlu0 %890  ;;  %v2390_v56 = vsel %vm1031_vm7, %v982_v4, %v943_v15  ;;  %v719_v15 = vrot.slane %v717_v41, 7 }
  0x8b   : > { %1084 = vrot.lane.b32.xlu2 %v2390_v56, %s2061_s26  ;;  %v985_v5 = vsel %vm976_vm6, %v795_v57, %v891_v50  ;;  %v895_v19 = vpop.permute.xlu2 %894  ;;  %v677_v57 = vrot.slane %v675_v55, 7  ;;  %v726_v55 = vrot.slane %v724_v21, 7 }
  0x8c   : > { %v722_v50 = vor.u32 %v720_v36, %v719_v15 }
  0x8d   : > { %v680_v1 = vor.u32 %v678_v47, %v677_v57  ;;  %v649_v47 = vrot.slane %v647_v16, 7  ;;  %v729_v21 = vor.u32 %v727_v9, %v726_v55  ;;  %v740_v9 = vrot.slane %v738_v48, 7 }
  0x8e   : > { %v803_v44 = vsel %vm2376_vm5, 0, %v722_v50  ;;  %v747_v50 = vrot.slane %v745_v51, 7 }
  0x8f   : > { %v1009_v36 = vsel %vm976_vm6, %v803_v44, %v907_v6  ;;  %v797_v39 = vsel %vm2376_vm5, 0, %v680_v1  ;;  %v754_v1 = vrot.slane %v752_v38, 7 }
  0x90   : > { %v991_v6 = vsel %vm976_vm6, %v797_v39, %v895_v19 }
  0x91   : > { %v945_v22 = vpop.permute.xlu1 %944  ;;  %v757_v38 = vor.u32 %v755_v42, %v754_v1 }
  0x92   : > { %v899_v62 = vpop.permute.xlu0 %898  ;;  %v2406_v59 = vsel %vm1031_vm7, %v985_v5, %v945_v22  ;;  %v800_v5 = vsel %vm2376_vm5, 0, %v701_v32 }
  0x93   : > { %1086 = vrot.lane.b32.xlu0 %v2406_v59, %s2061_s26  ;;  %1117 = vrot.lane.b32.xlu1 %v2406_v59, %s2062_s27  ;;  %v997_v3 = vsel %vm976_vm6, %v799_v12, %v899_v62  ;;  %v955_v13 = vpop.permute.xlu2 %954  ;;  %v804_v12 = vsel %vm2376_vm5, 0, %v729_v21  ;;  %v808_v39 = vsel %vm2376_vm5, 0, %v757_v38 }
  0x94   : > { %1119 = vrot.lane.b32.xlu2 %v2403_v18, %s2062_s27 }
  0x99   : > { %v951_v35 = vpop.permute.xlu1 %950 }
  0x9a   : > { %v953_v0 = vpop.permute.xlu0 %952  ;;  %v2425_v4 = vsel %vm1031_vm7, %v994_v23, %v951_v35  ;;  %v652_v23 = vor.u32 %v650_v7, %v649_v47 }
  0x9b   : > { %1092 = vrot.lane.b32.xlu1 %v2425_v4, %s2061_s26  ;;  %v2430_v49 = vsel %vm1031_vm7, %v997_v3, %v953_v0  ;;  %v909_v37 = vpop.permute.xlu2 %908 }
  0x9c   : > { %1125 = vrot.lane.b32.xlu0 %v2430_v49, %s2062_s27  ;;  %v1012_v16 = vsel %vm976_vm6, %v804_v12, %v909_v37  ;;  %v2501_v19 = vsel %vm2376_vm5, 0, %v652_v23  ;;  %v761_v37 = vrot.slane %v759_v28, 7 }
  0x9e   : > { %v764_v21 = vor.u32 %v762_v33, %v761_v37 }
  0xa0   : > { %v809_v14 = vsel %vm2376_vm5, 0, %v764_v21 }
  0xa1   : > { %v905_v10 = vpop.permute.xlu1 %904 }
  0xa2   : > { %v1006_v26 = vsel %vm976_vm6, %v802_v2, %v905_v10  ;;  %v959_v30 = vpop.permute.xlu0 %958  ;;  %v743_v2 = vor.u32 %v741_v29, %v740_v9  ;;  %v750_v29 = vor.u32 %v748_v52, %v747_v50 }
  0xa3   : > { %1088 = vrot.lane.b32.xlu1 %v2403_v18, %s2061_s26  ;;  %v2448_v41 = vsel %vm1031_vm7, %v1006_v26, %v959_v30  ;;  %v963_v61 = vpop.permute.xlu2 %962  ;;  %v705_v26 = vrot.slane %v703_v60, 7 }
  0xa4   : > { %1100 = vrot.lane.b32.xlu2 %v2448_v41, %s2061_s26  ;;  %v2504_v7 = vsel %vm1031_vm7, %v1012_v16, %v963_v61  ;;  %v806_v48 = vsel %vm2376_vm5, 0, %v743_v2  ;;  %v807_v57 = vsel %vm2376_vm5, 0, %v750_v29 }
  0xa5   : > { %v708_v51 = vor.u32 %v706_v63, %v705_v26 }
  0xa7   : > { %v801_v46 = vsel %vm2376_vm5, 0, %v708_v51 }
  0xa9   : > { %v961_v22 = vpop.permute.xlu1 %960 }
  0xaa   : > { %v901_v62 = vpop.permute.xlu0 %900  ;;  %v2466_v54 = vsel %vm1031_vm7, %v1009_v36, %v961_v22  ;;  %v1219_v22 = vld [vmem:[%s2766_s3 + $0x10] sm:$0x3] }
  0xab   : > { %v1000_v24 = vsel %vm976_vm6, %v800_v5, %v901_v62  ;;  %1133 = vrot.lane.b32.xlu0 %v2466_v54, %s2062_s27  ;;  %v957_v63 = vpop.permute.xlu2 %956  ;;  %v1229_v55 = vunpack.c.l.b16 %v1219_v22 }
  0xac   : > { %1094 = vrot.lane.b32.xlu2 %v2430_v49, %s2061_s26  ;;  %v2476_v40 = vsel %vm1031_vm7, %v1000_v24, %v955_v13 }
  0xad   : > { %1127 = vrot.lane.b32.xlu1 %v2476_v40, %s2062_s27  ;;  %v1232_v62 = vpack.c.b16 %v1229_v55, %v1229_v55 }
  0xaf   : > { %v1270_v24 = vsel %vm1268_vm8, %v1232_v62, 0 }
  0xb0   : > { %1277 = vmatpush.bf16.msra.mxu0 %v1270_v24  ;;  %1996 = vmatpush.bf16.msra.mxu1 %v1270_v24 }
  0xb1   : > { %v949_v8 = vpop.permute.xlu1 %948  ;;  %1997 = vmatpush.bf16.msra.mxu2 %v1270_v24  ;;  %1998 = vmatpush.bf16.msra.mxu3 %v1270_v24 }
  0xb2   : > { %v887_v35 = vpop.permute.xlu0 %886  ;;  %v2490_v3 = vsel %vm1031_vm7, %v991_v6, %v949_v8  ;;  %v1900_v6 = vld [vmem:[%s2766_s3 + $0x8] sm:$0xff] }
  0xb3   : > { %1121 = vrot.lane.b32.xlu0 %v2490_v3, %s2062_s27  ;;  %v979_v0 = vsel %vm976_vm6, %v2501_v19, %v887_v35  ;;  %v917_v47 = vpop.permute.xlu2 %916 }
  0xb4   : > { %1278 = vmatpush.bf16.msra.mxu0 %v1900_v6  ;;  %1999 = vmatpush.bf16.msra.mxu1 %v1900_v6 }
  0xb5   : > { %1102 = vrot.lane.b32.xlu1 %v2466_v54, %s2061_s26  ;;  %2000 = vmatpush.bf16.msra.mxu2 %v1900_v6 }
  0xb6   : > { %2001 = vmatpush.bf16.msra.mxu3 %v1900_v6 }
  0xb9   : > { %v941_v34 = vpop.permute.xlu1 %940 }
  0xba   : > { %v2509_v15 = vsel %vm1031_vm7, %v979_v0, %v941_v34  ;;  %v913_v43 = vpop.permute.xlu0 %912 }
  0xbb   : > { %1135 = vrot.lane.b32.xlu0 %v2504_v7, %s2062_s27  ;;  %v1018_v10 = vsel %vm976_vm6, %v806_v48, %v913_v43  ;;  %v919_v33 = vpop.permute.xlu2 %918 }
  0xbc   : > { %v1027_v23 = vsel %vm976_vm6, %v809_v14, %v919_v33 }
  0xc1   : > { %v967_v13 = vpop.permute.xlu1 %966 }
  0xc2   : > { %v915_v30 = vpop.permute.xlu0 %914  ;;  %v2523_v20 = vsel %vm1031_vm7, %v1018_v10, %v967_v13 }
  0xc3   : > { %1096 = vrot.lane.b32.xlu0 %v2476_v40, %s2061_s26  ;;  %1108 = vrot.lane.b32.xlu2 %v2523_v20, %s2061_s26  ;;  %v1021_v44 = vsel %vm976_vm6, %v807_v57, %v915_v30 }
  0xc9   : > { %v903_v60 = vpop.permute.xlu1 %902 }
  0xca   : > { %v969_v32 = vpop.permute.xlu0 %968  ;;  %v1003_v53 = vsel %vm976_vm6, %v801_v46, %v903_v60 }
  0xcb   : > { %920 = vrot.lane.b32.xlu0 %v2247_v58, %s2058_s24  ;;  %1090 = vrot.lane.b32.xlu2 %v2490_v3, %s2061_s26  ;;  %v2543_v52 = vsel %vm1031_vm7, %v1021_v44, %v969_v32  ;;  %v2549_v36 = vsel %vm1031_vm7, %v1003_v53, %v957_v63  ;;  %v733_v58 = vrot.slane %v731_v25, 7 }
  0xcc   : > { %1141 = vrot.lane.b32.xlu1 %v2543_v52, %s2062_s27 }
  0xcd   : > { %v736_v25 = vor.u32 %v734_v27, %v733_v58  ;;  %v1024_v27 = vsel %vm976_vm6, %v808_v39, %v917_v47 }
  0xcf   : > { %v805_v31 = vsel %vm2376_vm5, 0, %v736_v25 }
  0xd1   : > { %v911_v5 = vpop.permute.xlu1 %910 }
  0xd2   : > { %v965_v11 = vpop.permute.xlu0 %964  ;;  %v1015_v28 = vsel %vm976_vm6, %v805_v31, %v911_v5 }
  0xd3   : > { %1110 = vrot.lane.b32.xlu0 %v2543_v52, %s2061_s26  ;;  %1129 = vrot.lane.b32.xlu2 %v2549_v36, %s2062_s27  ;;  %v2595_v12 = vsel %vm1031_vm7, %v1015_v28, %v965_v11 }
  0xd4   : > { %1123 = vrot.lane.b32.xlu1 %v2425_v4, %s2062_s27 }
  0xd9   : > { %v971_v42 = vpop.permute.xlu1 %970 }
  0xda   : > { %v2589_v8 = vsel %vm1031_vm7, %v1024_v27, %v971_v42  ;;  %v973_v35 = vpop.permute.xlu0 %972 }
  0xdb   : > { %1098 = vrot.lane.b32.xlu0 %v2549_v36, %s2061_s26  ;;  %1104 = vrot.lane.b32.xlu2 %v2504_v7, %s2061_s26  ;;  %v1065_v17 = vsel %vm1031_vm7, %v1027_v23, %v973_v35 }
  0xdc   : > { %974 = vrot.lane.b32.xlu1 %v2303_v45, %s2059_s25  ;;  %v1899_v45 = vld [vmem:[%s2766_s3] sm:$0xff] }
  0xdd   : > { %1279 = vmatpush.bf16.msra.mxu0 %v1899_v45  ;;  %2002 = vmatpush.bf16.msra.mxu1 %v1899_v45 }
  0xde   : > { %2003 = vmatpush.bf16.msra.mxu2 %v1899_v45  ;;  %2004 = vmatpush.bf16.msra.mxu3 %v1899_v45 }
  0xe3   : > { %1112 = vrot.lane.b32.xlu0 %v2589_v8, %s2061_s26  ;;  %1143 = vrot.lane.b32.xlu2 %v2589_v8, %s2062_s27 }
  0xe4   : > { %1137 = vrot.lane.b32.xlu1 %v2595_v12, %s2062_s27 }
  0xe5   : > { %v1085_v16 = vpop.permute.xlu2 %1084 }
  0xe6   : > { %v1151_v61 = vsel %vm1149_vm9, %v2509_v15, %v1085_v16 }
  0xeb   : > { %1114 = vrot.lane.b32.xlu0 %v1065_v17, %s2061_s26  ;;  %1106 = vrot.lane.b32.xlu2 %v2595_v12, %s2061_s26 }
  0xec   : > { %1131 = vrot.lane.b32.xlu1 %v2448_v41, %s2062_s27 }
  0xee   : > { %v1120_v34 = vpop.permute.xlu2 %1119 }
  0xf3   : > { %1145 = vrot.lane.b32.xlu2 %v1065_v17, %s2062_s27 }
  0xf4   : > { %1139 = vrot.lane.b32.xlu1 %v2523_v20, %s2062_s27 }
  0xfe   : > { %v1101_v13 = vpop.permute.xlu2 %1100 }
  0xff   : > { %v1167_v51 = vsel %vm1149_vm9, %v2549_v36, %v1101_v13 }
 0x105   : > { %v1087_v9 = vpop.permute.xlu0 %1086  ;;  %v1118_v0 = vpop.permute.xlu1 %1117 }
 0x106   : > { %v1184_v2 = vsel %vm1182_vm10, %v1151_v61, %v1118_v0  ;;  %v1153_v15 = vsel %vm1149_vm9, %v2390_v56, %v1087_v9  ;;  %v1095_v29 = vpop.permute.xlu2 %1094 }
 0x107   : > { %1860 = vmatmul.msk.bf16.vlgmr.msra.gmra.mxu0 %vm1235_vm11, %v1184_v2  ;;  %v1186_v26 = vsel %vm1182_vm10, %v1153_v15, %v1120_v34  ;;  %v1161_v60 = vsel %vm1149_vm9, %v2425_v4, %v1095_v29 }
 0x10d   : > { %v1093_v43 = vpop.permute.xlu1 %1092 }
 0x10e   : > { %v1159_v48 = vsel %vm1149_vm9, %v2490_v3, %v1093_v43  ;;  %v1126_v50 = vpop.permute.xlu0 %1125 }
 0x10f   : > { %v1192_v10 = vsel %vm1182_vm10, %v1159_v48, %v1126_v50 }
 0x110   : > { %1864 = vmatmul.msk.bf16.vlgmr.msra.gmra.mxu1 %vm1235_vm11, %v1192_v10 }
 0x115   : > { %v1089_v30 = vpop.permute.xlu1 %1088 }
 0x116   : > { %v1155_v46 = vsel %vm1149_vm9, %v2406_v59, %v1089_v30 }
 0x117   : > { %1861 = vmatmul.msk.bf16.gmra.mxu0 %vm1235_vm11, %v1186_v26 }
 0x11d   : > { %v1134_v57 = vpop.permute.xlu0 %1133  ;;  %v1109_v32 = vpop.permute.xlu2 %1108 }
 0x11e   : > { %v1200_v3 = vsel %vm1182_vm10, %v1167_v51, %v1134_v57  ;;  %v1175_v62 = vsel %vm1149_vm9, %v2595_v12, %v1109_v32 }
 0x11f   : > { %v1128_v44 = vpop.permute.xlu1 %1127  ;;  %1868 = vmatmul.msk.bf16.vlgmr.msra.gmra.mxu2 %vm1235_vm11, %v1200_v3 }
 0x120   : > { %v1194_v56 = vsel %vm1182_vm10, %v1161_v60, %v1128_v44 }
 0x121   : > { %1865 = vmatmul.msk.bf16.gmra.mxu1 %vm1235_vm11, %v1194_v56 }
 0x125   : > { %v1122_v53 = vpop.permute.xlu0 %1121  ;;  %v1091_v1 = vpop.permute.xlu2 %1090 }
 0x126   : > { %v1188_v63 = vsel %vm1182_vm10, %v1155_v46, %v1122_v53  ;;  %v1157_v47 = vsel %vm1149_vm9, %v2403_v18, %v1091_v1 }
 0x127   : > { %1862 = vmatmul.msk.bf16.gmra.mxu0 %vm1235_vm11, %v1188_v63  ;;  %v1103_v36 = vpop.permute.xlu1 %1102 }
 0x128   : > { %v1169_v4 = vsel %vm1149_vm9, %v2448_v41, %v1103_v36 }
 0x12d   : > { %v1136_v58 = vpop.permute.xlu0 %1135  ;;  %v1130_v55 = vpop.permute.xlu2 %1129 }
 0x12e   : > { %v1202_v5 = vsel %vm1182_vm10, %v1169_v4, %v1136_v58 }
 0x12f   : > { %1869 = vmatmul.msk.bf16.gmra.mxu2 %vm1235_vm11, %v1202_v5 }
 0x135   : > { %v1097_v22 = vpop.permute.xlu0 %1096  ;;  %v1105_v37 = vpop.permute.xlu2 %1104 }
 0x136   : > { %v1163_v59 = vsel %vm1149_vm9, %v2430_v49, %v1097_v22  ;;  %v1171_v12 = vsel %vm1149_vm9, %v2466_v54, %v1105_v37 }
 0x137   : > { %v1196_v38 = vsel %vm1182_vm10, %v1163_v59, %v1130_v55 }
 0x138   : > { %1866 = vmatmul.msk.bf16.gmra.mxu1 %vm1235_vm11, %v1196_v38 }
 0x13d   : > { %v921_v25 = vpop.permute.xlu0 %920  ;;  %v1144_v11 = vpop.permute.xlu2 %1143 }
 0x13e   : > { %v1142_v24 = vpop.permute.xlu1 %1141  ;;  %v1030_v27 = vsel %vm976_vm6, %v2501_v19, %v921_v25 }
 0x13f   : > { %v1208_v41 = vsel %vm1182_vm10, %v1175_v62, %v1142_v24 }
 0x140   : > { %1872 = vmatmul.msk.bf16.vlgmr.msra.gmra.mxu3 %vm1235_vm11, %v1208_v41 }
 0x145   : > { %v1111_v39 = vpop.permute.xlu0 %1110  ;;  %v1107_v18 = vpop.permute.xlu2 %1106 }
 0x146   : > { %v1124_v31 = vpop.permute.xlu1 %1123  ;;  %v1177_v42 = vsel %vm1149_vm9, %v2523_v20, %v1111_v39  ;;  %v1173_v54 = vsel %vm1149_vm9, %v2504_v7, %v1107_v18 }
 0x147   : > { %v1190_v49 = vsel %vm1182_vm10, %v1157_v47, %v1124_v31  ;;  %v1210_v45 = vsel %vm1182_vm10, %v1177_v42, %v1144_v11 }
 0x148   : > { %1863 = vmatmul.msk.bf16.gmra.mxu0 %vm1235_vm11, %v1190_v49 }
 0x14d   : > { %v1099_v21 = vpop.permute.xlu0 %1098  ;;  %v1146_v23 = vpop.permute.xlu2 %1145 }
 0x14e   : > { %v975_v28 = vpop.permute.xlu1 %974  ;;  %v1165_v35 = vsel %vm1149_vm9, %v2476_v40, %v1099_v21 }
 0x14f   : > { %v1067_v6 = vsel %vm1031_vm7, %v1030_v27, %v975_v28 }
 0x150   : > { %1147 = vrot.lane.b32.xlu1 %v1067_v6, %s2062_s27  ;;  %1873 = vmatmul.msk.bf16.gmra.mxu3 %vm1235_vm11, %v1210_v45 }
 0x155   : > { %v1113_v20 = vpop.permute.xlu0 %1112 }
 0x156   : > { %v1138_v14 = vpop.permute.xlu1 %1137  ;;  %v1179_v33 = vsel %vm1149_vm9, %v2543_v52, %v1113_v20 }
 0x157   : > { %v1204_v19 = vsel %vm1182_vm10, %v1171_v12, %v1138_v14  ;;  %v1212_v61 = vsel %vm1182_vm10, %v1179_v33, %v1146_v23 }
 0x158   : > { %1870 = vmatmul.msk.bf16.gmra.mxu2 %vm1235_vm11, %v1204_v19 }
 0x15d   : > { %v1115_v31 = vpop.permute.xlu0 %1114 }
 0x15e   : > { %v1132_v17 = vpop.permute.xlu1 %1131  ;;  %v1181_v49 = vsel %vm1149_vm9, %v2589_v8, %v1115_v31 }
 0x15f   : > { %v1198_v16 = vsel %vm1182_vm10, %v1165_v35, %v1132_v17 }
 0x160   : > { %1867 = vmatmul.msk.bf16.gmra.mxu1 %vm1235_vm11, %v1198_v16  ;;  %1874 = vmatmul.msk.bf16.gmra.mxu3 %vm1235_vm11, %v1212_v61 }
 0x166   : > { %v1140_v9 = vpop.permute.xlu1 %1139 }
 0x167   : > { %v1206_v0 = vsel %vm1182_vm10, %v1173_v54, %v1140_v9 }
 0x168   : > { %1871 = vmatmul.msk.bf16.gmra.mxu2 %vm1235_vm11, %v1206_v0 }
 0x184   : > { %v1281_v52 = vpop.f32.mrf.mxu0 }
 0x185   : > { %v1526_v34 = vmul.f32 %v1281_v52, %v1281_v52 }
 0x18c   : > { %v1283_v40 = vpop.f32.mrf.mxu0 }
 0x18d   : > { %v1904_v2 = vpack.c.bf16 %v1283_v40, %v1281_v52  ;;  %v1489_v43 = vadd.f32 %v1283_v40, %v1281_v52  ;;  %v1527_v48 = vmul.f32 %v1283_v40, %v1283_v40  ;;  %v1301_v7 = vpop.f32.mrf.mxu1 }
 0x18e   : > { %v1534_v33 = vmul.f32 %v1301_v7, %v1301_v7 }
 0x18f   : > { %1905 = vst [vmem:[%s2684_s11] sm:$0xff] %v1904_v2   ;;  %v1558_v50 = vadd.f32 %v1527_v48, %v1526_v34 }
 0x194   : > { %v1286_v10 = vpop.f32.mrf.mxu0 }
 0x195   : > { %v1490_v13 = vadd.f32 %v1489_v43, %v1286_v10  ;;  %v1528_v15 = vmul.f32 %v1286_v10, %v1286_v10  ;;  %v1303_v26 = vpop.f32.mrf.mxu1 }
 0x196   : > { %v1924_v30 = vpack.c.bf16 %v1303_v26, %v1301_v7  ;;  %v1535_v17 = vmul.f32 %v1303_v26, %v1303_v26 }
 0x197   : > { %v1559_v29 = vadd.f32 %v1558_v50, %v1528_v15 }
 0x198   : > { %1984 = vst [vmem:[%s2684_s11 + $0x20] sm:$0xff] %v1924_v30  }
 0x19c   : > { %v1288_v51 = vpop.f32.mrf.mxu0 }
 0x19d   : > { %v1909_v57 = vpack.c.bf16 %v1288_v51, %v1286_v10  ;;  %v1491_v3 = vadd.f32 %v1490_v13, %v1288_v51  ;;  %v1529_v60 = vmul.f32 %v1288_v51, %v1288_v51 }
 0x19e   : > { %v1306_v44 = vpop.f32.mrf.mxu1 }
 0x19f   : > { %1981 = vst [vmem:[%s2684_s11 + $0x8] sm:$0xff] %v1909_v57   ;;  %v1560_v56 = vadd.f32 %v1559_v29, %v1529_v60  ;;  %v1536_v9 = vmul.f32 %v1306_v44, %v1306_v44 }
 0x1a2   : > { %v2689_v32 = vpop.f32.mrf.mxu2 }
 0x1a4   : > { %v1291_v46 = vpop.f32.mrf.mxu0 }
 0x1a5   : > { %v1492_v53 = vadd.f32 %v1491_v3, %v1291_v46  ;;  %v1530_v63 = vmul.f32 %v1291_v46, %v1291_v46 }
 0x1a6   : > { %v1308_v36 = vpop.f32.mrf.mxu1 }
 0x1a7   : > { %v1561_v1 = vadd.f32 %v1560_v56, %v1530_v63  ;;  %v1929_v4 = vpack.c.bf16 %v1308_v36, %v1306_v44  ;;  %v1537_v40 = vmul.f32 %v1308_v36, %v1308_v36 }
 0x1a9   : > { %1985 = vst [vmem:[%s2684_s11 + $0x28] sm:$0xff] %v1929_v4   ;;  %v1542_v4 = vmul.f32 %v2689_v32, %v2689_v32 }
 0x1aa   : > { %v2692_v58 = vpop.f32.mrf.mxu2 }
 0x1ab   : > { %v1944_v5 = vpack.c.bf16 %v2692_v58, %v2689_v32 }
 0x1ac   : > { %v1293_v22 = vpop.f32.mrf.mxu0 }
 0x1ad   : > { %1988 = vst [vmem:[%s2684_s11 + $0x40] sm:$0xff] %v1944_v5   ;;  %v1914_v55 = vpack.c.bf16 %v1293_v22, %v1291_v46  ;;  %v1493_v59 = vadd.f32 %v1492_v53, %v1293_v22  ;;  %v1531_v38 = vmul.f32 %v1293_v22, %v1293_v22 }
 0x1af   : > { %1982 = vst [vmem:[%s2684_s11 + $0x10] sm:$0xff] %v1914_v55   ;;  %v1562_v25 = vadd.f32 %v1561_v1, %v1531_v38  ;;  %v1543_v55 = vmul.f32 %v2692_v58, %v2692_v58 }
 0x1b2   : > { %v2698_v62 = vpop.f32.mrf.mxu2 }
 0x1b5   : > { %v1311_v24 = vpop.f32.mrf.mxu1 }
 0x1b6   : > { %v1538_v43 = vmul.f32 %v1311_v24, %v1311_v24 }
 0x1ba   : > { %v2700_v41 = vpop.f32.mrf.mxu2 }
 0x1bb   : > { %v1949_v37 = vpack.c.bf16 %v2700_v41, %v2698_v62 }
 0x1bd   : > { %1989 = vst [vmem:[%s2684_s11 + $0x48] sm:$0xff] %v1949_v37   ;;  %v1313_v39 = vpop.f32.mrf.mxu1  ;;  %v1544_v37 = vmul.f32 %v2698_v62, %v2698_v62 }
 0x1be   : > { %v1934_v47 = vpack.c.bf16 %v1313_v39, %v1311_v24  ;;  %v1539_v10 = vmul.f32 %v1313_v39, %v1313_v39 }
 0x1c0   : > { %1986 = vst [vmem:[%s2684_s11 + $0x30] sm:$0xff] %v1934_v47  }
 0x1c2   : > { %v1148_v11 = vpop.permute.xlu1 %1147 }
 0x1c3   : > { %v2708_v27 = vpop.f32.mrf.mxu3  ;;  %v1214_v42 = vsel %vm1182_vm10, %v1181_v49, %v1148_v11  ;;  %v1545_v49 = vmul.f32 %v2700_v41, %v2700_v41 }
 0x1c4   : > { %1875 = vmatmul.msk.bf16.gmra.mxu3 %vm1235_vm11, %v1214_v42 }
 0x1c5   : > { %v1296_v28 = vpop.f32.mrf.mxu0 }
 0x1c6   : > { %v1494_v21 = vadd.f32 %v1493_v59, %v1296_v28  ;;  %v1532_v6 = vmul.f32 %v1296_v28, %v1296_v28 }
 0x1c8   : > { %v1563_v45 = vadd.f32 %v1562_v25, %v1532_v6 }
 0x1cb   : > { %v2712_v18 = vpop.f32.mrf.mxu3 }
 0x1cc   : > { %v1964_v12 = vpack.c.bf16 %v2712_v18, %v2708_v27 }
 0x1cd   : > { %v1298_v14 = vpop.f32.mrf.mxu0 }
 0x1ce   : > { %1992 = vst [vmem:[%s2684_s11 + $0x60] sm:$0xff] %v1964_v12   ;;  %v1919_v8 = vpack.c.bf16 %v1298_v14, %v1296_v28  ;;  %v1495_v19 = vadd.f32 %v1494_v21, %v1298_v14  ;;  %v1533_v20 = vmul.f32 %v1298_v14, %v1298_v14 }
 0x1d0   : > { %1983 = vst [vmem:[%s2684_s11 + $0x18] sm:$0xff] %v1919_v8   ;;  %v1496_v23 = vadd.f32 %v1495_v19, %v1301_v7  ;;  %v1564_v35 = vadd.f32 %v1563_v45, %v1533_v20 }
 0x1d2   : > { %v1497_v16 = vadd.f32 %v1496_v23, %v1303_v26  ;;  %v1565_v61 = vadd.f32 %v1564_v35, %v1534_v33  ;;  %v1550_v35 = vmul.f32 %v2708_v27, %v2708_v27 }
 0x1d3   : > { %v2718_v54 = vpop.f32.mrf.mxu3 }
 0x1d4   : > { %v1498_v0 = vadd.f32 %v1497_v16, %v1306_v44  ;;  %v1566_v52 = vadd.f32 %v1565_v61, %v1535_v17  ;;  %v1551_v16 = vmul.f32 %v2712_v18, %v2712_v18 }
 0x1d6   : > { %v1567_v34 = vadd.f32 %v1566_v52, %v1536_v9  ;;  %v1499_v2 = vadd.f32 %v1498_v0, %v1308_v36  ;;  %v1552_v0 = vmul.f32 %v2718_v54, %v2718_v54 }
 0x1d8   : > { %v1500_v48 = vadd.f32 %v1499_v2, %v1311_v24  ;;  %v1568_v50 = vadd.f32 %v1567_v34, %v1537_v40 }
 0x1da   : > { %v1501_v13 = vadd.f32 %v1500_v48, %v1313_v39  ;;  %v1569_v7 = vadd.f32 %v1568_v50, %v1538_v43 }
 0x1db   : > { %v1331_v15 = vpop.f32.mrf.mxu2  ;;  %v1348_v30 = vpop.f32.mrf.mxu3 }
 0x1dc   : > { %v1969_v26 = vpack.c.bf16 %v1348_v30, %v2718_v54  ;;  %v1570_v29 = vadd.f32 %v1569_v7, %v1539_v10  ;;  %v1546_v42 = vmul.f32 %v1331_v15, %v1331_v15  ;;  %v1553_v34 = vmul.f32 %v1348_v30, %v1348_v30 }
 0x1dd   : > { %v1316_v51 = vpop.f32.mrf.mxu1 }
 0x1de   : > { %1993 = vst [vmem:[%s2684_s11 + $0x68] sm:$0xff] %v1969_v26   ;;  %v1502_v57 = vadd.f32 %v1501_v13, %v1316_v51  ;;  %v1540_v3 = vmul.f32 %v1316_v51, %v1316_v51 }
 0x1e0   : > { %v1571_v60 = vadd.f32 %v1570_v29, %v1540_v3 }
 0x1e3   : > { %v1333_v44 = vpop.f32.mrf.mxu2  ;;  %v1351_v56 = vpop.f32.mrf.mxu3 }
 0x1e4   : > { %v1954_v46 = vpack.c.bf16 %v1333_v44, %v1331_v15  ;;  %v1547_v21 = vmul.f32 %v1333_v44, %v1333_v44  ;;  %v1554_v48 = vmul.f32 %v1351_v56, %v1351_v56 }
 0x1e5   : > { %v1318_v53 = vpop.f32.mrf.mxu1 }
 0x1e6   : > { %1990 = vst [vmem:[%s2684_s11 + $0x50] sm:$0xff] %v1954_v46   ;;  %v1939_v63 = vpack.c.bf16 %v1318_v53, %v1316_v51  ;;  %v1503_v36 = vadd.f32 %v1502_v57, %v1318_v53  ;;  %v1541_v1 = vmul.f32 %v1318_v53, %v1318_v53 }
 0x1e8   : > { %1987 = vst [vmem:[%s2684_s11 + $0x38] sm:$0xff] %v1939_v63   ;;  %v1504_v5 = vadd.f32 %v1503_v36, %v2689_v32  ;;  %v1572_v22 = vadd.f32 %v1571_v60, %v1541_v1 }
 0x1ea   : > { %v1505_v59 = vadd.f32 %v1504_v5, %v2692_v58  ;;  %v1573_v38 = vadd.f32 %v1572_v22, %v1542_v4 }
 0x1eb   : > { %v1336_v25 = vpop.f32.mrf.mxu2  ;;  %v1353_v24 = vpop.f32.mrf.mxu3 }
 0x1ec   : > { %v1506_v39 = vadd.f32 %v1505_v59, %v2698_v62  ;;  %v1574_v47 = vadd.f32 %v1573_v38, %v1543_v55  ;;  %v1974_v31 = vpack.c.bf16 %v1353_v24, %v1351_v56  ;;  %v1548_v8 = vmul.f32 %v1336_v25, %v1336_v25 }
 0x1ed   : > { %v1555_v7 = vmul.f32 %v1353_v24, %v1353_v24 }
 0x1ee   : > { %v1575_v32 = vadd.f32 %v1574_v47, %v1544_v37  ;;  %v1507_v11 = vadd.f32 %v1506_v39, %v2700_v41  ;;  %1994 = vst [vmem:[%s2684_s11 + $0x70] sm:$0xff] %v1974_v31  }
 0x1f0   : > { %v1508_v58 = vadd.f32 %v1507_v11, %v1331_v15  ;;  %v1576_v28 = vadd.f32 %v1575_v32, %v1545_v49 }
 0x1f2   : > { %v1509_v6 = vadd.f32 %v1508_v58, %v1333_v44  ;;  %v1577_v45 = vadd.f32 %v1576_v28, %v1546_v42 }
 0x1f3   : > { %v1338_v12 = vpop.f32.mrf.mxu2 }
 0x1f4   : > { %v1510_v14 = vadd.f32 %v1509_v6, %v1336_v25  ;;  %v1578_v62 = vadd.f32 %v1577_v45, %v1547_v21  ;;  %v1959_v19 = vpack.c.bf16 %v1338_v12, %v1336_v25  ;;  %v1549_v23 = vmul.f32 %v1338_v12, %v1338_v12 }
 0x1f6   : > { %v1579_v20 = vadd.f32 %v1578_v62, %v1548_v8  ;;  %1991 = vst [vmem:[%s2684_s11 + $0x58] sm:$0xff] %v1959_v19   ;;  %v1511_v33 = vadd.f32 %v1510_v14, %v1338_v12 }
 0x1f8   : > { %v1512_v41 = vadd.f32 %v1511_v33, %v2708_v27  ;;  %v1580_v17 = vadd.f32 %v1579_v20, %v1549_v23 }
 0x1fa   : > { %v1513_v61 = vadd.f32 %v1512_v41, %v2712_v18  ;;  %v1581_v9 = vadd.f32 %v1580_v17, %v1550_v35 }
 0x1fc   : > { %v1514_v52 = vadd.f32 %v1513_v61, %v2718_v54  ;;  %v1582_v40 = vadd.f32 %v1581_v9, %v1551_v16 }
 0x1fe   : > { %v1583_v2 = vadd.f32 %v1582_v40, %v1552_v0  ;;  %v1515_v43 = vadd.f32 %v1514_v52, %v1348_v30 }
 0x200   : > { %v1516_v50 = vadd.f32 %v1515_v43, %v1351_v56  ;;  %v1584_v27 = vadd.f32 %v1583_v2, %v1553_v34 }
 0x202   : > { %v1585_v10 = vadd.f32 %v1584_v27, %v1554_v48  ;;  %v1517_v15 = vadd.f32 %v1516_v50, %v1353_v24 }
 0x204   : > { %v1586_v29 = vadd.f32 %v1585_v10, %v1555_v7 }
 0x247   : > { %v1356_v13 = vpop.f32.mrf.mxu3 }
 0x248   : > { %v1556_v26 = vmul.f32 %v1356_v13, %v1356_v13  ;;  %v1518_v18 = vadd.f32 %v1517_v15, %v1356_v13 }
 0x24a   : > { %v1587_v57 = vadd.f32 %v1586_v29, %v1556_v26 }
 0x24f   : > { %v1358_v51 = vpop.f32.mrf.mxu3 }
 0x250   : > { %v1979_v3 = vpack.c.bf16 %v1358_v51, %v1356_v13  ;;  %v1519_v54 = vadd.f32 %v1518_v18, %v1358_v51  ;;  %v1557_v60 = vmul.f32 %v1358_v51, %v1358_v51 }
 0x252   : > { %1995 = vst [vmem:[%s2684_s11 + $0x78] sm:$0xff] %v1979_v3   ;;  %v1520_v44 = vrot.slane %v1519_v54, 4  ;;  %v1588_v30 = vadd.f32 %v1587_v57, %v1557_v60 }
 0x254   : > { %v1521_v46 = vadd.f32 %v1520_v44, %v1519_v54  ;;  %v1589_v53 = vrot.slane %v1588_v30, 4 }
 0x256   : > { %v1522_v56 = vrot.slane %v1521_v46, 2  ;;  %v1590_v63 = vadd.f32 %v1589_v53, %v1588_v30 }
 0x258   : > { %v1523_v36 = vadd.f32 %v1522_v56, %v1521_v46  ;;  %v1591_v1 = vrot.slane %v1590_v63, 2 }
 0x25a   : > { %v1524_v4 = vrot.slane %v1523_v36, 1  ;;  %v1592_v5 = vadd.f32 %v1591_v1, %v1590_v63 }
 0x25c   : > { %v1593_v22 = vrot.slane %v1592_v5, 1  ;;  %v1525_v55 = vadd.f32 %v1524_v4, %v1523_v36 }
 0x25e   : > { %v1594_v59 = vadd.f32 %v1593_v22, %v1592_v5 }
 0x260   : > { %v1596_v38 = vsel %vm790_vm3, %v1525_v55, %v1594_v59 }
 0x261   : > { %v1597_v25 = vsel %vm1268_vm8, %v1596_v38, 0.0 }
 0x262   : > { %1598 = vst [vmem:[%s408_s15] sm:$0xff] %v1597_v25 }
 0x263 PF: > { %s16_s0 = sadd.s32 1, %s2056_s0   ;;  %s2773_s18 = smov %s2052_s19 }
 0x264   : > { %p13_p5 = scmp.ge.s32.totalorder %s16_s0, 4   ;;  %s2774_s19 = smov %s2776_s2 }
 0x266   :  { %15 = sbr.rel (!%p13_p5) target bundleno = 2 (0x2), region = 84 }

// kernel: double_conv_forward.4
= control target key start
LH: loop header
LB: loop body
LE: loop exit
PB: predicated region body
PF: predicated region fallthrough
CT: control target
= control target key end

     0   :  { %s4514_s23 = smov 0   ;;  %s4516_s24 = smov 0   ;;  %s5565_s0 = inlined_call_operand.vmem [shape: bf16[2,16,16,128], index: 0, kind: input, shape index: {}, may-alias: {0,1,2}]   ;;  %s5566_s1 = inlined_call_operand.vmem [shape: bf16[2,16,16,128], index: 1, kind: input, shape index: {}, may-alias: {0,1,2}]   ;;  %s5567_s2 = inlined_call_operand.vmem [shape: bf16[2,16,16,128], index: 2, kind: input, shape index: {}, may-alias: {0,1,2}]   ;;  %s5568_s3 = inlined_call_operand.vmem [shape: f32[1,128], index: 3, kind: input, shape index: {}]   ;;  %s5569_s4 = inlined_call_operand.vmem [shape: f32[1,128], index: 4, kind: input, shape index: {}]   ;;  %s5570_s5 = inlined_call_operand.vmem [shape: bf16[9,128,128], index: 5, kind: input, shape index: {}]   ;;  %s5571_s6 = inlined_call_operand.vmem [shape: bf16[2,1,16,16,128], index: 6, kind: output, shape index: {0}]   ;;  %s5572_s7 = inlined_call_operand.vmem [shape: f32[2,1,8,128], index: 7, kind: output, shape index: {1}]  }
   0x1   :  { %s4518_s2 = smov 0  }
   0x2 LB: > { %s30_s25 = sadd.s32 1, %s4467_s24  ;;  %p3717_p0 = scmp.ge.s32.totalorder %s4471_s2, 1  ;;  %s4471_s2 = sphi %s4518_s2, %s18_s2   ;;  %s4467_s24 = sphi %s4516_s24, %s5706_s24   ;;  %s4463_s23 = sphi %s4514_s23, %s5705_s23  }
   0x3   : > { %p32_p1 = scmp.ge.s32.totalorder %s30_s25, 2  ;;  %p328_p2 = scmp.lt.s32.totalorder %s4471_s2, 3 }
   0x5   : > { %s5708_s25 = smov (%p32_p1, %s30_s25), 0  ;;  %p329_p3 = pnand %p3717_p0, %p328_p2 }
   0x7   : > { %332 = sbr.rel (%p329_p3) target bundleno = 769 (0x301), region = 44 }
   0xc   : > { %v4157_v0 = vld [vmem:[%s5570_s5 + $0x38] sm:$0xff]  ;;  %p420_p4 = scmp.lt.s32.totalorder %s4463_s23, 1  ;;  %v4473_v1 = vmov 0.0|0.0   ;;  %v4156_v3 = vld [vmem:[%s5570_s5 + $0x30] sm:$0xff]  ;;  %v4155_v5 = vld [vmem:[%s5570_s5 + $0x28] sm:$0xff]  ;;  %vm1032_vm0 = vcmask 1040384  }
   0xd   : > { %v834_v2 = vunpack.c.l.b16 %v4473_v1  ;;  %4396 = vmatpush.bf16.msra.mxu1 %v4157_v0  ;;  %4397 = vmatpush.bf16.msra.mxu2 %v4157_v0  ;;  %v4556_v6 = vld [vmem:[%s5568_s3] ss:$0 sm:$0xff]  ;;  %vm1033_vm1 = vsmask.f32 256  ;;  %v4153_v45 = vld [vmem:[%s5570_s5 + $0x18] sm:$0xff]  ;;  %v4152_v63 = vld [vmem:[%s5570_s5 + $0x10] sm:$0xff] }
   0xe   : > { %s5710_s23 = smov (!%p420_p4, %s4463_s23), 1  ;;  %4398 = vmatpush.bf16.msra.mxu3 %v4157_v0  ;;  %1192 = vmatpush.bf16.msra.mxu0 %v4157_v0  ;;  %v4566_v14 = vld [vmem:[%s5569_s4] ss:$0 sm:$0xff]  ;;  %vm4587_vm2 = vmand %vm1032_vm0, %vm1033_vm1  ;;  %vm1107_vm3 = vcmask 1047552   ;;  %vm1108_vm4 = vsmask.f32 7424 }
   0xf   : > { %v4540_v4 = vpack.c.b16 %v834_v2, %v834_v2  ;;  %s4146_s30 = sshll.u32 %s5710_s23, 7  ;;  %v4154_v27 = vld [vmem:[%s5570_s5 + $0x20] sm:$0xff]  ;;  %vm4977_vm5 = vmand %vm1107_vm3, %vm1108_vm4  ;;  %vm3535_vm6 = vcmask 1041408  }
  0x10   : > { %s4551_s12 = scalar_lea.vmem %s5566_s1, %s4146_s30  ;;  %s5473_s29 = scalar_lea.vmem %s5571_s6, %s4146_s30 }
  0x11   : > { %5614 = vst [vmem:[#allocation3_spill] sm:$0xff] %v4540_v4  ;;  %v889_v7 = vshrl.u32 %v4540_v4, 16  ;;  %4399 = vmatpush.bf16.msra.mxu1 %v4156_v3  ;;  %4400 = vmatpush.bf16.msra.mxu2 %v4156_v3  ;;  %v4368_v8 = vld [vmem:[%s4551_s12 + $0x18] sm:$0xff]   ;;  %v892_v11 = vshll.u32 %v4540_v4, 16  ;;  %v4369_v17 = vld [vmem:[%s4551_s12 + $0x20] sm:$0xff]   ;;  %s3726_s30 = sshll.u32 %s5710_s23, 3 }
  0x12   : > { %v4372_v9 = vld [vmem:[%s4551_s12 + $0x38] sm:$0xff]   ;;  %4401 = vmatpush.bf16.msra.mxu3 %v4156_v3  ;;  %1193 = vmatpush.bf16.msra.mxu0 %v4156_v3  ;;  %v4236_v12 = vunpack.c.l.bf16 %v4368_v8  ;;  %v4237_v13 = vunpack.c.h.bf16 %v4368_v8  ;;  %v4240_v21 = vunpack.c.l.bf16 %v4369_v17  ;;  %v4373_v22 = vld [vmem:[%s4551_s12 + $0x40] sm:$0xff]   ;;  %v4241_v31 = vunpack.c.h.bf16 %v4369_v17  ;;  %s462_s10 = scalar_lea.vmem %s5572_s7, %s3726_s30 }
  0x13   : > { %v4376_v10 = vld [vmem:[%s4551_s12 + $0x58] sm:$0xff]   ;;  %v4252_v15 = vunpack.c.l.bf16 %v4372_v9  ;;  %v4253_v16 = vunpack.c.h.bf16 %v4372_v9  ;;  %v891_v20 = vrot.slane %v889_v7, 7  ;;  %v4256_v36 = vunpack.c.l.bf16 %v4373_v22  ;;  %v4607_v62 = vld [vmem:[%s4551_s12 + $0x60] sm:$0xff]  }
  0x14   : > { %v4268_v18 = vunpack.c.l.bf16 %v4376_v10  ;;  %v4269_v19 = vunpack.c.h.bf16 %v4376_v10  ;;  %v549_v23 = vmul.f32 %v4556_v6, %v4236_v12  ;;  %v550_v24 = vmul.f32 %v4556_v6, %v4237_v13 }
  0x15   : > { %v557_v25 = vmul.f32 %v4556_v6, %v4252_v15  ;;  %v558_v26 = vmul.f32 %v4556_v6, %v4253_v16  ;;  %4402 = vmatpush.bf16.msra.mxu1 %v4155_v5  ;;  %4403 = vmatpush.bf16.msra.mxu2 %v4155_v5  ;;  %v894_v30 = vor.u32 %v892_v11, %v891_v20  ;;  %v4257_v53 = vunpack.c.h.bf16 %v4373_v22 }
  0x16   : > { %v565_v28 = vmul.f32 %v4556_v6, %v4268_v18  ;;  %v566_v29 = vmul.f32 %v4556_v6, %v4269_v19  ;;  %4404 = vmatpush.bf16.msra.mxu3 %v4155_v5  ;;  %1194 = vmatpush.bf16.msra.mxu0 %v4155_v5  ;;  %v588_v32 = vadd.f32 %v4566_v14, %v549_v23  ;;  %v4272_v16 = vunpack.c.l.bf16 %v4607_v62 }
  0x17   : > { %v589_v33 = vadd.f32 %v4566_v14, %v550_v24  ;;  %v596_v35 = vadd.f32 %v4566_v14, %v557_v25  ;;  %v597_v37 = vadd.f32 %v4566_v14, %v558_v26  ;;  %v4597_v40 = vsel %vm4587_vm2, 0, %v894_v30  ;;  %v4223_v30 = vld [vmem:[%s4551_s12] sm:$0xff]  }
  0x18   : > { %v604_v38 = vadd.f32 %v4566_v14, %v565_v28  ;;  %v605_v39 = vadd.f32 %v4566_v14, %v566_v29  ;;  %5617 = vst [vmem:[#allocation4_spill] sm:$0xff] %v4597_v40  ;;  %v624_v41 = vmax.f32 %v588_v32, 0.0  ;;  %v551_v44 = vmul.f32 %v4556_v6, %v4240_v21  ;;  %v4151_v21 = vld [vmem:[%s5570_s5 + $0x8] sm:$0xff] }
  0x19   : > { %v625_v42 = vmax.f32 %v589_v33, 0.0  ;;  %v632_v43 = vmax.f32 %v596_v35, 0.0  ;;  %4405 = vmatpush.bf16.msra.mxu1 %v4154_v27  ;;  %4406 = vmatpush.bf16.msra.mxu2 %v4154_v27  ;;  %v633_v46 = vmax.f32 %v597_v37, 0.0  ;;  %v552_v49 = vmul.f32 %v4556_v6, %v4241_v31 }
  0x1a   : > { %v640_v47 = vmax.f32 %v604_v38, 0.0  ;;  %v641_v48 = vmax.f32 %v605_v39, 0.0  ;;  %4407 = vmatpush.bf16.msra.mxu3 %v4154_v27  ;;  %1195 = vmatpush.bf16.msra.mxu0 %v4154_v27  ;;  %v770_v50 = vpack.c.bf16 %v624_v41, %v624_v41  ;;  %v590_v57 = vadd.f32 %v4566_v14, %v551_v44  ;;  %v4150_v41 = vld [vmem:[%s5570_s5] sm:$0xff] }
  0x1b   : > { %v771_v51 = vpack.c.bf16 %v625_v42, %v625_v42  ;;  %v778_v52 = vpack.c.bf16 %v632_v43, %v632_v43  ;;  %v779_v54 = vpack.c.bf16 %v633_v46, %v633_v46  ;;  %v591_v61 = vadd.f32 %v4566_v14, %v552_v49 }
  0x1c   : > { %v786_v55 = vpack.c.bf16 %v640_v47, %v640_v47  ;;  %v787_v56 = vpack.c.bf16 %v641_v48, %v641_v48  ;;  %v842_v58 = vunpack.c.l.b16 %v770_v50  ;;  %v626_v3 = vmax.f32 %v590_v57, 0.0  ;;  %v4370_v50 = vld [vmem:[%s4551_s12 + $0x28] sm:$0xff]  }
  0x1d   : > { %v843_v59 = vunpack.c.l.b16 %v771_v51  ;;  %v850_v60 = vunpack.c.l.b16 %v778_v52  ;;  %4408 = vmatpush.bf16.msra.mxu1 %v4153_v45  ;;  %4409 = vmatpush.bf16.msra.mxu2 %v4153_v45  ;;  %v851_v0 = vunpack.c.l.b16 %v779_v54  ;;  %v627_v8 = vmax.f32 %v591_v61, 0.0  ;;  %v4181_v54 = vld [vmem:[%s5570_s5 + $0xf8] sm:$0xff] }
  0x1e   : > { %v858_v1 = vunpack.c.l.b16 %v786_v55  ;;  %v859_v2 = vunpack.c.l.b16 %v787_v56  ;;  %4410 = vmatpush.bf16.msra.mxu3 %v4153_v45  ;;  %1196 = vmatpush.bf16.msra.mxu0 %v4153_v45  ;;  %v559_v9 = vmul.f32 %v4556_v6, %v4256_v36  ;;  %v560_v10 = vmul.f32 %v4556_v6, %v4257_v53  ;;  %v4173_v53 = vld [vmem:[%s5570_s5 + $0xb8] sm:$0xff] }
  0x1f   : > { %v4612_v5 = vpack.c.b16 %v843_v59, %v842_v58  ;;  %v4616_v12 = vpack.c.b16 %v851_v0, %v850_v60  ;;  %v772_v15 = vpack.c.bf16 %v626_v3, %v626_v3  ;;  %v773_v19 = vpack.c.bf16 %v627_v8, %v627_v8 }
  0x20   : > { %v4618_v13 = vpack.c.b16 %v859_v2, %v858_v1  ;;  %v598_v20 = vadd.f32 %v4566_v14, %v559_v9  ;;  %v599_v29 = vadd.f32 %v4566_v14, %v560_v10  ;;  %v4273_v35 = vunpack.c.h.bf16 %v4607_v62  ;;  %v4165_v1 = vld [vmem:[%s5570_s5 + $0x78] sm:$0xff] }
  0x21   : > { %5618 = vst [vmem:[#allocation5_spill] sm:$0xff] %v4616_v12  ;;  %v917_v17 = vshrl.u32 %v4612_v5, 16  ;;  %v920_v18 = vshll.u32 %v4612_v5, 16  ;;  %4411 = vmatpush.bf16.msra.mxu1 %v4152_v63  ;;  %4412 = vmatpush.bf16.msra.mxu2 %v4152_v63  ;;  %v5587_v22 = vshrl.u32 %v4616_v12, 16  ;;  %v5588_v23 = vshll.u32 %v4616_v12, 16  ;;  %v4189_v2 = vld [vmem:[%s5570_s5 + $0x138] sm:$0xff] }
  0x22   : > { %v5575_v24 = vshrl.u32 %v4618_v13, 16  ;;  %v5576_v25 = vshll.u32 %v4618_v13, 16  ;;  %4413 = vmatpush.bf16.msra.mxu3 %v4152_v63  ;;  %1197 = vmatpush.bf16.msra.mxu0 %v4152_v63  ;;  %v844_v27 = vunpack.c.l.b16 %v772_v15  ;;  %v845_v28 = vunpack.c.l.b16 %v773_v19  ;;  %v4172_v15 = vld [vmem:[%s5570_s5 + $0xb0] sm:$0xff] }
  0x23   : > { %v919_v26 = vrot.slane %v917_v17, 7  ;;  %v947_v31 = vrot.slane %v5587_v22, 7  ;;  %v634_v33 = vmax.f32 %v598_v20, 0.0  ;;  %v635_v38 = vmax.f32 %v599_v29, 0.0 }
  0x24   : > { %v975_v32 = vrot.slane %v5575_v24, 7  ;;  %v4642_v37 = vpack.c.b16 %v845_v28, %v844_v27  ;;  %v567_v39 = vmul.f32 %v4556_v6, %v4272_v16  ;;  %v4224_v45 = vunpack.c.l.bf16 %v4223_v30  ;;  %v4180_v16 = vld [vmem:[%s5570_s5 + $0xf0] sm:$0xff]  ;;  %v4374_v27 = vld [vmem:[%s4551_s12 + $0x48] sm:$0xff]  }
  0x25   : > { %v922_v36 = vor.u32 %v920_v18, %v919_v26  ;;  %4414 = vmatpush.bf16.msra.mxu1 %v4151_v21  ;;  %4415 = vmatpush.bf16.msra.mxu2 %v4151_v21  ;;  %v950_v42 = vor.u32 %v5588_v23, %v947_v31  ;;  %v780_v44 = vpack.c.bf16 %v634_v33, %v634_v33  ;;  %v4225_v60 = vunpack.c.h.bf16 %v4223_v30 }
  0x26   : > { %v978_v43 = vor.u32 %v5576_v25, %v975_v32  ;;  %4416 = vmatpush.bf16.msra.mxu3 %v4151_v21  ;;  %1198 = vmatpush.bf16.msra.mxu0 %v4151_v21  ;;  %v924_v47 = vshrl.u32 %v4642_v37, 16  ;;  %v927_v48 = vshll.u32 %v4642_v37, 16  ;;  %v781_v49 = vpack.c.bf16 %v635_v38, %v635_v38  ;;  %v4164_v38 = vld [vmem:[%s5570_s5 + $0x70] sm:$0xff] }
  0x27   : > { %v4654_v46 = vsel %vm4587_vm2, 0, %v922_v36  ;;  %v4661_v51 = vsel %vm4587_vm2, 0, %v950_v42  ;;  %v852_v55 = vunpack.c.l.b16 %v780_v44  ;;  %v568_v56 = vmul.f32 %v4556_v6, %v4273_v35  ;;  %v4188_v42 = vld [vmem:[%s5570_s5 + $0x130] sm:$0xff] }
  0x28   : > { %5619 = vst [vmem:[#allocation6_spill] sm:$0xff] %v4661_v51  ;;  %v4665_v52 = vsel %vm4587_vm2, 0, %v978_v43  ;;  %v926_v57 = vrot.slane %v924_v47, 7  ;;  %v853_v58 = vunpack.c.l.b16 %v781_v49  ;;  %v606_v59 = vadd.f32 %v4566_v14, %v567_v39  ;;  %v4171_v49 = vld [vmem:[%s5570_s5 + $0xa8] sm:$0xff] }
  0x29   : > { %4417 = vmatpush.bf16.msra.mxu1 %v4150_v41  ;;  %4418 = vmatpush.bf16.msra.mxu2 %v4150_v41  ;;  %v607_v61 = vadd.f32 %v4566_v14, %v568_v56  ;;  %v543_v62 = vmul.f32 %v4556_v6, %v4224_v45  ;;  %v4244_v63 = vunpack.c.l.bf16 %v4370_v50  ;;  %v4245_v0 = vunpack.c.h.bf16 %v4370_v50 }
  0x2a   : > { %4419 = vmatpush.bf16.msra.mxu3 %v4150_v41  ;;  %1199 = vmatpush.bf16.msra.mxu0 %v4150_v41  ;;  %v929_v3 = vor.u32 %v927_v48, %v926_v57  ;;  %v4687_v8 = vpack.c.b16 %v853_v58, %v852_v55  ;;  %v642_v9 = vmax.f32 %v606_v59, 0.0  ;;  %v544_v10 = vmul.f32 %v4556_v6, %v4225_v60 }
  0x2b   : > { %v643_v19 = vmax.f32 %v607_v61, 0.0  ;;  %v582_v20 = vadd.f32 %v4566_v14, %v543_v62  ;;  %v553_v21 = vmul.f32 %v4556_v6, %v4244_v63  ;;  %v554_v26 = vmul.f32 %v4556_v6, %v4245_v0  ;;  %v4378_v0 = vld [vmem:[%s4551_s12 + $0x68] sm:$0xff]  }
  0x2c   : > { %1220 = vmatmul.bf16.vlgmr.msra.gmra.mxu1 %v4654_v46  ;;  %1240 = vmatmul.bf16.vlgmr.msra.gmra.mxu2 %v4661_v51  ;;  %v4704_v28 = vsel %vm4587_vm2, 0, %v929_v3  ;;  %v5581_v29 = vshrl.u32 %v4687_v8, 16  ;;  %v5586_v30 = vshll.u32 %v4687_v8, 16  ;;  %v788_v31 = vpack.c.bf16 %v642_v9, %v642_v9  ;;  %v4187_v3 = vld [vmem:[%s5570_s5 + $0x128] sm:$0xff] }
  0x2d   : > { %1644 = vmatpush.bf16.msrb.mxu2 %v4173_v53  ;;  %1260 = vmatmul.bf16.vlgmr.msra.gmra.mxu3 %v4665_v52  ;;  %v789_v32 = vpack.c.bf16 %v643_v19, %v643_v19  ;;  %v583_v33 = vadd.f32 %v4566_v14, %v544_v10  ;;  %v618_v35 = vmax.f32 %v582_v20, 0.0  ;;  %v592_v36 = vadd.f32 %v4566_v14, %v553_v21 }
  0x2e   : > { %1894 = vmatpush.bf16.msrb.mxu3 %v4181_v54  ;;  %1200 = vmatmul.bf16.vlgmr.msra.gmra.mxu0 %v4597_v40  ;;  %v954_v39 = vrot.slane %v5581_v29, 7  ;;  %v860_v41 = vunpack.c.l.b16 %v788_v31  ;;  %v593_v43 = vadd.f32 %v4566_v14, %v554_v26  ;;  %v4260_v44 = vunpack.c.l.bf16 %v4374_v27  ;;  %v4179_v54 = vld [vmem:[%s5570_s5 + $0xe8] sm:$0xff]  ;;  %v4170_v26 = vld [vmem:[%s5570_s5 + $0xa0] sm:$0xff] }
  0x2f   : > { %1394 = vmatpush.bf16.msrb.mxu1 %v4165_v1  ;;  %2145 = vmatpush.bf16.msrb.mxu0 %v4189_v2  ;;  %v861_v45 = vunpack.c.l.b16 %v789_v32  ;;  %v619_v50 = vmax.f32 %v583_v33, 0.0  ;;  %v764_v53 = vpack.c.bf16 %v618_v35, %v618_v35  ;;  %v628_v55 = vmax.f32 %v592_v36, 0.0  ;;  %v4163_v2 = vld [vmem:[%s5570_s5 + $0x68] sm:$0xff] }
  0x30   : > { %v957_v56 = vor.u32 %v5586_v30, %v954_v39  ;;  %v629_v57 = vmax.f32 %v593_v43, 0.0  ;;  %v4261_v58 = vunpack.c.h.bf16 %v4374_v27  ;;  %v561_v59 = vmul.f32 %v4556_v6, %v4260_v44  ;;  %v4178_v27 = vld [vmem:[%s5570_s5 + $0xe0] sm:$0xff] }
  0x31   : > { %1645 = vmatpush.bf16.msrb.mxu2 %v4172_v15  ;;  %v4730_v60 = vpack.c.b16 %v861_v45, %v860_v41  ;;  %v765_v61 = vpack.c.bf16 %v619_v50, %v619_v50  ;;  %v836_v62 = vunpack.c.l.b16 %v764_v53  ;;  %v774_v63 = vpack.c.bf16 %v628_v55, %v628_v55  ;;  %v4162_v43 = vld [vmem:[%s5570_s5 + $0x60] sm:$0xff] }
  0x32   : > { %1895 = vmatpush.bf16.msrb.mxu3 %v4180_v16  ;;  %v4735_v1 = vsel %vm4587_vm2, 0, %v957_v56  ;;  %v775_v9 = vpack.c.bf16 %v629_v57, %v629_v57  ;;  %v562_v10 = vmul.f32 %v4556_v6, %v4261_v58  ;;  %v600_v15 = vadd.f32 %v4566_v14, %v561_v59  ;;  %v4366_v16 = vld [vmem:[%s4551_s12 + $0x8] sm:$0xff]   ;;  %v4186_v53 = vld [vmem:[%s5570_s5 + $0x120] sm:$0xff]  ;;  %v4169_v58 = vld [vmem:[%s5570_s5 + $0x98] sm:$0xff] }
  0x33   : > { %1395 = vmatpush.bf16.msrb.mxu1 %v4164_v38  ;;  %5620 = vst [vmem:[#allocation7_spill] sm:$0xff] %v4735_v1  ;;  %2146 = vmatpush.bf16.msrb.mxu0 %v4188_v42  ;;  %v5573_v19 = vshrl.u32 %v4730_v60, 16  ;;  %v5574_v20 = vshll.u32 %v4730_v60, 16  ;;  %v837_v21 = vunpack.c.l.b16 %v765_v61  ;;  %v846_v31 = vunpack.c.l.b16 %v774_v63  ;;  %v4177_v59 = vld [vmem:[%s5570_s5 + $0xd8] sm:$0xff] }
  0x34   : > { %v847_v32 = vunpack.c.l.b16 %v775_v9  ;;  %v601_v33 = vadd.f32 %v4566_v14, %v562_v10  ;;  %v636_v35 = vmax.f32 %v600_v15, 0.0  ;;  %v4276_v36 = vunpack.c.l.bf16 %v4378_v0 }
  0x35   : > { %1646 = vmatpush.bf16.msrb.mxu2 %v4171_v49  ;;  %v982_v38 = vrot.slane %v5573_v19, 7  ;;  %v4757_v39 = vpack.c.b16 %v837_v21, %v836_v62  ;;  %v4277_v41 = vunpack.c.h.bf16 %v4378_v0  ;;  %v4228_v42 = vunpack.c.l.bf16 %v4366_v16  ;;  %v4159_v19 = vld [vmem:[%s5570_s5 + $0x48] sm:$0xff] }
  0x36   : > { %1896 = vmatpush.bf16.msrb.mxu3 %v4179_v54  ;;  %v4762_v44 = vpack.c.b16 %v847_v32, %v846_v31  ;;  %v637_v45 = vmax.f32 %v601_v33, 0.0  ;;  %v782_v49 = vpack.c.bf16 %v636_v35, %v636_v35  ;;  %v569_v50 = vmul.f32 %v4556_v6, %v4276_v36  ;;  %v4161_v32 = vld [vmem:[%s5570_s5 + $0x58] sm:$0xff] }
  0x37   : > { %1396 = vmatpush.bf16.msrb.mxu1 %v4163_v2  ;;  %2147 = vmatpush.bf16.msrb.mxu0 %v4187_v3  ;;  %v985_v54 = vor.u32 %v5574_v20, %v982_v38  ;;  %v896_v55 = vshrl.u32 %v4757_v39, 16  ;;  %v899_v56 = vshll.u32 %v4757_v39, 16  ;;  %v570_v57 = vmul.f32 %v4556_v6, %v4277_v41  ;;  %v4371_v2 = vld [vmem:[%s4551_s12 + $0x30] sm:$0xff]  }
  0x38   : > { %5621 = vst [vmem:[#allocation8_spill] sm:$0xff] %v4762_v44  ;;  %v931_v61 = vshrl.u32 %v4762_v44, 16  ;;  %v934_v62 = vshll.u32 %v4762_v44, 16  ;;  %v783_v63 = vpack.c.bf16 %v637_v45, %v637_v45  ;;  %v854_v0 = vunpack.c.l.b16 %v782_v49  ;;  %v4168_v38 = vld [vmem:[%s5570_s5 + $0x90] sm:$0xff]  ;;  %v4185_v49 = vld [vmem:[%s5570_s5 + $0x118] sm:$0xff] }
  0x39   : > { %1647 = vmatpush.bf16.msrb.mxu2 %v4170_v26  ;;  %v4784_v3 = vsel %vm4587_vm2, 0, %v985_v54  ;;  %v898_v9 = vrot.slane %v896_v55, 7  ;;  %v608_v10 = vadd.f32 %v4566_v14, %v569_v50  ;;  %v609_v15 = vadd.f32 %v4566_v14, %v570_v57 }
  0x3a   : > { %1897 = vmatpush.bf16.msrb.mxu3 %v4178_v27  ;;  %v933_v21 = vrot.slane %v931_v61, 7  ;;  %v855_v26 = vunpack.c.l.b16 %v783_v63  ;;  %v4229_v27 = vunpack.c.h.bf16 %v4366_v16  ;;  %v545_v31 = vmul.f32 %v4556_v6, %v4228_v42  ;;  %v4176_v16 = vld [vmem:[%s5570_s5 + $0xd0] sm:$0xff] }
  0x3b   : > { %1397 = vmatpush.bf16.msrb.mxu1 %v4162_v43  ;;  %2148 = vmatpush.bf16.msrb.mxu0 %v4186_v53  ;;  %v901_v33 = vor.u32 %v899_v56, %v898_v9  ;;  %v644_v35 = vmax.f32 %v608_v10, 0.0  ;;  %v645_v36 = vmax.f32 %v609_v15, 0.0  ;;  %v4248_v41 = vunpack.c.l.bf16 %v4371_v2  ;;  %v4160_v10 = vld [vmem:[%s5570_s5 + $0x50] sm:$0xff] }
  0x3c   : > { %1225 = vmatmul.bf16.gmra.mxu1 %v4704_v28  ;;  %1245 = vmatmul.bf16.gmra.mxu2 %v4735_v1  ;;  %v936_v42 = vor.u32 %v934_v62, %v933_v21  ;;  %v4808_v43 = vpack.c.b16 %v855_v26, %v854_v0  ;;  %v546_v45 = vmul.f32 %v4556_v6, %v4229_v27  ;;  %v4249_v50 = vunpack.c.h.bf16 %v4371_v2 }
  0x3d   : > { %1648 = vmatpush.bf16.msrb.mxu2 %v4169_v58  ;;  %1265 = vmatmul.bf16.gmra.mxu3 %v4784_v3  ;;  %v4817_v53 = vsel %vm4587_vm2, 0, %v901_v33  ;;  %v790_v54 = vpack.c.bf16 %v644_v35, %v644_v35  ;;  %v791_v57 = vpack.c.bf16 %v645_v36, %v645_v36  ;;  %v584_v58 = vadd.f32 %v4566_v14, %v545_v31  ;;  %v4167_v31 = vld [vmem:[%s5570_s5 + $0x88] sm:$0xff] }
  0x3e   : > { %1898 = vmatpush.bf16.msrb.mxu3 %v4177_v59  ;;  %v4375_v59 = vld [vmem:[%s4551_s12 + $0x50] sm:$0xff]   ;;  %1205 = vmatmul.bf16.gmra.mxu0 %v4817_v53  ;;  %v4824_v63 = vsel %vm4587_vm2, 0, %v936_v42  ;;  %v5579_v0 = vshrl.u32 %v4808_v43, 16  ;;  %v5580_v2 = vshll.u32 %v4808_v43, 16  ;;  %v585_v9 = vadd.f32 %v4566_v14, %v546_v45 }
  0x3f   : > { %5622 = vst [vmem:[#allocation9_spill] sm:$0xff] %v4824_v63  ;;  %1398 = vmatpush.bf16.msrb.mxu1 %v4161_v32  ;;  %v862_v15 = vunpack.c.l.b16 %v790_v54  ;;  %v863_v21 = vunpack.c.l.b16 %v791_v57  ;;  %v620_v26 = vmax.f32 %v584_v58, 0.0  ;;  %v555_v27 = vmul.f32 %v4556_v6, %v4248_v41  ;;  %2149 = vmatpush.bf16.msrb.mxu0 %v4185_v49 }
  0x40   : > { %v961_v33 = vrot.slane %v5579_v0, 7  ;;  %v621_v32 = vmax.f32 %v585_v9, 0.0  ;;  %v556_v35 = vmul.f32 %v4556_v6, %v4249_v50  ;;  %v4264_v36 = vunpack.c.l.bf16 %v4375_v59  ;;  %v4379_v9 = vld [vmem:[%s4551_s12 + $0x70] sm:$0xff]  }
  0x41   : > { %1649 = vmatpush.bf16.msrb.mxu2 %v4168_v38  ;;  %v4175_v38 = vld [vmem:[%s5570_s5 + $0xc8] sm:$0xff]  ;;  %v4845_v41 = vpack.c.b16 %v863_v21, %v862_v15  ;;  %v766_v42 = vpack.c.bf16 %v620_v26, %v620_v26  ;;  %v594_v45 = vadd.f32 %v4566_v14, %v555_v27  ;;  %v4265_v54 = vunpack.c.h.bf16 %v4375_v59  ;;  %v4174_v27 = vld [vmem:[%s5570_s5 + $0xc0] sm:$0xff] }
  0x42   : > { %1899 = vmatpush.bf16.msrb.mxu3 %v4176_v16  ;;  %v4184_v16 = vld [vmem:[%s5570_s5 + $0x110] sm:$0xff]  ;;  %v964_v49 = vor.u32 %v5580_v2, %v961_v33  ;;  %v767_v57 = vpack.c.bf16 %v621_v32, %v621_v32  ;;  %v595_v50 = vadd.f32 %v4566_v14, %v556_v35  ;;  %v563_v58 = vmul.f32 %v4556_v6, %v4264_v36 }
  0x43   : > { %1399 = vmatpush.bf16.msrb.mxu1 %v4160_v10  ;;  %v5577_v15 = vshrl.u32 %v4845_v41, 16  ;;  %v5578_v21 = vshll.u32 %v4845_v41, 16  ;;  %v838_v26 = vunpack.c.l.b16 %v766_v42  ;;  %v630_v59 = vmax.f32 %v594_v45, 0.0  ;;  %v4166_v10 = vld [vmem:[%s5570_s5 + $0x80] sm:$0xff]  ;;  %2150 = vmatpush.bf16.msrb.mxu0 %v4184_v16 }
  0x44   : > { %v4866_v33 = vsel %vm4587_vm2, 0, %v964_v49  ;;  %v839_v32 = vunpack.c.l.b16 %v767_v57  ;;  %v631_v35 = vmax.f32 %v595_v50, 0.0  ;;  %v564_v36 = vmul.f32 %v4556_v6, %v4265_v54  ;;  %v4158_v16 = vld [vmem:[%s5570_s5 + $0x40] sm:$0xff] }
  0x45   : > { %1650 = vmatpush.bf16.msrb.mxu2 %v4167_v31  ;;  %5623 = vst [vmem:[#allocation10_spill] sm:$0xff] %v4866_v33  ;;  %v4183_v31 = vld [vmem:[%s5570_s5 + $0x108] sm:$0xff]  ;;  %v776_v42 = vpack.c.bf16 %v630_v59, %v630_v59  ;;  %v602_v45 = vadd.f32 %v4566_v14, %v563_v58  ;;  %v4280_v20 = vunpack.c.l.bf16 %v4379_v9  ;;  %v4281_v50 = vunpack.c.h.bf16 %v4379_v9  ;;  %v4367_v58 = vld [vmem:[%s4551_s12 + $0x10] sm:$0xff]  }
  0x46   : > { %1900 = vmatpush.bf16.msrb.mxu3 %v4175_v38  ;;  %v989_v38 = vrot.slane %v5577_v15, 7  ;;  %v4875_v24 = vpack.c.b16 %v839_v32, %v838_v26  ;;  %v777_v49 = vpack.c.bf16 %v631_v35, %v631_v35  ;;  %v603_v57 = vadd.f32 %v4566_v14, %v564_v36 }
  0x47   : > { %1400 = vmatpush.bf16.msrb.mxu1 %v4159_v19  ;;  %v848_v25 = vunpack.c.l.b16 %v776_v42  ;;  %v638_v15 = vmax.f32 %v602_v45, 0.0  ;;  %v571_v59 = vmul.f32 %v4556_v6, %v4280_v20  ;;  %2151 = vmatpush.bf16.msrb.mxu0 %v4183_v31  ;;  %v4182_v20 = vld [vmem:[%s5570_s5 + $0x100] sm:$0xff]  ;;  %v4232_v31 = vunpack.c.l.bf16 %v4367_v58 }
  0x48   : > { %v992_v54 = vor.u32 %v5578_v21, %v989_v38  ;;  %v903_v26 = vshrl.u32 %v4875_v24, 16  ;;  %v906_v32 = vshll.u32 %v4875_v24, 16  ;;  %v849_v9 = vunpack.c.l.b16 %v777_v49 }
  0x49   : > { %1651 = vmatpush.bf16.msrb.mxu2 %v4166_v10  ;;  %v639_v19 = vmax.f32 %v603_v57, 0.0  ;;  %v784_v36 = vpack.c.bf16 %v638_v15, %v638_v15  ;;  %v572_v38 = vmul.f32 %v4556_v6, %v4281_v50  ;;  %v610_v42 = vadd.f32 %v4566_v14, %v571_v59 }
  0x4a   : > { %1901 = vmatpush.bf16.msrb.mxu3 %v4174_v27  ;;  %v4889_v35 = vsel %vm4587_vm2, 0, %v992_v54  ;;  %v905_v10 = vrot.slane %v903_v26, 7  ;;  %v4898_v27 = vpack.c.b16 %v849_v9, %v848_v25  ;;  %v4233_v54 = vunpack.c.h.bf16 %v4367_v58  ;;  %v4205_v58 = vld [vmem:[%s5570_s5 + $0x1b8] sm:$0xff] }
  0x4b   : > { %5624 = vst [vmem:[#allocation11_spill] sm:$0xff] %v4889_v35  ;;  %v785_v45 = vpack.c.bf16 %v639_v19, %v639_v19  ;;  %1401 = vmatpush.bf16.msrb.mxu1 %v4158_v16  ;;  %v856_v49 = vunpack.c.l.b16 %v784_v36  ;;  %v611_v57 = vadd.f32 %v4566_v14, %v572_v38  ;;  %v646_v15 = vmax.f32 %v610_v42, 0.0  ;;  %2152 = vmatpush.bf16.msrb.mxu0 %v4182_v20 }
  0x4c   : > { %5625 = vst [vmem:[#allocation12_spill] sm:$0xff] %v4898_v27  ;;  %1230 = vmatmul.bf16.gmra.mxu1 %v4824_v63  ;;  %1250 = vmatmul.bf16.gmra.mxu2 %v4866_v33  ;;  %v908_v50 = vor.u32 %v906_v32, %v905_v10  ;;  %v5589_v59 = vshrl.u32 %v4898_v27, 16  ;;  %v547_v16 = vmul.f32 %v4556_v6, %v4232_v31  ;;  %v941_v38 = vshll.u32 %v4898_v27, 16 }
  0x4d   : > { %v857_v21 = vunpack.c.l.b16 %v785_v45  ;;  %1270 = vmatmul.bf16.gmra.mxu3 %v4889_v35  ;;  %v647_v25 = vmax.f32 %v611_v57, 0.0  ;;  %v792_v9 = vpack.c.bf16 %v646_v15, %v646_v15  ;;  %v548_v19 = vmul.f32 %v4556_v6, %v4233_v54  ;;  %2645 = vmatpush.bf16.msra.mxu2 %v4205_v58 }
  0x4e   : > { %v4914_v36 = vsel %vm4587_vm2, 0, %v908_v50  ;;  %v586_v31 = vadd.f32 %v4566_v14, %v547_v16  ;;  %v940_v20 = vrot.slane %v5589_v59, 7  ;;  %v1067_v59 = vrot.slane %v941_v38, 1 }
  0x4f   : > { %v4917_v42 = vpack.c.b16 %v857_v21, %v856_v49  ;;  %1210 = vmatmul.bf16.gmra.mxu0 %v4914_v36  ;;  %v793_v10 = vpack.c.bf16 %v647_v25, %v647_v25  ;;  %v864_v45 = vunpack.c.l.b16 %v792_v9  ;;  %v587_v6 = vadd.f32 %v4566_v14, %v548_v19  ;;  %v4213_v21 = vld [vmem:[%s5570_s5 + $0x1f8] sm:$0xff] }
  0x50   : > { %v4197_v49 = vld [vmem:[%s5570_s5 + $0x178] sm:$0xff]  ;;  %v622_v50 = vmax.f32 %v586_v31, 0.0  ;;  %2896 = vmatpush.bf16.msra.mxu3 %v4213_v21  ;;  %v943_v0 = vor.u32 %v941_v38, %v940_v20 }
  0x51   : > { %v5584_v57 = vshrl.u32 %v4917_v42, 16  ;;  %v5585_v15 = vshll.u32 %v4917_v42, 16  ;;  %v4221_v14 = vld [vmem:[%s5570_s5 + $0x238] sm:$0xff]  ;;  %v865_v54 = vunpack.c.l.b16 %v793_v10  ;;  %v623_v25 = vmax.f32 %v587_v6, 0.0  ;;  %2395 = vmatpush.bf16.msra.mxu1 %v4197_v49 }
  0x52   : > { %v768_v19 = vpack.c.bf16 %v622_v50, %v622_v50  ;;  %3146 = vmatpush.bf16.msra.mxu0 %v4221_v14  ;;  %v4951_v49 = vsel %vm4587_vm2, 0, %v943_v0 }
  0x53   : > { %v968_v9 = vrot.slane %v5584_v57, 7  ;;  %v4937_v16 = vpack.c.b16 %v865_v54, %v864_v45  ;;  %v769_v58 = vpack.c.bf16 %v623_v25, %v623_v25  ;;  %5626 = vst [vmem:[#allocation13_spill] sm:$0xff] %v4951_v49 }
  0x54   : > { %v840_v6 = vunpack.c.l.b16 %v768_v19 }
  0x55   : > { %v971_v2 = vor.u32 %v5585_v15, %v968_v9  ;;  %v5582_v10 = vshrl.u32 %v4937_v16, 16  ;;  %v5583_v31 = vshll.u32 %v4937_v16, 16  ;;  %v841_v29 = vunpack.c.l.b16 %v769_v58 }
  0x56   : > { %v1053_v9 = vrot.slane %v892_v11, 1  ;;  %v4204_v11 = vld [vmem:[%s5570_s5 + $0x1b0] sm:$0xff] }
  0x57   : > { %v996_v21 = vrot.slane %v5582_v10, 7  ;;  %v4947_v45 = vpack.c.b16 %v841_v29, %v840_v6  ;;  %v4955_v20 = vsel %vm4587_vm2, 0, %v971_v2  ;;  %2646 = vmatpush.bf16.msra.mxu2 %v4204_v11  ;;  %v4219_v11 = vld [vmem:[%s5570_s5 + $0x228] sm:$0xff] }
  0x58   : > { %v1054_v19 = vor.u32 %v1053_v9, %v889_v7  ;;  %v4212_v7 = vld [vmem:[%s5570_s5 + $0x1f0] sm:$0xff] }
  0x59   : > { %v999_v14 = vor.u32 %v5583_v31, %v996_v21  ;;  %v910_v54 = vshrl.u32 %v4947_v45, 16  ;;  %v913_v50 = vshll.u32 %v4947_v45, 16  ;;  %v4196_v21 = vld [vmem:[%s5570_s5 + $0x170] sm:$0xff]  ;;  %2897 = vmatpush.bf16.msra.mxu3 %v4212_v7 }
  0x5a   : > { %v4983_v6 = vsel %vm4977_vm5, %v1054_v19, 0  ;;  %2396 = vmatpush.bf16.msra.mxu1 %v4196_v21 }
  0x5b   : > { %v4963_v25 = vsel %vm4587_vm2, 0, %v999_v14  ;;  %v912_v29 = vrot.slane %v910_v54, 7  ;;  %5629 = vst [vmem:[#allocation14_spill] sm:$0xff] %v4983_v6  ;;  %v4220_v14 = vld [vmem:[%s5570_s5 + $0x230] sm:$0xff]  ;;  %v1059_v19 = vrot.slane %v913_v50, 1 }
  0x5c   : > { %1235 = vmatmul.bf16.gmra.mxu1 %v4951_v49  ;;  %1255 = vmatmul.bf16.gmra.mxu2 %v4955_v20 }
  0x5d   : > { %1275 = vmatmul.bf16.gmra.mxu3 %v4963_v25  ;;  %v915_v0 = vor.u32 %v913_v50, %v912_v29  ;;  %3147 = vmatpush.bf16.msra.mxu0 %v4220_v14  ;;  %v1060_v7 = vor.u32 %v1059_v19, %v910_v54  ;;  %v1061_v50 = vrot.slane %v920_v18, 1  ;;  %v4202_v18 = vld [vmem:[%s5570_s5 + $0x1a0] sm:$0xff] }
  0x5f   : > { %v4970_v2 = vsel %vm4587_vm2, 0, %v915_v0  ;;  %v5039_v21 = vsel %vm4977_vm5, %v1060_v7, 0  ;;  %v1062_v14 = vor.u32 %v1061_v50, %v917_v17 }
  0x60   : > { %1215 = vmatmul.bf16.gmra.mxu0 %v4970_v2 }
  0x61   : > { %3148 = vmatpush.bf16.msra.mxu0 %v4219_v11  ;;  %v5053_v54 = vsel %vm4977_vm5, %v1062_v14, 0  ;;  %v4218_v11 = vld [vmem:[%s5570_s5 + $0x220] sm:$0xff] }
  0x65   : > { %3149 = vmatpush.bf16.msra.mxu0 %v4218_v11  ;;  %v1065_v11 = vrot.slane %v934_v62, 1 }
  0x67   : > { %v1066_v10 = vor.u32 %v1065_v11, %v931_v61  ;;  %v4201_v61 = vld [vmem:[%s5570_s5 + $0x198] sm:$0xff] }
  0x69   : > { %v5121_v30 = vsel %vm4977_vm5, %v1066_v10, 0  ;;  %v4209_v10 = vld [vmem:[%s5570_s5 + $0x1d8] sm:$0xff] }
  0x6a   : > { %5635 = vst [vmem:[#allocation20_spill] sm:$0xff] %v5121_v30 }
  0x6c   : > { %1402 = vmatmul.bf16.vlgmr.msrb.gmra.mxu1 %v4540_v4  ;;  %1652 = vmatmul.bf16.vlgmr.msrb.gmra.mxu2 %v4983_v6  ;;  %v4193_v6 = vld [vmem:[%s5570_s5 + $0x158] sm:$0xff] }
  0x6d   : > { %1902 = vmatmul.bf16.vlgmr.msrb.gmra.mxu3 %v4817_v53  ;;  %v1055_v53 = vrot.slane %v899_v56, 1  ;;  %v1057_v56 = vrot.slane %v906_v32, 1  ;;  %v4195_v32 = vld [vmem:[%s5570_s5 + $0x168] sm:$0xff] }
  0x6e   : > { %2397 = vmatpush.bf16.msra.mxu1 %v4195_v32  ;;  %v1063_v32 = vrot.slane %v927_v48, 1 }
  0x6f   : > { %v1056_v29 = vor.u32 %v1055_v53, %v896_v55  ;;  %v1058_v9 = vor.u32 %v1057_v56, %v903_v26  ;;  %v4211_v26 = vld [vmem:[%s5570_s5 + $0x1e8] sm:$0xff] }
  0x70   : > { %2153 = vmatmul.bf16.vlgmr.msrb.gmra.mxu0 %v4757_v39  ;;  %2898 = vmatpush.bf16.msra.mxu3 %v4211_v26  ;;  %v1064_v7 = vor.u32 %v1063_v32, %v924_v47 }
  0x71   : > { %v5007_v0 = vsel %vm4977_vm5, %v1056_v29, 0  ;;  %v5019_v55 = vsel %vm4977_vm5, %v1058_v9, 0  ;;  %v4210_v9 = vld [vmem:[%s5570_s5 + $0x1e0] sm:$0xff] }
  0x72   : > { %v5093_v48 = vsel %vm4977_vm5, %v1064_v7, 0 }
  0x73   : > { %5632 = vst [vmem:[#allocation17_spill] sm:$0xff] %v5093_v48 }
  0x74   : > { %2899 = vmatpush.bf16.msra.mxu3 %v4210_v9 }
  0x78   : > { %2900 = vmatpush.bf16.msra.mxu3 %v4209_v10 }
  0x7c   : > { %1407 = vmatmul.bf16.gmra.mxu1 %v4757_v39  ;;  %1657 = vmatmul.bf16.gmra.mxu2 %v5007_v0  ;;  %v4203_v39 = vld [vmem:[%s5570_s5 + $0x1a8] sm:$0xff] }
  0x7d   : > { %1907 = vmatmul.bf16.gmra.mxu3 %v4914_v36  ;;  %2647 = vmatpush.bf16.msra.mxu2 %v4203_v39  ;;  %v4194_v39 = vld [vmem:[%s5570_s5 + $0x160] sm:$0xff] }
  0x7e   : > { %2398 = vmatpush.bf16.msra.mxu1 %v4194_v39 }
  0x80   : > { %2158 = vmatmul.bf16.gmra.mxu0 %v4875_v24 }
  0x81   : > { %2648 = vmatpush.bf16.msra.mxu2 %v4202_v18 }
  0x82   : > { %2399 = vmatpush.bf16.msra.mxu1 %v4193_v6 }
  0x85   : > { %2649 = vmatpush.bf16.msra.mxu2 %v4201_v61  ;;  %v5637_v61 = vshrl.u32 %v4898_v27, 16 }
  0x87   : > { %v1068_v40 = vor.u32 %v1067_v59, %v5637_v61 }
  0x89   : > { %v5161_v10 = vsel %vm4977_vm5, %v1068_v40, 0 }
  0x8a   : > { %5639 = vst [vmem:[#allocation23_spill] sm:$0xff] %v5161_v10 }
  0x8c   : > { %1412 = vmatmul.bf16.gmra.mxu1 %v4875_v24  ;;  %1662 = vmatmul.bf16.gmra.mxu2 %v5019_v55 }
  0x8d   : > { %1912 = vmatmul.bf16.gmra.mxu3 %v4970_v2 }
  0x90   : > { %2163 = vmatmul.bf16.gmra.mxu0 %v4947_v45 }
  0x9c   : > { %1417 = vmatmul.bf16.gmra.mxu1 %v4947_v45  ;;  %1667 = vmatmul.bf16.gmra.mxu2 %v5039_v21 }
  0x9d   : > { %1917 = vmatmul.bf16.gmra.mxu3 %v4654_v46 }
  0xa0   : > { %2168 = vmatmul.bf16.gmra.mxu0 %v4612_v5 }
  0xa9   : > { %v5049_v53 = vpop.f32.mrf.mxu1 }
  0xab   : > { %v5055_v29 = vpop.f32.mrf.mxu0 }
  0xac   : > { %1422 = vmatmul.bf16.gmra.mxu1 %v4612_v5  ;;  %1672 = vmatmul.bf16.gmra.mxu2 %v5053_v54 }
  0xad   : > { %1922 = vmatmul.bf16.gmra.mxu3 %v4704_v28 }
  0xaf   : > { %v5063_v56 = vpop.f32.mrf.mxu2 }
  0xb0   : > { %2173 = vmatmul.bf16.gmra.mxu0 %v4642_v37  ;;  %v5066_v17 = vpop.f32.mrf.mxu3 }
  0xb1   : > { %5630 = vst [vmem:[#allocation15_spill] sm:$0xff] %v5066_v17  ;;  %v5074_v26 = vpop.f32.mrf.mxu1 }
  0xb3   : > { %v5078_v19 = vpop.f32.mrf.mxu0 }
  0xb7   : > { %v5085_v50 = vpop.f32.mrf.mxu2 }
  0xb8   : > { %v5087_v14 = vpop.f32.mrf.mxu3 }
  0xb9   : > { %5631 = vst [vmem:[#allocation16_spill] sm:$0xff] %v5087_v14  ;;  %v5089_v18 = vpop.f32.mrf.mxu1 }
  0xbb   : > { %v5095_v9 = vpop.f32.mrf.mxu0 }
  0xbc   : > { %1427 = vmatmul.bf16.gmra.mxu1 %v4642_v37  ;;  %1677 = vmatmul.bf16.gmra.mxu2 %v5093_v48  ;;  %v4216_v48 = vld [vmem:[%s5570_s5 + $0x210] sm:$0xff] }
  0xbd   : > { %1927 = vmatmul.bf16.gmra.mxu3 %v4824_v63 }
  0xbf   : > { %v5100_v47 = vpop.f32.mrf.mxu2 }
  0xc0   : > { %2178 = vmatmul.bf16.gmra.mxu0 %v4762_v44  ;;  %v5103_v39 = vpop.f32.mrf.mxu3 }
  0xc1   : > { %5633 = vst [vmem:[#allocation18_spill] sm:$0xff] %v5103_v39  ;;  %v5105_v32 = vpop.f32.mrf.mxu1 }
  0xc3   : > { %v5109_v7 = vpop.f32.mrf.mxu0 }
  0xc7   : > { %v5113_v31 = vpop.f32.mrf.mxu2 }
  0xc8   : > { %v5115_v57 = vpop.f32.mrf.mxu3 }
  0xc9   : > { %5634 = vst [vmem:[#allocation19_spill] sm:$0xff] %v5115_v57  ;;  %v5117_v15 = vpop.f32.mrf.mxu1 }
  0xcc   : > { %v5123_v22 = vpop.f32.mrf.mxu0  ;;  %1432 = vmatmul.bf16.gmra.mxu1 %v4762_v44  ;;  %1682 = vmatmul.bf16.gmra.mxu2 %v5121_v30 }
  0xcd   : > { %1932 = vmatmul.bf16.gmra.mxu3 %v4951_v49 }
  0xcf   : > { %v5131_v62 = vpop.f32.mrf.mxu2 }
  0xd0   : > { %2183 = vmatmul.bf16.gmra.mxu0 %v4898_v27  ;;  %v5134_v11 = vpop.f32.mrf.mxu3 }
  0xd1   : > { %5636 = vst [vmem:[#allocation21_spill] sm:$0xff] %v5134_v11  ;;  %v5139_v23 = vpop.f32.mrf.mxu1  ;;  %v4217_v11 = vld [vmem:[%s5570_s5 + $0x218] sm:$0xff] }
  0xd2   : > { %3150 = vmatpush.bf16.msra.mxu0 %v4217_v11 }
  0xd4   : > { %v5146_v4 = vpop.f32.mrf.mxu0 }
  0xd6   : > { %3151 = vmatpush.bf16.msra.mxu0 %v4216_v48 }
  0xd7   : > { %v5153_v57 = vpop.f32.mrf.mxu2 }
  0xd8   : > { %v5155_v39 = vpop.f32.mrf.mxu3 }
  0xd9   : > { %5638 = vst [vmem:[#allocation22_spill] sm:$0xff] %v5155_v39  ;;  %v5157_v38 = vpop.f32.mrf.mxu1  ;;  %v5641_v39 = vshll.u32 %v4616_v12, 16 }
  0xdb   : > { %v1069_v40 = vrot.slane %v5641_v39, 1 }
  0xdc   : > { %1437 = vmatmul.bf16.gmra.mxu1 %v4898_v27  ;;  %1687 = vmatmul.bf16.gmra.mxu2 %v5161_v10  ;;  %v5642_v27 = vshrl.u32 %v4616_v12, 16 }
  0xdd   : > { %v5165_v59 = vpop.f32.mrf.mxu0  ;;  %1937 = vmatmul.bf16.gmra.mxu3 %v4661_v51 }
  0xde   : > { %v1070_v10 = vor.u32 %v1069_v40, %v5642_v27  ;;  %v4200_v27 = vld [vmem:[%s5570_s5 + $0x190] sm:$0xff] }
  0xdf   : > { %v5168_v6 = vpop.f32.mrf.mxu2  ;;  %2650 = vmatpush.bf16.msra.mxu2 %v4200_v27  ;;  %v4192_v27 = vld [vmem:[%s5570_s5 + $0x150] sm:$0xff] }
  0xe0   : > { %2188 = vmatmul.bf16.gmra.mxu0 %v4616_v12  ;;  %v5171_v11 = vpop.f32.mrf.mxu3  ;;  %v5187_v17 = vsel %vm4977_vm5, %v1070_v10, 0  ;;  %2400 = vmatpush.bf16.msra.mxu1 %v4192_v27 }
  0xe1   : > { %5640 = vst [vmem:[#allocation24_spill] sm:$0xff] %v5171_v11  ;;  %v5173_v61 = vpop.f32.mrf.mxu1 }
  0xe2   : > { %5645 = vst [vmem:[#allocation27_spill] sm:$0xff] %v5187_v17 }
  0xe5   : > { %v5177_v49 = vpop.f32.mrf.mxu0 }
  0xe7   : > { %v5181_v14 = vpop.f32.mrf.mxu2 }
  0xe8   : > { %5643 = vst [vmem:[#allocation25_spill] sm:$0xff] %v5181_v14  ;;  %v5183_v30 = vpop.f32.mrf.mxu3 }
  0xe9   : > { %5644 = vst [vmem:[#allocation26_spill] sm:$0xff] %v5183_v30  ;;  %v1403_v51 = vpop.f32.mrf.mxu1 }
  0xea   : > { %v1515_v11 = vadd.f32 %v1403_v51, %v5055_v29  ;;  %v4208_v51 = vld [vmem:[%s5570_s5 + $0x1d0] sm:$0xff] }
  0xeb   : > { %2901 = vmatpush.bf16.msra.mxu3 %v4208_v51 }
  0xec   : > { %1442 = vmatmul.bf16.gmra.mxu1 %v4616_v12  ;;  %1692 = vmatmul.bf16.gmra.mxu2 %v5187_v17  ;;  %v5646_v17 = vshll.u32 %v4687_v8, 16 }
  0xed   : > { %v2154_v39 = vpop.f32.mrf.mxu0  ;;  %1942 = vmatmul.bf16.gmra.mxu3 %v4735_v1 }
  0xee   : > { %v1071_v12 = vrot.slane %v5646_v17, 1 }
  0xef   : > { %v1653_v40 = vpop.f32.mrf.mxu2 }
  0xf0   : > { %2193 = vmatmul.bf16.gmra.mxu0 %v4687_v8  ;;  %v1765_v30 = vadd.f32 %v1653_v40, %v1515_v11  ;;  %v1903_v10 = vpop.f32.mrf.mxu3  ;;  %v5648_v40 = vshrl.u32 %v4687_v8, 16 }
  0xf1   : > { %v1405_v29 = vpop.f32.mrf.mxu1 }
  0xf2   : > { %v2015_v44 = vadd.f32 %v1903_v10, %v1765_v30  ;;  %v1516_v1 = vadd.f32 %v1405_v29, %v5078_v19  ;;  %v1072_v14 = vor.u32 %v1071_v12, %v5648_v40 }
  0xf4   : > { %v5206_v63 = vadd.f32 %v2154_v39, %v2015_v44  ;;  %v5215_v51 = vsel %vm4977_vm5, %v1072_v14, 0  ;;  %v5651_v14 = vshll.u32 %v4808_v43, 16 }
  0xf5   : > { %v2156_v11 = vpop.f32.mrf.mxu0  ;;  %5649 = vst [vmem:[#allocation29_spill] sm:$0xff] %v5215_v51 }
  0xf6   : > { %5647 = vst [vmem:[#allocation28_spill] sm:$0xff] %v5206_v63 }
  0xf7   : > { %v1655_v17 = vpop.f32.mrf.mxu2 }
  0xf8   : > { %v1766_v30 = vadd.f32 %v1655_v17, %v1516_v1  ;;  %v1905_v19 = vpop.f32.mrf.mxu3  ;;  %v1073_v17 = vrot.slane %v5651_v14, 1 }
  0xf9   : > { %v1408_v10 = vpop.f32.mrf.mxu1 }
  0xfa   : > { %v2016_v29 = vadd.f32 %v1905_v19, %v1766_v30  ;;  %v1517_v44 = vadd.f32 %v1408_v10, %v5095_v9 }
  0xfc   : > { %1447 = vmatmul.bf16.gmra.mxu1 %v4687_v8  ;;  %1697 = vmatmul.bf16.gmra.mxu2 %v5215_v51  ;;  %v5220_v12 = vadd.f32 %v2156_v11, %v2016_v29  ;;  %v5652_v11 = vshrl.u32 %v4808_v43, 16 }
  0xfd   : > { %v2159_v39 = vpop.f32.mrf.mxu0  ;;  %1947 = vmatmul.bf16.gmra.mxu3 %v4866_v33 }
  0xfe   : > { %5650 = vst [vmem:[#allocation30_spill] sm:$0xff] %v5220_v12  ;;  %v1074_v29 = vor.u32 %v1073_v17, %v5652_v11 }
  0xff   : > { %v1658_v48 = vpop.f32.mrf.mxu2 }
 0x100   : > { %2198 = vmatmul.bf16.gmra.mxu0 %v4808_v43  ;;  %v1767_v1 = vadd.f32 %v1658_v48, %v1517_v44  ;;  %v1908_v27 = vpop.f32.mrf.mxu3  ;;  %v5233_v44 = vsel %vm4977_vm5, %v1074_v29, 0  ;;  %v5655_v29 = vshrl.u32 %v4917_v42, 16 }
 0x101   : > { %v1410_v40 = vpop.f32.mrf.mxu1 }
 0x102   : > { %v2017_v30 = vadd.f32 %v1908_v27, %v1767_v1  ;;  %v1518_v9 = vadd.f32 %v1410_v40, %v5109_v7  ;;  %v5653_v27 = vshll.u32 %v4917_v42, 16 }
 0x104   : > { %v5227_v19 = vadd.f32 %v2159_v39, %v2017_v30  ;;  %v1075_v40 = vrot.slane %v5653_v27, 1 }
 0x105   : > { %v2161_v10 = vpop.f32.mrf.mxu0 }
 0x107   : > { %v1660_v12 = vpop.f32.mrf.mxu2 }
 0x108   : > { %v1768_v63 = vadd.f32 %v1660_v12, %v1518_v9  ;;  %v1910_v33 = vpop.f32.mrf.mxu3  ;;  %v4199_v12 = vld [vmem:[%s5570_s5 + $0x188] sm:$0xff] }
 0x109   : > { %v1413_v51 = vpop.f32.mrf.mxu1  ;;  %2651 = vmatpush.bf16.msra.mxu2 %v4199_v12  ;;  %v4191_v9 = vld [vmem:[%s5570_s5 + $0x148] sm:$0xff] }
 0x10a   : > { %v2018_v48 = vadd.f32 %v1910_v33, %v1768_v63  ;;  %v1519_v14 = vadd.f32 %v1413_v51, %v5123_v22  ;;  %v4207_v22 = vld [vmem:[%s5570_s5 + $0x1c8] sm:$0xff]  ;;  %2401 = vmatpush.bf16.msra.mxu1 %v4191_v9 }
 0x10b   : > { %2902 = vmatpush.bf16.msra.mxu3 %v4207_v22 }
 0x10c   : > { %1452 = vmatmul.bf16.gmra.mxu1 %v4808_v43  ;;  %1702 = vmatmul.bf16.gmra.mxu2 %v5233_v44  ;;  %v5238_v7 = vadd.f32 %v2161_v10, %v2018_v48  ;;  %v1076_v48 = vor.u32 %v1075_v40, %v5655_v29  ;;  %v5657_v29 = vshll.u32 %v4618_v13, 16 }
 0x10d   : > { %v2164_v39 = vpop.f32.mrf.mxu0  ;;  %1952 = vmatmul.bf16.gmra.mxu3 %v4955_v20 }
 0x10f   : > { %v1663_v1 = vpop.f32.mrf.mxu2 }
 0x110   : > { %2203 = vmatmul.bf16.gmra.mxu0 %v4917_v42  ;;  %v1769_v63 = vadd.f32 %v1663_v1, %v1519_v14  ;;  %v1913_v33 = vpop.f32.mrf.mxu3  ;;  %v4215_v14 = vld [vmem:[%s5570_s5 + $0x208] sm:$0xff] }
 0x111   : > { %v1415_v51 = vpop.f32.mrf.mxu1  ;;  %3152 = vmatpush.bf16.msra.mxu0 %v4215_v14 }
 0x112   : > { %v2019_v17 = vadd.f32 %v1913_v33, %v1769_v63  ;;  %v1520_v30 = vadd.f32 %v1415_v51, %v5146_v4  ;;  %v5263_v33 = vsel %vm4977_vm5, %v1076_v48, 0  ;;  %v1077_v48 = vrot.slane %v5657_v29, 1  ;;  %v4380_v29 = vld [vmem:[%s4551_s12 + $0x78] sm:$0xff]  }
 0x114   : > { %v5254_v10 = vadd.f32 %v2164_v39, %v2019_v17 }
 0x115   : > { %v2166_v11 = vpop.f32.mrf.mxu0 }
 0x116   : > { %5654 = vst [vmem:[#allocation31_spill] sm:$0xff] %v5254_v10 }
 0x117   : > { %v1665_v12 = vpop.f32.mrf.mxu2 }
 0x118   : > { %v1770_v1 = vadd.f32 %v1665_v12, %v1520_v30  ;;  %v1915_v4 = vpop.f32.mrf.mxu3 }
 0x119   : > { %v1418_v63 = vpop.f32.mrf.mxu1 }
 0x11a   : > { %v2020_v22 = vadd.f32 %v1915_v4, %v1770_v1  ;;  %v1521_v39 = vadd.f32 %v1418_v63, %v5165_v59 }
 0x11c   : > { %1457 = vmatmul.bf16.gmra.mxu1 %v4917_v42  ;;  %1707 = vmatmul.bf16.gmra.mxu2 %v5263_v33  ;;  %v5268_v51 = vadd.f32 %v2166_v11, %v2020_v22  ;;  %v5659_v11 = vshrl.u32 %v4618_v13, 16 }
 0x11d   : > { %v2169_v27 = vpop.f32.mrf.mxu0  ;;  %1957 = vmatmul.bf16.gmra.mxu3 %v4665_v52 }
 0x11e   : > { %5656 = vst [vmem:[#allocation32_spill] sm:$0xff] %v5268_v51  ;;  %v1078_v4 = vor.u32 %v1077_v48, %v5659_v11 }
 0x11f   : > { %v1668_v40 = vpop.f32.mrf.mxu2 }
 0x120   : > { %2208 = vmatmul.bf16.gmra.mxu0 %v4618_v13  ;;  %v1771_v17 = vadd.f32 %v1668_v40, %v1521_v39  ;;  %v1918_v30 = vpop.f32.mrf.mxu3  ;;  %v5281_v39 = vsel %vm4977_vm5, %v1078_v4, 0 }
 0x121   : > { %v1420_v9 = vpop.f32.mrf.mxu1 }
 0x122   : > { %v2021_v14 = vadd.f32 %v1918_v30, %v1771_v17  ;;  %v1522_v59 = vadd.f32 %v1420_v9, %v5177_v49  ;;  %v4198_v17 = vld [vmem:[%s5570_s5 + $0x180] sm:$0xff] }
 0x123   : > { %2652 = vmatpush.bf16.msra.mxu2 %v4198_v17  ;;  %v5663_v17 = vshrl.u32 %v4730_v60, 16 }
 0x124   : > { %v5275_v12 = vadd.f32 %v2169_v27, %v2021_v14  ;;  %v4206_v14 = vld [vmem:[%s5570_s5 + $0x1c0] sm:$0xff] }
 0x125   : > { %v2171_v1 = vpop.f32.mrf.mxu0  ;;  %2903 = vmatpush.bf16.msra.mxu3 %v4206_v14 }
 0x126   : > { %5658 = vst [vmem:[#allocation33_spill] sm:$0xff] %v5275_v12 }
 0x127   : > { %v1670_v63 = vpop.f32.mrf.mxu2 }
 0x128   : > { %v1772_v22 = vadd.f32 %v1670_v63, %v1522_v59  ;;  %v1920_v51 = vpop.f32.mrf.mxu3  ;;  %v4285_v63 = vunpack.c.h.bf16 %v4380_v29 }
 0x129   : > { %v1423_v10 = vpop.f32.mrf.mxu1 }
 0x12a   : > { %v2022_v40 = vadd.f32 %v1920_v51, %v1772_v22  ;;  %v1523_v30 = vadd.f32 %v1423_v10, %v5049_v53  ;;  %v4190_v53 = vld [vmem:[%s5570_s5 + $0x140] sm:$0xff]  ;;  %v4284_v10 = vunpack.c.l.bf16 %v4380_v29 }
 0x12b   : > { %2402 = vmatpush.bf16.msra.mxu1 %v4190_v53 }
 0x12c   : > { %1462 = vmatmul.bf16.gmra.mxu1 %v4618_v13  ;;  %1712 = vmatmul.bf16.gmra.mxu2 %v5281_v39  ;;  %v5285_v49 = vadd.f32 %v2171_v1, %v2022_v40  ;;  %v5661_v1 = vshll.u32 %v4730_v60, 16 }
 0x12d   : > { %v2174_v27 = vpop.f32.mrf.mxu0  ;;  %1962 = vmatmul.bf16.gmra.mxu3 %v4784_v3 }
 0x12e   : > { %5660 = vst [vmem:[#allocation34_spill] sm:$0xff] %v5285_v49  ;;  %v1079_v11 = vrot.slane %v5661_v1, 1 }
 0x12f   : > { %v1673_v9 = vpop.f32.mrf.mxu2 }
 0x130   : > { %2213 = vmatmul.bf16.gmra.mxu0 %v4730_v60  ;;  %v1773_v51 = vadd.f32 %v1673_v9, %v1523_v30  ;;  %v1923_v48 = vpop.f32.mrf.mxu3  ;;  %v1080_v30 = vor.u32 %v1079_v11, %v5663_v17  ;;  %v4214_v9 = vld [vmem:[%s5570_s5 + $0x200] sm:$0xff] }
 0x131   : > { %v1425_v59 = vpop.f32.mrf.mxu1  ;;  %3153 = vmatpush.bf16.msra.mxu0 %v4214_v9 }
 0x132   : > { %v2023_v4 = vadd.f32 %v1923_v48, %v1773_v51  ;;  %v1524_v51 = vadd.f32 %v1425_v59, %v5074_v26  ;;  %v4447_v48 = vld [vmem:[%s5568_s3] ss:$0 sm:$0xff]  ;;  %v5315_v11 = vsel %vm4977_vm5, %v1080_v30, 0 }
 0x133   : > { %v573_v14 = vmul.f32 %v4447_v48, %v4284_v10  ;;  %v574_v1 = vmul.f32 %v4447_v48, %v4285_v63  ;;  %5664 = vst [vmem:[#allocation36_spill] sm:$0xff] %v5315_v11  ;;  %v4448_v26 = vld [vmem:[%s5569_s4] ss:$0 sm:$0xff] }
 0x134   : > { %v5302_v22 = vadd.f32 %v2174_v27, %v2023_v4 }
 0x135   : > { %v2176_v40 = vpop.f32.mrf.mxu0  ;;  %v612_v59 = vadd.f32 %v4448_v26, %v573_v14 }
 0x136   : > { %5662 = vst [vmem:[#allocation35_spill] sm:$0xff] %v5302_v22  ;;  %v613_v22 = vadd.f32 %v4448_v26, %v574_v1  ;;  %v5666_v1 = vshll.u32 %v4845_v41, 16 }
 0x137   : > { %v1675_v29 = vpop.f32.mrf.mxu2  ;;  %v648_v30 = vmax.f32 %v612_v59, 0.0 }
 0x138   : > { %v1774_v27 = vadd.f32 %v1675_v29, %v1524_v51  ;;  %v1925_v4 = vpop.f32.mrf.mxu3  ;;  %v649_v51 = vmax.f32 %v613_v22, 0.0 }
 0x139   : > { %v1428_v53 = vpop.f32.mrf.mxu1  ;;  %v794_v49 = vpack.c.bf16 %v648_v30, %v648_v30 }
 0x13a   : > { %v2024_v17 = vadd.f32 %v1925_v4, %v1774_v27  ;;  %v1525_v9 = vadd.f32 %v1428_v53, %v5089_v18  ;;  %v1081_v4 = vrot.slane %v5666_v1, 1 }
 0x13b   : > { %v866_v53 = vunpack.c.l.b16 %v794_v49 }
 0x13c   : > { %1467 = vmatmul.bf16.gmra.mxu1 %v4730_v60  ;;  %1717 = vmatmul.bf16.gmra.mxu2 %v5315_v11  ;;  %v5322_v10 = vadd.f32 %v2176_v40, %v2024_v17  ;;  %v795_v40 = vpack.c.bf16 %v649_v51, %v649_v51 }
 0x13d   : > { %v2179_v63 = vpop.f32.mrf.mxu0  ;;  %1967 = vmatmul.bf16.gmra.mxu3 %v4889_v35  ;;  %v5667_v35 = vshrl.u32 %v4845_v41, 16 }
 0x13e   : > { %5665 = vst [vmem:[#allocation37_spill] sm:$0xff] %v5322_v10  ;;  %v867_v59 = vunpack.c.l.b16 %v795_v40 }
 0x13f   : > { %v1678_v48 = vpop.f32.mrf.mxu2  ;;  %v1082_v18 = vor.u32 %v1081_v4, %v5667_v35  ;;  %v5668_v4 = vshll.u32 %v4937_v16, 16 }
 0x140   : > { %2218 = vmatmul.bf16.gmra.mxu0 %v4845_v41  ;;  %v1775_v29 = vadd.f32 %v1678_v48, %v1525_v9  ;;  %v1928_v27 = vpop.f32.mrf.mxu3  ;;  %v5338_v51 = vpack.c.b16 %v867_v59, %v866_v53 }
 0x141   : > { %v1430_v14 = vpop.f32.mrf.mxu1  ;;  %v5336_v1 = vsel %vm4977_vm5, %v1082_v18, 0 }
 0x142   : > { %v2025_v26 = vadd.f32 %v1928_v27, %v1775_v29  ;;  %v1526_v22 = vadd.f32 %v1430_v14, %v5105_v32  ;;  %v1004_v18 = vshll.u32 %v5338_v51, 16 }
 0x144   : > { %v5329_v17 = vadd.f32 %v2179_v63, %v2025_v26  ;;  %v1083_v26 = vrot.slane %v5668_v4, 1 }
 0x145   : > { %v2181_v10 = vpop.f32.mrf.mxu0 }
 0x147   : > { %v1680_v11 = vpop.f32.mrf.mxu2 }
 0x148   : > { %v1776_v9 = vadd.f32 %v1680_v11, %v1526_v22  ;;  %v1930_v48 = vpop.f32.mrf.mxu3  ;;  %v1001_v11 = vshrl.u32 %v5338_v51, 16 }
 0x149   : > { %v1433_v12 = vpop.f32.mrf.mxu1 }
 0x14a   : > { %v2026_v30 = vadd.f32 %v1930_v48, %v1776_v9  ;;  %v1527_v49 = vadd.f32 %v1433_v12, %v5117_v15  ;;  %v5669_v12 = vshrl.u32 %v4937_v16, 16 }
 0x14c   : > { %1472 = vmatmul.bf16.gmra.mxu1 %v4845_v41  ;;  %1722 = vmatmul.bf16.gmra.mxu2 %v5336_v1  ;;  %v5342_v35 = vadd.f32 %v2181_v10, %v2026_v30  ;;  %v1003_v10 = vrot.slane %v1001_v11, 7  ;;  %v1084_v53 = vor.u32 %v1083_v26, %v5669_v12 }
 0x14d   : > { %v2184_v32 = vpop.f32.mrf.mxu0  ;;  %1972 = vmatmul.bf16.gmra.mxu3 %v4963_v25 }
 0x14e   : > { %v1006_v9 = vor.u32 %v1004_v18, %v1003_v10 }
 0x14f   : > { %v1683_v63 = vpop.f32.mrf.mxu2 }
 0x150   : > { %2223 = vmatmul.bf16.gmra.mxu0 %v4937_v16  ;;  %v1777_v29 = vadd.f32 %v1683_v63, %v1527_v49  ;;  %v1933_v27 = vpop.f32.mrf.mxu3 }
 0x151   : > { %v1435_v14 = vpop.f32.mrf.mxu1 }
 0x152   : > { %v2027_v40 = vadd.f32 %v1933_v27, %v1777_v29  ;;  %v1528_v59 = vadd.f32 %v1435_v14, %v5139_v23  ;;  %v5362_v29 = vsel %vm4977_vm5, %v1084_v53, 0 }
 0x154   : > { %v5353_v22 = vadd.f32 %v2184_v32, %v2027_v40  ;;  %v5366_v32 = vsel %vm4587_vm2, 0, %v1006_v9 }
 0x155   : > { %v2186_v15 = vpop.f32.mrf.mxu0 }
 0x157   : > { %v1685_v48 = vpop.f32.mrf.mxu2 }
 0x158   : > { %v1778_v30 = vadd.f32 %v1685_v48, %v1528_v59  ;;  %v1935_v49 = vpop.f32.mrf.mxu3 }
 0x159   : > { %v1438_v63 = vpop.f32.mrf.mxu1 }
 0x15a   : > { %v2028_v27 = vadd.f32 %v1935_v49, %v1778_v30  ;;  %v1529_v4 = vadd.f32 %v1438_v63, %v5157_v38 }
 0x15c   : > { %1477 = vmatmul.bf16.gmra.mxu1 %v4937_v16  ;;  %1727 = vmatmul.bf16.gmra.mxu2 %v5362_v29  ;;  %v5370_v23 = vadd.f32 %v2186_v15, %v2028_v27 }
 0x15d   : > { %v2189_v14 = vpop.f32.mrf.mxu0  ;;  %1977 = vmatmul.bf16.gmra.mxu3 %v5366_v32 }
 0x15f   : > { %v1688_v26 = vpop.f32.mrf.mxu2 }
 0x160   : > { %2228 = vmatmul.bf16.gmra.mxu0 %v5338_v51  ;;  %v1779_v40 = vadd.f32 %v1688_v26, %v1529_v4  ;;  %v1938_v10 = vpop.f32.mrf.mxu3 }
 0x161   : > { %v1440_v12 = vpop.f32.mrf.mxu1 }
 0x162   : > { %v2029_v34 = vadd.f32 %v1938_v10, %v1779_v40  ;;  %v1530_v9 = vadd.f32 %v1440_v12, %v5173_v61 }
 0x164   : > { %v5375_v53 = vadd.f32 %v2189_v14, %v2029_v34 }
 0x165   : > { %v2191_v59 = vpop.f32.mrf.mxu0 }
 0x167   : > { %v1690_v48 = vpop.f32.mrf.mxu2 }
 0x168   : > { %v1780_v15 = vadd.f32 %v1690_v48, %v1530_v9  ;;  %v1940_v30 = vpop.f32.mrf.mxu3 }
 0x169   : > { %v1443_v49 = vpop.f32.mrf.mxu1 }
 0x16a   : > { %v2030_v27 = vadd.f32 %v1940_v30, %v1780_v15  ;;  %v1531_v14 = vadd.f32 %v1443_v49, %v5063_v56 }
 0x16c   : > { %2403 = vmatmul.bf16.vlgmr.msra.gmra.mxu1 %v5007_v0  ;;  %2653 = vmatmul.bf16.vlgmr.msra.gmra.mxu2 %v4914_v36  ;;  %v5380_v38 = vadd.f32 %v2191_v59, %v2030_v27 }
 0x16d   : > { %v2194_v63 = vpop.f32.mrf.mxu0  ;;  %2904 = vmatmul.bf16.vlgmr.msra.gmra.mxu3 %v4875_v24 }
 0x16f   : > { %v1693_v4 = vpop.f32.mrf.mxu2 }
 0x170   : > { %3154 = vmatmul.bf16.vlgmr.msra.gmra.mxu0 %v5019_v55  ;;  %v1781_v61 = vadd.f32 %v1693_v4, %v1531_v14  ;;  %v1943_v26 = vpop.f32.mrf.mxu3 }
 0x171   : > { %v1445_v40 = vpop.f32.mrf.mxu1 }
 0x172   : > { %v2031_v10 = vadd.f32 %v1943_v26, %v1781_v61  ;;  %v1532_v0 = vadd.f32 %v1445_v40, %v5085_v50 }
 0x174   : > { %v5385_v12 = vadd.f32 %v2194_v63, %v2031_v10 }
 0x175   : > { %v2196_v34 = vpop.f32.mrf.mxu0 }
 0x177   : > { %v1695_v36 = vpop.f32.mrf.mxu2 }
 0x178   : > { %v1782_v59 = vadd.f32 %v1695_v36, %v1532_v0  ;;  %v1945_v9 = vpop.f32.mrf.mxu3 }
 0x179   : > { %v1448_v48 = vpop.f32.mrf.mxu1 }
 0x17a   : > { %v2032_v15 = vadd.f32 %v1945_v9, %v1782_v59  ;;  %v1533_v30 = vadd.f32 %v1448_v48, %v5100_v47 }
 0x17c   : > { %2408 = vmatmul.bf16.gmra.mxu1 %v5019_v55  ;;  %2658 = vmatmul.bf16.gmra.mxu2 %v4970_v2  ;;  %v5390_v24 = vadd.f32 %v2196_v34, %v2032_v15 }
 0x17d   : > { %v2199_v56 = vpop.f32.mrf.mxu0  ;;  %2909 = vmatmul.bf16.gmra.mxu3 %v4947_v45 }
 0x17f   : > { %v1698_v49 = vpop.f32.mrf.mxu2 }
 0x180   : > { %3159 = vmatmul.bf16.gmra.mxu0 %v5039_v21  ;;  %v1783_v50 = vadd.f32 %v1698_v49, %v1533_v30  ;;  %v1948_v27 = vpop.f32.mrf.mxu3 }
 0x181   : > { %v1450_v63 = vpop.f32.mrf.mxu1 }
 0x182   : > { %v2033_v14 = vadd.f32 %v1948_v27, %v1783_v50  ;;  %v1534_v55 = vadd.f32 %v1450_v63, %v5113_v31 }
 0x184   : > { %v5395_v4 = vadd.f32 %v2199_v56, %v2033_v14 }
 0x185   : > { %v2201_v61 = vpop.f32.mrf.mxu0 }
 0x187   : > { %v1700_v2 = vpop.f32.mrf.mxu2 }
 0x188   : > { %v1784_v26 = vadd.f32 %v1700_v2, %v1534_v55  ;;  %v1950_v40 = vpop.f32.mrf.mxu3 }
 0x189   : > { %v1453_v10 = vpop.f32.mrf.mxu1 }
 0x18a   : > { %v2034_v34 = vadd.f32 %v1950_v40, %v1784_v26  ;;  %v1535_v0 = vadd.f32 %v1453_v10, %v5131_v62 }
 0x18c   : > { %2413 = vmatmul.bf16.gmra.mxu1 %v5039_v21  ;;  %2663 = vmatmul.bf16.gmra.mxu2 %v4654_v46  ;;  %v5400_v45 = vadd.f32 %v2201_v61, %v2034_v34  ;;  %v5670_v61 = vld [vmem:[#allocation17_spill] sm:$0xff] }
 0x18d   : > { %v2204_v47 = vpop.f32.mrf.mxu0  ;;  %2914 = vmatmul.bf16.gmra.mxu3 %v4612_v5 }
 0x18f   : > { %v1703_v36 = vpop.f32.mrf.mxu2 }
 0x190   : > { %3164 = vmatmul.bf16.gmra.mxu0 %v5053_v54  ;;  %v1785_v31 = vadd.f32 %v1703_v36, %v1535_v0  ;;  %v1953_v59 = vpop.f32.mrf.mxu3 }
 0x191   : > { %v1455_v9 = vpop.f32.mrf.mxu1 }
 0x192   : > { %v2035_v48 = vadd.f32 %v1953_v59, %v1785_v31  ;;  %v1536_v21 = vadd.f32 %v1455_v9, %v5153_v57  ;;  %v5673_v9 = vld [vmem:[#allocation8_spill] sm:$0xff] }
 0x194   : > { %v5405_v15 = vadd.f32 %v2204_v47, %v2035_v48  ;;  %v5674_v48 = vld [vmem:[#allocation15_spill] sm:$0xff] }
 0x195   : > { %v2206_v56 = vpop.f32.mrf.mxu0 }
 0x197   : > { %v1705_v46 = vpop.f32.mrf.mxu2 }
 0x198   : > { %v1786_v30 = vadd.f32 %v1705_v46, %v1536_v21  ;;  %v1955_v49 = vpop.f32.mrf.mxu3  ;;  %v5675_v46 = vld [vmem:[#allocation20_spill] sm:$0xff] }
 0x199   : > { %v1458_v50 = vpop.f32.mrf.mxu1 }
 0x19a   : > { %v2036_v27 = vadd.f32 %v1955_v49, %v1786_v30  ;;  %v1537_v63 = vadd.f32 %v1458_v50, %v5168_v6 }
 0x19c   : > { %2418 = vmatmul.bf16.gmra.mxu1 %v5053_v54  ;;  %2668 = vmatmul.bf16.gmra.mxu2 %v4704_v28  ;;  %v5410_v5 = vadd.f32 %v2206_v56, %v2036_v27  ;;  %v5671_v54 = vld [vmem:[#allocation25_spill] sm:$0xff] }
 0x19d   : > { %v2209_v62 = vpop.f32.mrf.mxu0  ;;  %2919 = vmatmul.bf16.gmra.mxu3 %v4642_v37  ;;  %v5672_v37 = vld [vmem:[#allocation9_spill] sm:$0xff] }
 0x19f   : > { %v1708_v14 = vpop.f32.mrf.mxu2 }
 0x1a0   : > { %3169 = vmatmul.bf16.gmra.mxu0 %v5670_v61  ;;  %v1787_v57 = vadd.f32 %v1708_v14, %v1537_v63  ;;  %v1958_v55 = vpop.f32.mrf.mxu3  ;;  %v5676_v14 = vld [vmem:[#allocation16_spill] sm:$0xff] }
 0x1a1   : > { %v1460_v2 = vpop.f32.mrf.mxu1 }
 0x1a2   : > { %v2037_v26 = vadd.f32 %v1958_v55, %v1787_v57  ;;  %v1538_v34 = vadd.f32 %v1460_v2, %v5671_v54  ;;  %v5677_v54 = vld [vmem:[#allocation13_spill] sm:$0xff] }
 0x1a4   : > { %v5415_v40 = vadd.f32 %v2209_v62, %v2037_v26 }
 0x1a5   : > { %v2211_v10 = vpop.f32.mrf.mxu0 }
 0x1a7   : > { %v1710_v28 = vpop.f32.mrf.mxu2 }
 0x1a8   : > { %v1788_v47 = vadd.f32 %v1710_v28, %v1538_v34  ;;  %v1960_v0 = vpop.f32.mrf.mxu3 }
 0x1a9   : > { %v1463_v36 = vpop.f32.mrf.mxu1 }
 0x1aa   : > { %v2038_v31 = vadd.f32 %v1960_v0, %v1788_v47  ;;  %v1539_v56 = vadd.f32 %v1463_v36, %v5674_v48  ;;  %v5678_v47 = vld [vmem:[#allocation12_spill] sm:$0xff]  ;;  %v5679_v0 = vld [vmem:[#allocation18_spill] sm:$0xff] }
 0x1ac   : > { %2423 = vmatmul.bf16.gmra.mxu1 %v5670_v61  ;;  %2673 = vmatmul.bf16.gmra.mxu2 %v5672_v37  ;;  %v5420_v6 = vadd.f32 %v2211_v10, %v2038_v31  ;;  %v5680_v37 = vld [vmem:[#allocation23_spill] sm:$0xff] }
 0x1ad   : > { %v2214_v59 = vpop.f32.mrf.mxu0  ;;  %2924 = vmatmul.bf16.gmra.mxu3 %v5673_v9 }
 0x1af   : > { %v1713_v21 = vpop.f32.mrf.mxu2 }
 0x1b0   : > { %3174 = vmatmul.bf16.gmra.mxu0 %v5675_v46  ;;  %v1789_v30 = vadd.f32 %v1713_v21, %v1539_v56  ;;  %v1963_v49 = vpop.f32.mrf.mxu3 }
 0x1b1   : > { %v1465_v50 = vpop.f32.mrf.mxu1 }
 0x1b2   : > { %v2039_v27 = vadd.f32 %v1963_v49, %v1789_v30  ;;  %v1540_v61 = vadd.f32 %v1465_v50, %v5676_v14 }
 0x1b4   : > { %v5425_v62 = vadd.f32 %v2214_v59, %v2039_v27 }
 0x1b5   : > { %v2216_v63 = vpop.f32.mrf.mxu0 }
 0x1b7   : > { %v1715_v57 = vpop.f32.mrf.mxu2 }
 0x1b8   : > { %v1790_v55 = vadd.f32 %v1715_v57, %v1540_v61  ;;  %v1965_v2 = vpop.f32.mrf.mxu3  ;;  %v5682_v57 = vld [vmem:[#allocation6_spill] sm:$0xff] }
 0x1b9   : > { %v1468_v26 = vpop.f32.mrf.mxu1 }
 0x1ba   : > { %v2040_v10 = vadd.f32 %v1965_v2, %v1790_v55  ;;  %v1541_v36 = vadd.f32 %v1468_v26, %v5679_v0  ;;  %v5683_v26 = vld [vmem:[#allocation5_spill] sm:$0xff] }
 0x1bc   : > { %2428 = vmatmul.bf16.gmra.mxu1 %v5675_v46  ;;  %2678 = vmatmul.bf16.gmra.mxu2 %v5677_v54  ;;  %v5430_v34 = vadd.f32 %v2216_v63, %v2040_v10  ;;  %v5681_v46 = vld [vmem:[#allocation19_spill] sm:$0xff]  ;;  %v5684_v10 = vld [vmem:[#allocation21_spill] sm:$0xff] }
 0x1bd   : > { %v2219_v28 = vpop.f32.mrf.mxu0  ;;  %2929 = vmatmul.bf16.gmra.mxu3 %v5678_v47  ;;  %v5685_v47 = vld [vmem:[#allocation27_spill] sm:$0xff] }
 0x1bf   : > { %v1718_v31 = vpop.f32.mrf.mxu2 }
 0x1c0   : > { %3179 = vmatmul.bf16.gmra.mxu0 %v5680_v37  ;;  %v1791_v59 = vadd.f32 %v1718_v31, %v1541_v36  ;;  %v1968_v9 = vpop.f32.mrf.mxu3 }
 0x1c1   : > { %v1470_v48 = vpop.f32.mrf.mxu1 }
 0x1c2   : > { %v2041_v56 = vadd.f32 %v1968_v9, %v1791_v59  ;;  %v1542_v49 = vadd.f32 %v1470_v48, %v5681_v46 }
 0x1c4   : > { %v5435_v21 = vadd.f32 %v2219_v28, %v2041_v56 }
 0x1c5   : > { %v2221_v30 = vpop.f32.mrf.mxu0 }
 0x1c7   : > { %v1720_v50 = vpop.f32.mrf.mxu2 }
 0x1c8   : > { %v1792_v27 = vadd.f32 %v1720_v50, %v1542_v49  ;;  %v1970_v63 = vpop.f32.mrf.mxu3 }
 0x1c9   : > { %v1473_v14 = vpop.f32.mrf.mxu1 }
 0x1ca   : > { %v2042_v61 = vadd.f32 %v1970_v63, %v1792_v27  ;;  %v1543_v54 = vadd.f32 %v1473_v14, %v5684_v10  ;;  %v5687_v63 = vld [vmem:[#allocation7_spill] sm:$0xff]  ;;  %v5689_v10 = vld [vmem:[#allocation29_spill] sm:$0xff] }
 0x1cc   : > { %2433 = vmatmul.bf16.gmra.mxu1 %v5680_v37  ;;  %2683 = vmatmul.bf16.gmra.mxu2 %v5682_v57  ;;  %v5440_v55 = vadd.f32 %v2221_v30, %v2042_v61  ;;  %v5686_v37 = vld [vmem:[#allocation22_spill] sm:$0xff]  ;;  %v5688_v57 = vld [vmem:[#allocation24_spill] sm:$0xff] }
 0x1cd   : > { %v2224_v2 = vpop.f32.mrf.mxu0  ;;  %2934 = vmatmul.bf16.gmra.mxu3 %v5683_v26 }
 0x1cf   : > { %v1723_v28 = vpop.f32.mrf.mxu2 }
 0x1d0   : > { %3184 = vmatmul.bf16.gmra.mxu0 %v5685_v47  ;;  %v1793_v0 = vadd.f32 %v1723_v28, %v1543_v54  ;;  %v1973_v36 = vpop.f32.mrf.mxu3 }
 0x1d1   : > { %v1475_v31 = vpop.f32.mrf.mxu1 }
 0x1d2   : > { %v2043_v59 = vadd.f32 %v1973_v36, %v1793_v0  ;;  %v1544_v56 = vadd.f32 %v1475_v31, %v5686_v37 }
 0x1d4   : > { %v5445_v9 = vadd.f32 %v2224_v2, %v2043_v59 }
 0x1d5   : > { %v2226_v48 = vpop.f32.mrf.mxu0 }
 0x1d7   : > { %v1725_v46 = vpop.f32.mrf.mxu2 }
 0x1d8   : > { %v1794_v30 = vadd.f32 %v1725_v46, %v1544_v56  ;;  %v1975_v49 = vpop.f32.mrf.mxu3 }
 0x1d9   : > { %v1478_v50 = vpop.f32.mrf.mxu1 }
 0x1da   : > { %v2044_v27 = vadd.f32 %v1975_v49, %v1794_v30  ;;  %v1545_v2 = vadd.f32 %v1478_v50, %v5688_v57 }
 0x1dc   : > { %2438 = vmatmul.bf16.gmra.mxu1 %v5685_v47  ;;  %2688 = vmatmul.bf16.gmra.mxu2 %v5687_v63  ;;  %v5450_v14 = vadd.f32 %v2226_v48, %v2044_v27  ;;  %v5690_v47 = vld [vmem:[#allocation26_spill] sm:$0xff]  ;;  %v5692_v63 = vld [vmem:[#allocation28_spill] sm:$0xff] }
 0x1dd   : > { %v2229_v61 = vpop.f32.mrf.mxu0  ;;  %2939 = vmatmul.bf16.gmra.mxu3 %v4687_v8  ;;  %v5691_v8 = vld [vmem:[#allocation10_spill] sm:$0xff] }
 0x1df   : > { %v1728_v26 = vpop.f32.mrf.mxu2 }
 0x1e0   : > { %3189 = vmatmul.bf16.gmra.mxu0 %v5689_v10  ;;  %v1795_v54 = vadd.f32 %v1728_v26, %v1545_v2  ;;  %v1978_v28 = vpop.f32.mrf.mxu3 }
 0x1e1   : > { %v1480_v0 = vpop.f32.mrf.mxu1 }
 0x1e2   : > { %v2045_v36 = vadd.f32 %v1978_v28, %v1795_v54  ;;  %v1546_v37 = vadd.f32 %v1480_v0, %v5690_v47 }
 0x1e4   : > { %v5455_v31 = vadd.f32 %v2229_v61, %v2045_v36  ;;  %v5693_v36 = vld [vmem:[#allocation30_spill] sm:$0xff] }
 0x1e5   : > { %v2231_v59 = vpop.f32.mrf.mxu0 }
 0x1e7   : > { %v1730_v56 = vpop.f32.mrf.mxu2 }
 0x1e8   : > { %v1796_v48 = vadd.f32 %v1730_v56, %v1546_v37  ;;  %v1980_v46 = vpop.f32.mrf.mxu3 }
 0x1e9   : > { %v2404_v30 = vpop.f32.mrf.mxu1 }
 0x1ea   : > { %v2046_v49 = vadd.f32 %v1980_v46, %v1796_v48  ;;  %v2516_v61 = vadd.f32 %v2404_v30, %v5692_v63 }
 0x1ec   : > { %2443 = vmatmul.bf16.gmra.mxu1 %v5689_v10  ;;  %2693 = vmatmul.bf16.gmra.mxu2 %v5691_v8  ;;  %v5460_v50 = vadd.f32 %v2231_v59, %v2046_v49 }
 0x1ed   : > { %v3155_v27 = vpop.f32.mrf.mxu0  ;;  %2944 = vmatmul.bf16.gmra.mxu3 %v4808_v43 }
 0x1ef   : > { %v2654_v57 = vpop.f32.mrf.mxu2 }
 0x1f0   : > { %3194 = vmatmul.bf16.gmra.mxu0 %v5233_v44  ;;  %v2905_v2 = vpop.f32.mrf.mxu3  ;;  %v2766_v26 = vadd.f32 %v2654_v57, %v2516_v61 }
 0x1f1   : > { %v2406_v54 = vpop.f32.mrf.mxu1 }
 0x1f2   : > { %v3017_v28 = vadd.f32 %v2905_v2, %v2766_v26  ;;  %v2517_v10 = vadd.f32 %v2406_v54, %v5693_v36 }
 0x1f4   : > { %v3267_v56 = vadd.f32 %v3155_v27, %v3017_v28 }
 0x1f5   : > { %v3157_v0 = vpop.f32.mrf.mxu0 }
 0x1f6   : > { %v3464_v30 = vmul.f32 %v3267_v56, %v3267_v56 }
 0x1f7   : > { %v2656_v47 = vpop.f32.mrf.mxu2 }
 0x1f8   : > { %v2767_v37 = vadd.f32 %v2656_v47, %v2517_v10  ;;  %v2907_v59 = vpop.f32.mrf.mxu3 }
 0x1f9   : > { %v2409_v48 = vpop.f32.mrf.mxu1 }
 0x1fa   : > { %v3018_v46 = vadd.f32 %v2907_v59, %v2767_v37  ;;  %v2518_v61 = vadd.f32 %v2409_v48, %v5227_v19 }
 0x1fc   : > { %v3268_v43 = vadd.f32 %v3157_v0, %v3018_v46  ;;  %2448 = vmatmul.bf16.gmra.mxu1 %v5233_v44  ;;  %2698 = vmatmul.bf16.gmra.mxu2 %v4955_v20 }
 0x1fd   : > { %v3160_v49 = vpop.f32.mrf.mxu0  ;;  %2949 = vmatmul.bf16.gmra.mxu3 %v4917_v42 }
 0x1fe   : > { %v4289_v8 = vpack.c.bf16 %v3268_v43, %v3267_v56  ;;  %v3427_v27 = vadd.f32 %v3268_v43, %v3267_v56  ;;  %v3465_v63 = vmul.f32 %v3268_v43, %v3268_v43 }
 0x1ff   : > { %v2659_v57 = vpop.f32.mrf.mxu2 }
 0x200   : > { %4290 = vst [vmem:[%s5473_s29] sm:$0xff] %v4289_v8   ;;  %v3496_v44 = vadd.f32 %v3465_v63, %v3464_v30  ;;  %3199 = vmatmul.bf16.gmra.mxu0 %v5263_v33  ;;  %v2768_v20 = vadd.f32 %v2659_v57, %v2518_v61  ;;  %v2910_v2 = vpop.f32.mrf.mxu3 }
 0x201   : > { %v2411_v26 = vpop.f32.mrf.mxu1 }
 0x202   : > { %v3019_v54 = vadd.f32 %v2910_v2, %v2768_v20  ;;  %v2519_v42 = vadd.f32 %v2411_v26, %v5238_v7 }
 0x204   : > { %v3269_v28 = vadd.f32 %v3160_v49, %v3019_v54 }
 0x205   : > { %v3162_v0 = vpop.f32.mrf.mxu0 }
 0x206   : > { %v3428_v36 = vadd.f32 %v3427_v27, %v3269_v28  ;;  %v3466_v10 = vmul.f32 %v3269_v28, %v3269_v28  ;;  %v5694_v27 = vld [vmem:[#allocation31_spill] sm:$0xff] }
 0x207   : > { %v2661_v47 = vpop.f32.mrf.mxu2 }
 0x208   : > { %v3497_v37 = vadd.f32 %v3496_v44, %v3466_v10  ;;  %v2769_v59 = vadd.f32 %v2661_v47, %v2519_v42  ;;  %v2912_v19 = vpop.f32.mrf.mxu3 }
 0x209   : > { %v2414_v56 = vpop.f32.mrf.mxu1 }
 0x20a   : > { %v3020_v48 = vadd.f32 %v2912_v19, %v2769_v59  ;;  %v2520_v7 = vadd.f32 %v2414_v56, %v5694_v27  ;;  %v5697_v27 = vld [vmem:[#allocation36_spill] sm:$0xff] }
 0x20c   : > { %v3270_v46 = vadd.f32 %v3162_v0, %v3020_v48  ;;  %2453 = vmatmul.bf16.gmra.mxu1 %v5263_v33  ;;  %2703 = vmatmul.bf16.gmra.mxu2 %v4665_v52  ;;  %v5695_v0 = vld [vmem:[#allocation32_spill] sm:$0xff] }
 0x20d   : > { %v3165_v43 = vpop.f32.mrf.mxu0  ;;  %2954 = vmatmul.bf16.gmra.mxu3 %v4618_v13 }
 0x20e   : > { %v4294_v30 = vpack.c.bf16 %v3270_v46, %v3269_v28  ;;  %v3429_v49 = vadd.f32 %v3428_v36, %v3270_v46  ;;  %v3467_v8 = vmul.f32 %v3270_v46, %v3270_v46 }
 0x20f   : > { %v2664_v63 = vpop.f32.mrf.mxu2 }
 0x210   : > { %4381 = vst [vmem:[%s5473_s29 + $0x8] sm:$0xff] %v4294_v30   ;;  %v3498_v61 = vadd.f32 %v3497_v37, %v3467_v8  ;;  %3204 = vmatmul.bf16.gmra.mxu0 %v5281_v39  ;;  %v2770_v57 = vadd.f32 %v2664_v63, %v2520_v7  ;;  %v2915_v44 = vpop.f32.mrf.mxu3 }
 0x211   : > { %v2416_v20 = vpop.f32.mrf.mxu1 }
 0x212   : > { %v3021_v2 = vadd.f32 %v2915_v44, %v2770_v57  ;;  %v2521_v13 = vadd.f32 %v2416_v20, %v5695_v0 }
 0x214   : > { %v3271_v33 = vadd.f32 %v3165_v43, %v3021_v2  ;;  %v5696_v43 = vld [vmem:[#allocation33_spill] sm:$0xff]  ;;  %v5698_v2 = vld [vmem:[#allocation34_spill] sm:$0xff] }
 0x215   : > { %v3167_v26 = vpop.f32.mrf.mxu0 }
 0x216   : > { %v3430_v52 = vadd.f32 %v3429_v49, %v3271_v33  ;;  %v3468_v54 = vmul.f32 %v3271_v33, %v3271_v33 }
 0x217   : > { %v2666_v28 = vpop.f32.mrf.mxu2 }
 0x218   : > { %v3499_v36 = vadd.f32 %v3498_v61, %v3468_v54  ;;  %v2771_v10 = vadd.f32 %v2666_v28, %v2521_v13  ;;  %v2917_v42 = vpop.f32.mrf.mxu3 }
 0x219   : > { %v2419_v47 = vpop.f32.mrf.mxu1 }
 0x21a   : > { %v3022_v59 = vadd.f32 %v2917_v42, %v2771_v10  ;;  %v2522_v30 = vadd.f32 %v2419_v47, %v5696_v43 }
 0x21c   : > { %v3272_v37 = vadd.f32 %v3167_v26, %v3022_v59  ;;  %2458 = vmatmul.bf16.gmra.mxu1 %v5281_v39  ;;  %2708 = vmatmul.bf16.gmra.mxu2 %v4784_v3 }
 0x21d   : > { %v3170_v19 = vpop.f32.mrf.mxu0  ;;  %2959 = vmatmul.bf16.gmra.mxu3 %v4730_v60 }
 0x21e   : > { %v4299_v56 = vpack.c.bf16 %v3272_v37, %v3271_v33  ;;  %v3431_v48 = vadd.f32 %v3430_v52, %v3272_v37  ;;  %v3469_v46 = vmul.f32 %v3272_v37, %v3272_v37  ;;  %v5700_v37 = vld [vmem:[#allocation35_spill] sm:$0xff] }
 0x21f   : > { %v2669_v49 = vpop.f32.mrf.mxu2 }
 0x220   : > { %4382 = vst [vmem:[%s5473_s29 + $0x10] sm:$0xff] %v4299_v56   ;;  %v3500_v8 = vadd.f32 %v3499_v36, %v3469_v46  ;;  %3209 = vmatmul.bf16.gmra.mxu0 %v5697_v27  ;;  %v2772_v7 = vadd.f32 %v2669_v49, %v2522_v30  ;;  %v2920_v63 = vpop.f32.mrf.mxu3  ;;  %v5699_v36 = vld [vmem:[#allocation11_spill] sm:$0xff] }
 0x221   : > { %v2421_v61 = vpop.f32.mrf.mxu1 }
 0x222   : > { %v3023_v57 = vadd.f32 %v2920_v63, %v2772_v7  ;;  %v2523_v60 = vadd.f32 %v2421_v61, %v5698_v2  ;;  %v5701_v61 = vld [vmem:[#allocation37_spill] sm:$0xff] }
 0x224   : > { %v3273_v39 = vadd.f32 %v3170_v19, %v3023_v57 }
 0x225   : > { %v3172_v44 = vpop.f32.mrf.mxu0 }
 0x226   : > { %v3432_v3 = vadd.f32 %v3431_v48, %v3273_v39  ;;  %v3470_v20 = vmul.f32 %v3273_v39, %v3273_v39 }
 0x227   : > { %v2671_v33 = vpop.f32.mrf.mxu2 }
 0x228   : > { %v3501_v26 = vadd.f32 %v3500_v8, %v3470_v20  ;;  %v2773_v52 = vadd.f32 %v2671_v33, %v2523_v60  ;;  %v2922_v54 = vpop.f32.mrf.mxu3 }
 0x229   : > { %v2424_v0 = vpop.f32.mrf.mxu1 }
 0x22a   : > { %v3024_v13 = vadd.f32 %v2922_v54, %v2773_v52  ;;  %v2524_v19 = vadd.f32 %v2424_v0, %v5700_v37 }
 0x22c   : > { %v3274_v28 = vadd.f32 %v3172_v44, %v3024_v13  ;;  %2463 = vmatmul.bf16.gmra.mxu1 %v5697_v27  ;;  %2713 = vmatmul.bf16.gmra.mxu2 %v5699_v36 }
 0x22d   : > { %v3175_v10 = vpop.f32.mrf.mxu0  ;;  %2964 = vmatmul.bf16.gmra.mxu3 %v4845_v41 }
 0x22e   : > { %v4304_v42 = vpack.c.bf16 %v3274_v28, %v3273_v39  ;;  %v3433_v47 = vadd.f32 %v3432_v3, %v3274_v28  ;;  %v3471_v59 = vmul.f32 %v3274_v28, %v3274_v28 }
 0x22f   : > { %v2674_v56 = vpop.f32.mrf.mxu2 }
 0x230   : > { %4383 = vst [vmem:[%s5473_s29 + $0x18] sm:$0xff] %v4304_v42   ;;  %v3502_v48 = vadd.f32 %v3501_v26, %v3471_v59  ;;  %3214 = vmatmul.bf16.gmra.mxu0 %v5336_v1  ;;  %v2774_v46 = vadd.f32 %v2674_v56, %v2524_v19  ;;  %v2925_v43 = vpop.f32.mrf.mxu3 }
 0x231   : > { %v2426_v30 = vpop.f32.mrf.mxu1 }
 0x232   : > { %v3025_v49 = vadd.f32 %v2925_v43, %v2774_v46  ;;  %v2525_v41 = vadd.f32 %v2426_v30, %v5701_v61 }
 0x234   : > { %v3275_v8 = vadd.f32 %v3175_v10, %v3025_v49 }
 0x235   : > { %v3177_v27 = vpop.f32.mrf.mxu0 }
 0x236   : > { %v3434_v7 = vadd.f32 %v3433_v47, %v3275_v8  ;;  %v3472_v63 = vmul.f32 %v3275_v8, %v3275_v8 }
 0x237   : > { %v2676_v57 = vpop.f32.mrf.mxu2 }
 0x238   : > { %v3503_v39 = vadd.f32 %v3502_v48, %v3472_v63  ;;  %v2775_v44 = vadd.f32 %v2676_v57, %v2525_v41  ;;  %v2927_v3 = vpop.f32.mrf.mxu3 }
 0x239   : > { %v2429_v20 = vpop.f32.mrf.mxu1 }
 0x23a   : > { %v3026_v2 = vadd.f32 %v2927_v3, %v2775_v44  ;;  %v2526_v0 = vadd.f32 %v2429_v20, %v5329_v17 }
 0x23c   : > { %v3276_v60 = vadd.f32 %v3177_v27, %v3026_v2  ;;  %2468 = vmatmul.bf16.gmra.mxu1 %v5336_v1  ;;  %2718 = vmatmul.bf16.gmra.mxu2 %v4963_v25  ;;  %v1085_v25 = vrot.slane %v1004_v18, 1 }
 0x23d   : > { %v3180_v33 = vpop.f32.mrf.mxu0  ;;  %2969 = vmatmul.bf16.gmra.mxu3 %v4937_v16 }
 0x23e   : > { %v4309_v26 = vpack.c.bf16 %v3276_v60, %v3275_v8  ;;  %v3435_v52 = vadd.f32 %v3434_v7, %v3276_v60  ;;  %v3473_v54 = vmul.f32 %v3276_v60, %v3276_v60  ;;  %v1086_v30 = vor.u32 %v1085_v25, %v1001_v11 }
 0x23f   : > { %v2679_v13 = vpop.f32.mrf.mxu2 }
 0x240   : > { %4384 = vst [vmem:[%s5473_s29 + $0x20] sm:$0xff] %v4309_v26   ;;  %v3504_v28 = vadd.f32 %v3503_v39, %v3473_v54  ;;  %3219 = vmatmul.bf16.gmra.mxu0 %v5362_v29  ;;  %v2776_v36 = vadd.f32 %v2679_v13, %v2526_v0  ;;  %v2930_v10 = vpop.f32.mrf.mxu3  ;;  %v5702_v0 = vld [vmem:[#allocation4_spill] sm:$0xff] }
 0x241   : > { %v2431_v42 = vpop.f32.mrf.mxu1 }
 0x242   : > { %v3027_v47 = vadd.f32 %v2930_v10, %v2776_v36  ;;  %v2527_v19 = vadd.f32 %v2431_v42, %v5342_v35  ;;  %v1126_v35 = vsel %vm4977_vm5, %v1086_v30, 0 }
 0x244   : > { %v3277_v1 = vadd.f32 %v3180_v33, %v3027_v47 }
 0x245   : > { %v3182_v59 = vpop.f32.mrf.mxu0 }
 0x246   : > { %v3436_v16 = vadd.f32 %v3435_v52, %v3277_v1  ;;  %v3474_v37 = vmul.f32 %v3277_v1, %v3277_v1 }
 0x247   : > { %v2681_v56 = vpop.f32.mrf.mxu2 }
 0x248   : > { %v3505_v17 = vadd.f32 %v3504_v28, %v3474_v37  ;;  %v2777_v48 = vadd.f32 %v2681_v56, %v2527_v19  ;;  %v2932_v46 = vpop.f32.mrf.mxu3  ;;  %v5703_v28 = vld [vmem:[#allocation3_spill] sm:$0xff] }
 0x249   : > { %v2434_v43 = vpop.f32.mrf.mxu1 }
 0x24a   : > { %v3028_v49 = vadd.f32 %v2932_v46, %v2777_v48  ;;  %v2528_v61 = vadd.f32 %v2434_v43, %v5353_v22 }
 0x24c   : > { %v3278_v8 = vadd.f32 %v3182_v59, %v3028_v49  ;;  %2473 = vmatmul.bf16.gmra.mxu1 %v5362_v29  ;;  %2723 = vmatmul.bf16.gmra.mxu2 %v5366_v32  ;;  %v5704_v59 = vld [vmem:[#allocation14_spill] sm:$0xff] }
 0x24d   : > { %v3185_v18 = vpop.f32.mrf.mxu0  ;;  %2974 = vmatmul.bf16.gmra.mxu3 %v5338_v51 }
 0x24e   : > { %v4314_v27 = vpack.c.bf16 %v3278_v8, %v3277_v1  ;;  %v3437_v7 = vadd.f32 %v3436_v16, %v3278_v8  ;;  %v3475_v63 = vmul.f32 %v3278_v8, %v3278_v8 }
 0x24f   : > { %v2684_v41 = vpop.f32.mrf.mxu2 }
 0x250   : > { %4385 = vst [vmem:[%s5473_s29 + $0x28] sm:$0xff] %v4314_v27   ;;  %v3506_v11 = vadd.f32 %v3505_v17, %v3475_v63  ;;  %3224 = vmatmul.bf16.gmra.mxu0 %v1126_v35  ;;  %v2778_v57 = vadd.f32 %v2684_v41, %v2528_v61  ;;  %v2935_v39 = vpop.f32.mrf.mxu3 }
 0x251   : > { %v2436_v29 = vpop.f32.mrf.mxu1 }
 0x252   : > { %v3029_v44 = vadd.f32 %v2935_v39, %v2778_v57  ;;  %v2529_v58 = vadd.f32 %v2436_v29, %v5370_v23 }
 0x254   : > { %v3279_v32 = vadd.f32 %v3185_v18, %v3029_v44 }
 0x255   : > { %v3187_v3 = vpop.f32.mrf.mxu0 }
 0x256   : > { %v3438_v20 = vadd.f32 %v3437_v7, %v3279_v32  ;;  %v3476_v51 = vmul.f32 %v3279_v32, %v3279_v32 }
 0x257   : > { %v2686_v2 = vpop.f32.mrf.mxu2 }
 0x258   : > { %v3507_v60 = vadd.f32 %v3506_v11, %v3476_v51  ;;  %v2779_v33 = vadd.f32 %v2686_v2, %v2529_v58  ;;  %v2937_v26 = vpop.f32.mrf.mxu3 }
 0x259   : > { %v2439_v22 = vpop.f32.mrf.mxu1 }
 0x25a   : > { %v3030_v52 = vadd.f32 %v2937_v26, %v2779_v33  ;;  %v2530_v47 = vadd.f32 %v2439_v22, %v5375_v53 }
 0x25c   : > { %v3280_v54 = vadd.f32 %v3187_v3, %v3030_v52  ;;  %2478 = vmatmul.bf16.gmra.mxu1 %v1126_v35  ;;  %2728 = vmatmul.bf16.gmra.mxu2 %v5702_v0 }
 0x25d   : > { %v3190_v13 = vpop.f32.mrf.mxu0  ;;  %2979 = vmatmul.bf16.gmra.mxu3 %v5703_v28 }
 0x25e   : > { %v4319_v36 = vpack.c.bf16 %v3280_v54, %v3279_v32  ;;  %v3439_v10 = vadd.f32 %v3438_v20, %v3280_v54  ;;  %v3477_v42 = vmul.f32 %v3280_v54, %v3280_v54 }
 0x25f   : > { %v2689_v23 = vpop.f32.mrf.mxu2 }
 0x260   : > { %4386 = vst [vmem:[%s5473_s29 + $0x30] sm:$0xff] %v4319_v36   ;;  %v3508_v1 = vadd.f32 %v3507_v60, %v3477_v42  ;;  %3229 = vmatmul.bf16.gmra.mxu0 %v5704_v59  ;;  %v2780_v25 = vadd.f32 %v2689_v23, %v2530_v47  ;;  %v2940_v16 = vpop.f32.mrf.mxu3 }
 0x261   : > { %v2441_v37 = vpop.f32.mrf.mxu1 }
 0x262   : > { %v3031_v19 = vadd.f32 %v2940_v16, %v2780_v25  ;;  %v2531_v43 = vadd.f32 %v2441_v37, %v5380_v38 }
 0x264   : > { %v3281_v56 = vadd.f32 %v3190_v13, %v3031_v19 }
 0x265   : > { %v3192_v17 = vpop.f32.mrf.mxu0 }
 0x266   : > { %v3440_v48 = vadd.f32 %v3439_v10, %v3281_v56  ;;  %v3478_v46 = vmul.f32 %v3281_v56, %v3281_v56 }
 0x267   : > { %v2691_v30 = vpop.f32.mrf.mxu2 }
 0x268   : > { %v3509_v49 = vadd.f32 %v3508_v1, %v3478_v46  ;;  %v2781_v8 = vadd.f32 %v2691_v30, %v2531_v43  ;;  %v2942_v53 = vpop.f32.mrf.mxu3 }
 0x269   : > { %v2444_v18 = vpop.f32.mrf.mxu1 }
 0x26a   : > { %v3032_v35 = vadd.f32 %v2942_v53, %v2781_v8  ;;  %v2532_v11 = vadd.f32 %v2444_v18, %v5385_v12 }
 0x26c   : > { %v3282_v27 = vadd.f32 %v3192_v17, %v3032_v35 }
 0x26d   : > { %v3195_v7 = vpop.f32.mrf.mxu0 }
 0x26e   : > { %v4324_v63 = vpack.c.bf16 %v3282_v27, %v3281_v56  ;;  %v3441_v61 = vadd.f32 %v3440_v48, %v3282_v27  ;;  %v3479_v41 = vmul.f32 %v3282_v27, %v3282_v27 }
 0x26f   : > { %v2694_v57 = vpop.f32.mrf.mxu2 }
 0x270   : > { %4387 = vst [vmem:[%s5473_s29 + $0x38] sm:$0xff] %v4324_v63   ;;  %v3510_v39 = vadd.f32 %v3509_v49, %v3479_v41  ;;  %v2782_v29 = vadd.f32 %v2694_v57, %v2532_v11  ;;  %v2945_v44 = vpop.f32.mrf.mxu3 }
 0x271   : > { %v2446_v32 = vpop.f32.mrf.mxu1 }
 0x272   : > { %v3033_v38 = vadd.f32 %v2945_v44, %v2782_v29  ;;  %v2533_v2 = vadd.f32 %v2446_v32, %v5390_v24 }
 0x274   : > { %v3283_v3 = vadd.f32 %v3195_v7, %v3033_v38 }
 0x275   : > { %v3197_v20 = vpop.f32.mrf.mxu0 }
 0x276   : > { %v3442_v51 = vadd.f32 %v3441_v61, %v3283_v3  ;;  %v3480_v58 = vmul.f32 %v3283_v3, %v3283_v3 }
 0x277   : > { %v2696_v60 = vpop.f32.mrf.mxu2 }
 0x278   : > { %v3511_v33 = vadd.f32 %v3510_v39, %v3480_v58  ;;  %v2783_v26 = vadd.f32 %v2696_v60, %v2533_v2  ;;  %v2947_v22 = vpop.f32.mrf.mxu3 }
 0x279   : > { %v2449_v52 = vpop.f32.mrf.mxu1 }
 0x27a   : > { %v3034_v12 = vadd.f32 %v2947_v22, %v2783_v26  ;;  %v2534_v10 = vadd.f32 %v2449_v52, %v5395_v4 }
 0x27c   : > { %v3284_v54 = vadd.f32 %v3197_v20, %v3034_v12 }
 0x27d   : > { %v3200_v0 = vpop.f32.mrf.mxu0 }
 0x27e   : > { %v4329_v13 = vpack.c.bf16 %v3284_v54, %v3283_v3  ;;  %v3443_v28 = vadd.f32 %v3442_v51, %v3284_v54  ;;  %v3481_v36 = vmul.f32 %v3284_v54, %v3284_v54 }
 0x27f   : > { %v2699_v42 = vpop.f32.mrf.mxu2 }
 0x280   : > { %4388 = vst [vmem:[%s5473_s29 + $0x40] sm:$0xff] %v4329_v13   ;;  %v3512_v47 = vadd.f32 %v3511_v33, %v3481_v36  ;;  %v2784_v23 = vadd.f32 %v2699_v42, %v2534_v10  ;;  %v2950_v1 = vpop.f32.mrf.mxu3 }
 0x281   : > { %v2451_v59 = vpop.f32.mrf.mxu1 }
 0x282   : > { %v3035_v24 = vadd.f32 %v2950_v1, %v2784_v23  ;;  %v2535_v56 = vadd.f32 %v2451_v59, %v5400_v45 }
 0x284   : > { %v3285_v25 = vadd.f32 %v3200_v0, %v3035_v24 }
 0x285   : > { %v3202_v16 = vpop.f32.mrf.mxu0 }
 0x286   : > { %v3444_v37 = vadd.f32 %v3443_v28, %v3285_v25  ;;  %v3482_v19 = vmul.f32 %v3285_v25, %v3285_v25 }
 0x287   : > { %v2701_v17 = vpop.f32.mrf.mxu2 }
 0x288   : > { %v3513_v48 = vadd.f32 %v3512_v47, %v3482_v19  ;;  %v2785_v46 = vadd.f32 %v2701_v17, %v2535_v56  ;;  %v2952_v43 = vpop.f32.mrf.mxu3 }
 0x289   : > { %v2454_v30 = vpop.f32.mrf.mxu1 }
 0x28a   : > { %v3036_v4 = vadd.f32 %v2952_v43, %v2785_v46  ;;  %v2536_v27 = vadd.f32 %v2454_v30, %v5405_v15 }
 0x28c   : > { %v3286_v49 = vadd.f32 %v3202_v16, %v3036_v4 }
 0x28d   : > { %v3205_v8 = vpop.f32.mrf.mxu0 }
 0x28e   : > { %v4334_v53 = vpack.c.bf16 %v3286_v49, %v3285_v25  ;;  %v3445_v18 = vadd.f32 %v3444_v37, %v3286_v49  ;;  %v3483_v35 = vmul.f32 %v3286_v49, %v3286_v49 }
 0x28f   : > { %v2704_v7 = vpop.f32.mrf.mxu2 }
 0x290   : > { %4389 = vst [vmem:[%s5473_s29 + $0x48] sm:$0xff] %v4334_v53   ;;  %v3514_v63 = vadd.f32 %v3513_v48, %v3483_v35  ;;  %v2786_v61 = vadd.f32 %v2704_v7, %v2536_v27  ;;  %v2955_v41 = vpop.f32.mrf.mxu3 }
 0x291   : > { %v2456_v11 = vpop.f32.mrf.mxu1 }
 0x292   : > { %v3037_v45 = vadd.f32 %v2955_v41, %v2786_v61  ;;  %v2537_v32 = vadd.f32 %v2456_v11, %v5410_v5 }
 0x294   : > { %v3287_v57 = vadd.f32 %v3205_v8, %v3037_v45 }
 0x295   : > { %v3207_v39 = vpop.f32.mrf.mxu0 }
 0x296   : > { %v3446_v29 = vadd.f32 %v3445_v18, %v3287_v57  ;;  %v3484_v44 = vmul.f32 %v3287_v57, %v3287_v57 }
 0x297   : > { %v2706_v38 = vpop.f32.mrf.mxu2 }
 0x298   : > { %v3515_v3 = vadd.f32 %v3514_v63, %v3484_v44  ;;  %v2787_v20 = vadd.f32 %v2706_v38, %v2537_v32  ;;  %v2957_v51 = vpop.f32.mrf.mxu3 }
 0x299   : > { %v2459_v58 = vpop.f32.mrf.mxu1 }
 0x29a   : > { %v3038_v15 = vadd.f32 %v2957_v51, %v2787_v20  ;;  %v2538_v52 = vadd.f32 %v2459_v58, %v5415_v40 }
 0x29c   : > { %v3288_v2 = vadd.f32 %v3207_v39, %v3038_v15 }
 0x29d   : > { %v3210_v60 = vpop.f32.mrf.mxu0 }
 0x29e   : > { %v4339_v33 = vpack.c.bf16 %v3288_v2, %v3287_v57  ;;  %v3447_v26 = vadd.f32 %v3446_v29, %v3288_v2  ;;  %v3485_v22 = vmul.f32 %v3288_v2, %v3288_v2 }
 0x29f   : > { %v2709_v12 = vpop.f32.mrf.mxu2 }
 0x2a0   : > { %4390 = vst [vmem:[%s5473_s29 + $0x50] sm:$0xff] %v4339_v33   ;;  %v3516_v54 = vadd.f32 %v3515_v3, %v3485_v22  ;;  %v2788_v0 = vadd.f32 %v2709_v12, %v2538_v52  ;;  %v2960_v13 = vpop.f32.mrf.mxu3 }
 0x2a1   : > { %v2461_v28 = vpop.f32.mrf.mxu1 }
 0x2a2   : > { %v3039_v5 = vadd.f32 %v2960_v13, %v2788_v0  ;;  %v2539_v23 = vadd.f32 %v2461_v28, %v5420_v6 }
 0x2a4   : > { %v3289_v36 = vadd.f32 %v3210_v60, %v3039_v5 }
 0x2a5   : > { %v3212_v10 = vpop.f32.mrf.mxu0 }
 0x2a6   : > { %v3448_v42 = vadd.f32 %v3447_v26, %v3289_v36  ;;  %v3486_v47 = vmul.f32 %v3289_v36, %v3289_v36 }
 0x2a7   : > { %v2711_v1 = vpop.f32.mrf.mxu2 }
 0x2a8   : > { %v3517_v59 = vadd.f32 %v3516_v54, %v3486_v47  ;;  %v2789_v24 = vadd.f32 %v2711_v1, %v2539_v23  ;;  %v2962_v25 = vpop.f32.mrf.mxu3 }
 0x2a9   : > { %v2464_v16 = vpop.f32.mrf.mxu1 }
 0x2aa   : > { %v3040_v40 = vadd.f32 %v2962_v25, %v2789_v24  ;;  %v2540_v46 = vadd.f32 %v2464_v16, %v5425_v62 }
 0x2ac   : > { %v3290_v37 = vadd.f32 %v3212_v10, %v3040_v40 }
 0x2ad   : > { %v3215_v19 = vpop.f32.mrf.mxu0 }
 0x2ae   : > { %v4344_v56 = vpack.c.bf16 %v3290_v37, %v3289_v36  ;;  %v3449_v17 = vadd.f32 %v3448_v42, %v3290_v37  ;;  %v3487_v48 = vmul.f32 %v3290_v37, %v3290_v37 }
 0x2af   : > { %v2714_v43 = vpop.f32.mrf.mxu2 }
 0x2b0   : > { %4391 = vst [vmem:[%s5473_s29 + $0x58] sm:$0xff] %v4344_v56   ;;  %v3518_v30 = vadd.f32 %v3517_v59, %v3487_v48  ;;  %v2790_v4 = vadd.f32 %v2714_v43, %v2540_v46  ;;  %v2965_v49 = vpop.f32.mrf.mxu3 }
 0x2b1   : > { %v2466_v8 = vpop.f32.mrf.mxu1 }
 0x2b2   : > { %v3041_v6 = vadd.f32 %v2965_v49, %v2790_v4  ;;  %v2541_v7 = vadd.f32 %v2466_v8, %v5430_v34 }
 0x2b4   : > { %v3291_v53 = vadd.f32 %v3215_v19, %v3041_v6 }
 0x2b5   : > { %v3217_v18 = vpop.f32.mrf.mxu0 }
 0x2b6   : > { %v3450_v35 = vadd.f32 %v3449_v17, %v3291_v53  ;;  %v3488_v27 = vmul.f32 %v3291_v53, %v3291_v53 }
 0x2b7   : > { %v2716_v63 = vpop.f32.mrf.mxu2 }
 0x2b8   : > { %v3519_v61 = vadd.f32 %v3518_v30, %v3488_v27  ;;  %v2791_v41 = vadd.f32 %v2716_v63, %v2541_v7  ;;  %v2967_v11 = vpop.f32.mrf.mxu3 }
 0x2b9   : > { %v2469_v45 = vpop.f32.mrf.mxu1 }
 0x2ba   : > { %v3042_v62 = vadd.f32 %v2967_v11, %v2791_v41  ;;  %v2542_v38 = vadd.f32 %v2469_v45, %v5435_v21 }
 0x2bc   : > { %v3292_v57 = vadd.f32 %v3217_v18, %v3042_v62 }
 0x2bd   : > { %v3220_v39 = vpop.f32.mrf.mxu0 }
 0x2be   : > { %v4349_v29 = vpack.c.bf16 %v3292_v57, %v3291_v53  ;;  %v3451_v44 = vadd.f32 %v3450_v35, %v3292_v57  ;;  %v3489_v32 = vmul.f32 %v3292_v57, %v3292_v57 }
 0x2bf   : > { %v2719_v3 = vpop.f32.mrf.mxu2 }
 0x2c0   : > { %4392 = vst [vmem:[%s5473_s29 + $0x60] sm:$0xff] %v4349_v29   ;;  %v3520_v20 = vadd.f32 %v3519_v61, %v3489_v32  ;;  %v2792_v51 = vadd.f32 %v2719_v3, %v2542_v38  ;;  %v2970_v58 = vpop.f32.mrf.mxu3 }
 0x2c1   : > { %v2471_v15 = vpop.f32.mrf.mxu1 }
 0x2c2   : > { %v3043_v34 = vadd.f32 %v2970_v58, %v2792_v51  ;;  %v2543_v22 = vadd.f32 %v2471_v15, %v5440_v55 }
 0x2c4   : > { %v3293_v2 = vadd.f32 %v3220_v39, %v3043_v34 }
 0x2c5   : > { %v3222_v60 = vpop.f32.mrf.mxu0 }
 0x2c6   : > { %v3452_v33 = vadd.f32 %v3451_v44, %v3293_v2  ;;  %v3490_v26 = vmul.f32 %v3293_v2, %v3293_v2 }
 0x2c7   : > { %v2721_v52 = vpop.f32.mrf.mxu2 }
 0x2c8   : > { %v3521_v12 = vadd.f32 %v3520_v20, %v3490_v26  ;;  %v2793_v54 = vadd.f32 %v2721_v52, %v2543_v22  ;;  %v2972_v0 = vpop.f32.mrf.mxu3 }
 0x2c9   : > { %v2474_v13 = vpop.f32.mrf.mxu1 }
 0x2ca   : > { %v3044_v21 = vadd.f32 %v2972_v0, %v2793_v54  ;;  %v2544_v47 = vadd.f32 %v2474_v13, %v5445_v9 }
 0x2cc   : > { %v3294_v28 = vadd.f32 %v3222_v60, %v3044_v21 }
 0x2cd   : > { %v3225_v5 = vpop.f32.mrf.mxu0 }
 0x2ce   : > { %v4354_v36 = vpack.c.bf16 %v3294_v28, %v3293_v2  ;;  %v3453_v10 = vadd.f32 %v3452_v33, %v3294_v28  ;;  %v3491_v42 = vmul.f32 %v3294_v28, %v3294_v28 }
 0x2cf   : > { %v2724_v23 = vpop.f32.mrf.mxu2 }
 0x2d0   : > { %4393 = vst [vmem:[%s5473_s29 + $0x68] sm:$0xff] %v4354_v36   ;;  %v3522_v1 = vadd.f32 %v3521_v12, %v3491_v42  ;;  %v2794_v59 = vadd.f32 %v2724_v23, %v2544_v47  ;;  %v2975_v24 = vpop.f32.mrf.mxu3 }
 0x2d1   : > { %v2476_v25 = vpop.f32.mrf.mxu1 }
 0x2d2   : > { %v3045_v55 = vadd.f32 %v2975_v24, %v2794_v59  ;;  %v2545_v19 = vadd.f32 %v2476_v25, %v5450_v14 }
 0x2d4   : > { %v3295_v16 = vadd.f32 %v3225_v5, %v3045_v55 }
 0x2d5   : > { %v3227_v56 = vpop.f32.mrf.mxu0 }
 0x2d6   : > { %v3454_v40 = vadd.f32 %v3453_v10, %v3295_v16  ;;  %v3492_v37 = vmul.f32 %v3295_v16, %v3295_v16 }
 0x2d7   : > { %v2726_v17 = vpop.f32.mrf.mxu2 }
 0x2d8   : > { %v3523_v48 = vadd.f32 %v3522_v1, %v3492_v37  ;;  %v2795_v46 = vadd.f32 %v2726_v17, %v2545_v19  ;;  %v2977_v43 = vpop.f32.mrf.mxu3 }
 0x2d9   : > { %v2479_v30 = vpop.f32.mrf.mxu1 }
 0x2da   : > { %v3046_v9 = vadd.f32 %v2977_v43, %v2795_v46  ;;  %v2546_v53 = vadd.f32 %v2479_v30, %v5455_v31 }
 0x2dc   : > { %v3296_v4 = vadd.f32 %v3227_v56, %v3046_v9 }
 0x2dd   : > { %v3230_v63 = vpop.f32.mrf.mxu0 }
 0x2de   : > { %v4359_v49 = vpack.c.bf16 %v3296_v4, %v3295_v16  ;;  %v3455_v8 = vadd.f32 %v3454_v40, %v3296_v4  ;;  %v3493_v6 = vmul.f32 %v3296_v4, %v3296_v4 }
 0x2df   : > { %v2729_v18 = vpop.f32.mrf.mxu2 }
 0x2e0   : > { %4394 = vst [vmem:[%s5473_s29 + $0x70] sm:$0xff] %v4359_v49   ;;  %v3524_v35 = vadd.f32 %v3523_v48, %v3493_v6  ;;  %v2796_v27 = vadd.f32 %v2729_v18, %v2546_v53  ;;  %v2980_v7 = vpop.f32.mrf.mxu3 }
 0x2e1   : > { %v2481_v61 = vpop.f32.mrf.mxu1 }
 0x2e2   : > { %v3047_v14 = vadd.f32 %v2980_v7, %v2796_v27  ;;  %v2547_v62 = vadd.f32 %v2481_v61, %v5460_v50 }
 0x2e4   : > { %v3297_v41 = vadd.f32 %v3230_v63, %v3047_v14 }
 0x2e5   : > { %v3232_v31 = vpop.f32.mrf.mxu0 }
 0x2e6   : > { %v3456_v11 = vadd.f32 %v3455_v8, %v3297_v41  ;;  %v3494_v45 = vmul.f32 %v3297_v41, %v3297_v41 }
 0x2e7   : > { %v2731_v57 = vpop.f32.mrf.mxu2 }
 0x2e8   : > { %v3525_v39 = vadd.f32 %v3524_v35, %v3494_v45  ;;  %v2797_v29 = vadd.f32 %v2731_v57, %v2547_v62  ;;  %v2982_v44 = vpop.f32.mrf.mxu3 }
 0x2ea   : > { %v3048_v32 = vadd.f32 %v2982_v44, %v2797_v29 }
 0x2ec   : > { %v3298_v38 = vadd.f32 %v3232_v31, %v3048_v32 }
 0x2ee   : > { %v4364_v3 = vpack.c.bf16 %v3298_v38, %v3297_v41  ;;  %v3457_v20 = vadd.f32 %v3456_v11, %v3298_v38  ;;  %v3495_v51 = vmul.f32 %v3298_v38, %v3298_v38 }
 0x2f0   : > { %4395 = vst [vmem:[%s5473_s29 + $0x78] sm:$0xff] %v4364_v3   ;;  %v3458_v58 = vrot.slane %v3457_v20, 4  ;;  %v3526_v15 = vadd.f32 %v3525_v39, %v3495_v51 }
 0x2f2   : > { %v3459_v34 = vadd.f32 %v3458_v58, %v3457_v20  ;;  %v3527_v2 = vrot.slane %v3526_v15, 4 }
 0x2f4   : > { %v3460_v60 = vrot.slane %v3459_v34, 2  ;;  %v3528_v33 = vadd.f32 %v3527_v2, %v3526_v15 }
 0x2f6   : > { %v3461_v26 = vadd.f32 %v3460_v60, %v3459_v34  ;;  %v3529_v50 = vrot.slane %v3528_v33, 2 }
 0x2f8   : > { %v3462_v22 = vrot.slane %v3461_v26, 1  ;;  %v3530_v52 = vadd.f32 %v3529_v50, %v3528_v33 }
 0x2fa   : > { %v3531_v12 = vrot.slane %v3530_v52, 1  ;;  %v3463_v54 = vadd.f32 %v3462_v22, %v3461_v26 }
 0x2fc   : > { %v3532_v0 = vadd.f32 %v3531_v12, %v3530_v52 }
 0x2fe   : > { %v3534_v13 = vsel %vm1032_vm0, %v3463_v54, %v3532_v0 }
 0x2ff   : > { %v3536_v21 = vsel %vm3535_vm6, %v3534_v13, 0.0 }
 0x300   : > { %3537 = vst [vmem:[%s462_s10] sm:$0xff] %v3536_v21 }
 0x301 PF: > { %s18_s2 = sadd.s32 1, %s4471_s2   ;;  %s5705_s23 = smov %s4467_s24 }
 0x302   : > { %p15_p5 = scmp.ge.s32.totalorder %s18_s2, 4   ;;  %s5706_s24 = smov %s5708_s25 }
 0x304   :  { %17 = sbr.rel (!%p15_p5) target bundleno = 2 (0x2), region = 100 }

</bundles_post_ra>
